<compile_context>
chip_gen: v7x
topology: tpu7x:2x2x1
jax: 0.10.0
libtpu: 0.0.40
codegen_flags: <defaults>
</compile_context>

<pallas_src>
from functools import partial

import jax
import jax.numpy as jnp
import numpy as np
from jax import lax
from jax.experimental import pallas as pl
from jax.experimental.pallas import tpu as pltpu

BN_EPS = 1e-5
LANE = 128
SUB = 8


def _round_up(x, m):
    return ((x + m - 1) // m) * m


# --------------------------------- fused kernel -------------------------------------------------

def _make_kernel(*, S, TH, Ho, Wo, Wo_p, Hph, has_proj):
    """One grid step computes TH output rows of one image (grid = (batch, row_tiles))."""
    M1 = (TH + 2) * Wo_p          # conv1 rows per step (tile + 1-row halo on each side)
    M2 = TH * Wo_p                # conv2 / output rows per step
    C0 = 8                        # column where valid h1 starts inside the scratch (aligned)

    def kernel(x_ref, w1_ref, b1_ref, w2_ref, b2_ref, *rest):
        if has_proj:
            ws_ref, bs_ref, o_ref, h1_ref = rest
        else:
            o_ref, h1_ref = rest

        t = pl.program_id(1)
        cin_p = x_ref.shape[-1]
        cout_p = o_ref.shape[-1]
        xin = x_ref.at[0]                                   # ref view: (S*S*Hph, Wph, cin_p)

        # ---- conv1 (3x3, stride S) as 9 tap matmuls; BN1 scale folded into w1 ----
        acc1 = None
        for kh in range(3):
            for kw in range(3):
                p = (kh % S) * S + (kw % S)                 # phase holding this tap
                slab = xin[pl.ds(p * Hph + t * TH + kh // S, TH + 2),
                           pl.ds(kw // S, Wo_p), :]
                slab = slab.astype(jnp.bfloat16).reshape(M1, cin_p)   # free merge (Wo_p % 8 == 0)
                tap = jnp.dot(slab, w1_ref[kh * 3 + kw], preferred_element_type=jnp.float32)
                acc1 = tap if acc1 is None else acc1 + tap
        h1 = jnp.maximum(acc1 + b1_ref[...], 0.0).astype(jnp.bfloat16)   # BN1 shift + ReLU

        # ---- stash h1 in the VMEM scratch (aligned body store); zero only the conv2 halo ----
        h1_ref[0:TH + 2, C0:C0 + Wo_p, :] = h1.reshape(TH + 2, Wo_p, cout_p)
        zc = jnp.zeros((TH + 2, 1, cout_p), jnp.bfloat16)
        h1_ref[:, C0 - 1:C0, :] = zc                        # left padding column
        h1_ref[:, C0 + Wo:C0 + Wo + 1, :] = zc              # right padding column
        zr = jnp.zeros((1, Wo_p + 16, cout_p), jnp.bfloat16)

        @pl.when(t == 0)
        def _():
            h1_ref[0:1, :, :] = zr                          # top padding row (image edge)

        ib = Ho - t * TH + 1                                # local index of h1 row `Ho`
        @pl.when(ib < TH + 2)
        def _():
            h1_ref[pl.ds(ib, 1), :, :] = zr                 # bottom padding row (image edge)

        # ---- conv2 (3x3, stride 1); BN2 scale folded into w2 ----
        acc2 = None
        for kh in range(3):
            for kw in range(3):
                slab = h1_ref[pl.ds(kh, TH), pl.ds(C0 - 1 + kw, Wo_p), :]
                tap = jnp.dot(slab.reshape(M2, cout_p), w2_ref[kh * 3 + kw],
                              preferred_element_type=jnp.float32)
                acc2 = tap if acc2 is None else acc2 + tap
        main = acc2 + b2_ref[...]

        # ---- shortcut ----
        if has_proj:
            # 1x1 conv, stride 2 (+ BNshortcut): input x[2i,2j] is exactly phase (1,1) of the split
            xs = xin[pl.ds(3 * Hph + t * TH + 1, TH), pl.ds(0, Wo_p), :]
            xs = xs.astype(jnp.bfloat16).reshape(M2, cin_p)
            short = jnp.dot(xs, ws_ref[...], preferred_element_type=jnp.float32) + bs_ref[...]
        else:
            # identity shortcut: exact f32 add (input stays f32 in this configuration)
            short = xin[pl.ds(t * TH + 2, TH), pl.ds(1, Wo_p), :].reshape(M2, cin_p)

        o_ref[0] = jnp.maximum(main + short, 0.0).reshape(TH, Wo_p, cout_p).astype(o_ref.dtype)

    return kernel


# --------------------------------- parameters ----------------------------------------------------

def init_residual_block_params(key, in_channel, out_channel):
    k1, k2, k3 = jax.random.split(key, 3)
    std3 = (2.0 / float(3 * 3 * out_channel)) ** 0.5          # init_layer for Conv2d
    params = {
        'w1': jax.random.normal(k1, (out_channel, in_channel, 3, 3), jnp.float32) * std3,
        'w2': jax.random.normal(k2, (out_channel, out_channel, 3, 3), jnp.float32) * std3,
    }
    for name in ('b1', 'b2', 'bs'):                            # BN: weight=1, bias=0, rm=0, rv=1
        params[name] = dict(gamma=jnp.ones((out_channel,), jnp.float32),
                            beta=jnp.zeros((out_channel,), jnp.float32),
                            mean=jnp.zeros((out_channel,), jnp.float32),
                            var=jnp.ones((out_channel,), jnp.float32))
    if in_channel != out_channel:
        std1 = (2.0 / float(1 * 1 * out_channel)) ** 0.5
        params['ws'] = jax.random.normal(k3, (out_channel, in_channel, 1, 1), jnp.float32) * std1
    return params


# --------------------------------- forward wrapper -----------------------------------------------

@partial(jax.jit, static_argnums=(2, 3, 4))
def residual_block_2d(x_nchw, params, in_channel, out_channel, stride):
    N, Cin, H, W = x_nchw.shape
    assert Cin == in_channel
    has_proj = in_channel != out_channel
    if has_proj:
        assert stride == 2, "projection shortcut is hard-coded to stride 2 in the PyTorch module"
    else:
        assert stride == 1, "identity shortcut requires stride == 1 (as in the PyTorch module)"

    S = stride
    hm = (3 - 1) // S
    Ho = (H + 2 - 3) // S + 1
    Wo = (W + 2 - 3) // S + 1
    cin_p = _round_up(in_channel, LANE)
    cout_p = _round_up(out_channel, LANE)
    Wo_p = _round_up(Wo, SUB)

    # Row-tile height for the second ("parallel") grid axis; conv1 recomputes a 1-row halo.
    TH = 8 if Wo_p >= 16 else 16
    TH = min(TH, Ho)
    T = pl.cdiv(Ho, TH)
    Ho_p = T * TH
    Hph = Ho_p + hm + 2            # per-phase rows: 1 top zero + data + bottom zeros
    Wph = Wo_p + hm

    # Identity config keeps the input in f32 so the skip-add is exact; projection config uses bf16.
    in_dtype = jnp.bfloat16 if has_proj else jnp.float32

    # ---- input: NCHW -> NHWC, channel pad to a lane multiple, spatial pad / phase split ----
    x = jnp.transpose(x_nchw, (0, 2, 3, 1))
    if S == 1:
        # single phase: one fused pad (conv pad + 1-row top shift + bottom/right extension)
        xph = jnp.pad(x, ((0, 0), (2, Hph - H - 2), (1, Wph - W - 1),
                          (0, cin_p - in_channel))).astype(in_dtype)
    else:
        xp = jnp.pad(x, ((0, 0), (1, 1), (1, 1), (0, cin_p - in_channel))).astype(in_dtype)
        phases = []
        for a in range(S):
            for b in range(S):
                sl = xp[:, a::S, b::S, :][:, :Ho + hm, :Wo + hm, :]
                sl = jnp.pad(sl, ((0, 0), (1, Hph - 1 - sl.shape[1]),
                                  (0, Wph - sl.shape[2]), (0, 0)))
                phases.append(sl)
        xph = jnp.concatenate(phases, axis=1)       # (N, S*S*Hph, Wph, cin_p), phase-major

    # ---- weights: fold BN scales into output columns, pad to lane multiples, bf16 ----
    def fold(bn):
        scale = bn['gamma'] / jnp.sqrt(bn['var'] + BN_EPS)
        shift = bn['beta'] - bn['mean'] * scale
        return scale, shift

    s1, b1 = fold(params['b1'])
    s2, b2 = fold(params['b2'])

    def prep_w3x3(w, scale, cin, cinp):
        wt = jnp.transpose(w, (2, 3, 1, 0)) * scale[None, None, None, :]   # (3,3,Cin,Cout)
        wt = jnp.pad(wt, ((0, 0), (0, 0), (0, cinp - cin), (0, cout_p - out_channel)))
        return wt.reshape(9, cinp, cout_p).astype(jnp.bfloat16)

    w1 = prep_w3x3(params['w1'], s1, in_channel, cin_p)
    w2 = prep_w3x3(params['w2'], s2, out_channel, cout_p)
    b1p = jnp.pad(b1, (0, cout_p - out_channel)).reshape(1, cout_p).astype(jnp.float32)
    b2p = jnp.pad(b2, (0, cout_p - out_channel)).reshape(1, cout_p).astype(jnp.float32)

    inputs = [xph, w1, b1p, w2, b2p]
    in_specs = [
        pl.BlockSpec((1, S * S * Hph, Wph, cin_p), lambda n, t: (n, 0, 0, 0)),  # per-image, resident over t
        pl.BlockSpec((9, cin_p, cout_p), lambda n, t: (0, 0, 0)),               # resident weights
        pl.BlockSpec((1, cout_p), lambda n, t: (0, 0)),
        pl.BlockSpec((9, cout_p, cout_p), lambda n, t: (0, 0, 0)),
        pl.BlockSpec((1, cout_p), lambda n, t: (0, 0)),
    ]
    if has_proj:
        ss, bs = fold(params['bs'])
        ws = jnp.transpose(params['ws'][:, :, 0, 0], (1, 0)) * ss[None, :]      # (Cin, Cout)
        ws = jnp.pad(ws, ((0, cin_p - in_channel), (0, cout_p - out_channel))).astype(jnp.bfloat16)
        bsp = jnp.pad(bs, (0, cout_p - out_channel)).reshape(1, cout_p).astype(jnp.float32)
        inputs += [ws, bsp]
        in_specs += [pl.BlockSpec((cin_p, cout_p), lambda n, t: (0, 0)),
                     pl.BlockSpec((1, cout_p), lambda n, t: (0, 0))]

    # Cost estimate with REAL (unpadded) channel counts.
    flops = 2 * N * Ho * Wo * out_channel * (9 * in_channel + 9 * out_channel
                                             + (in_channel if has_proj else 0))
    bytes_accessed = (N * H * W * in_channel * 4
                      + (9 * in_channel + 9 * out_channel
                         + (in_channel if has_proj else 0)) * out_channel * 4
                      + N * Ho * Wo * out_channel * 4)

    # Explicit VMEM budget (review: do not rely on the 16/32 MiB scoped defaults; v7x has 64 MiB).
    itemsize_x = jnp.dtype(in_dtype).itemsize
    vmem_est = (2 * S * S * Hph * Wph * cin_p * itemsize_x            # input block (double-buffered)
                + 2 * 9 * (cin_p + cout_p) * cout_p * 2               # w1 + w2 (double-buffered)
                + 2 * TH * Wo_p * cout_p * 4                          # output block
                + (TH + 2) * (Wo_p + 16) * cout_p * 2                 # h1 scratch
                + 2 * (TH + 2) * Wo_p * cout_p * 4)                   # f32 accumulator headroom
    vmem_limit = int(min(64 * 1024 * 1024, max(32 * 1024 * 1024, 2 * vmem_est)))

    out = pl.pallas_call(
        _make_kernel(S=S, TH=TH, Ho=Ho, Wo=Wo, Wo_p=Wo_p, Hph=Hph, has_proj=has_proj),
        out_shape=jax.ShapeDtypeStruct((N, Ho_p, Wo_p, cout_p), jnp.float32),
        grid=(N, T),
        in_specs=in_specs,
        out_specs=pl.BlockSpec((1, TH, Wo_p, cout_p), lambda n, t: (n, t, 0, 0)),
        scratch_shapes=[pltpu.VMEM((TH + 2, Wo_p + 16, cout_p), jnp.bfloat16)],
        compiler_params=pltpu.CompilerParams(
            dimension_semantics=("parallel", "parallel"),
            vmem_limit_bytes=vmem_limit),
        cost_estimate=pl.CostEstimate(flops=int(flops), transcendentals=0,
                                      bytes_accessed=int(bytes_accessed)),
    )(*inputs)

    out = out[:, :Ho, :Wo, :out_channel]            # drop row/col/channel padding
    return jnp.transpose(out, (0, 3, 1, 2))         # NHWC -> NCHW


# --------------------------------- pure-JAX reference (eval-mode BN, f32) ------------------------

def _conv_ref(x, w, stride, pad):
    return lax.conv_general_dilated(x, w, (stride, stride), [(pad, pad), (pad, pad)],
                                    dimension_numbers=('NCHW', 'OIHW', 'NCHW'))


def _bn_ref(x, bn):
    scale = bn['gamma'] / jnp.sqrt(bn['var'] + BN_EPS)
    shift = bn['beta'] - bn['mean'] * scale
    return x * scale.reshape(1, -1, 1, 1) + shift.reshape(1, -1, 1, 1)


def reference_forward(x, params, in_channel, out_channel, stride):
    out = jnp.maximum(_bn_ref(_conv_ref(x, params['w1'], stride, 1), params['b1']), 0.0)
    out = _bn_ref(_conv_ref(out, params['w2'], 1, 1), params['b2'])
    if in_channel == out_channel:
        short = x
    else:
        short = _bn_ref(_conv_ref(x, params['ws'], 2, 0), params['bs'])
    return jnp.maximum(out + short, 0.0)


# --------------------------------- main -----------------------------------------------------------

if __name__ == "__main__":
    key = jax.random.PRNGKey(0)
    kxa, kpa, kxb, kpb = jax.random.split(key, 4)

    # Config A: projection shortcut (in != out), stride 2 (hard-coded in the PyTorch module)
    in_c, out_c, stride = 4, 8, 2
    xa = jax.random.normal(kxa, (2, in_c, 16, 16), jnp.float32)
    pa = init_residual_block_params(kpa, in_c, out_c)
    out_a = jax.block_until_ready(residual_block_2d(xa, pa, in_c, out_c, stride))
    ref_a = reference_forward(xa, pa, in_c, out_c, stride)
    assert out_a.shape == (2, out_c, 8, 8), out_a.shape
    np.testing.assert_allclose(np.asarray(out_a), np.asarray(ref_a), rtol=5e-2, atol=5e-2)

    # Config B: identity shortcut (in == out), stride 1  (exercises T=2 row tiles)
    in_c = out_c = 8
    stride = 1
    xb = jax.random.normal(kxb, (2, in_c, 16, 16), jnp.float32)
    pb = init_residual_block_params(kpb, in_c, out_c)
    out_b = jax.block_until_ready(residual_block_2d(xb, pb, in_c, out_c, stride))
    ref_b = reference_forward(xb, pb, in_c, out_c, stride)
    assert out_b.shape == (2, out_c, 16, 16), out_b.shape
    np.testing.assert_allclose(np.asarray(out_b), np.asarray(ref_b), rtol=5e-2, atol=5e-2)

    print("KERNEL_OK")
</pallas_src>

<mosaic_0001>
module attributes {stable_mosaic.version = 11 : i64} {
  func.func @kernel(%arg0: i32, %arg1: i32, %arg2: memref<1x44x9x128xbf16, #tpu.memory_space<vmem>>, %arg3: memref<9x128x128xbf16, #tpu.memory_space<vmem>>, %arg4: memref<1x128xf32, #tpu.memory_space<vmem>>, %arg5: memref<9x128x128xbf16, #tpu.memory_space<vmem>>, %arg6: memref<1x128xf32, #tpu.memory_space<vmem>>, %arg7: memref<128x128xbf16, #tpu.memory_space<vmem>>, %arg8: memref<1x128xf32, #tpu.memory_space<vmem>>, %arg9: memref<1x8x8x128xf32, #tpu.memory_space<vmem>>, %arg10: memref<10x24x128xbf16, #tpu.memory_space<vmem>>) attributes {dimension_semantics = [#tpu.dimension_semantics<parallel>, #tpu.dimension_semantics<parallel>], iteration_bounds = array<i64: 2, 1>, scalar_prefetch = 0 : i64, scratch_operands = 1 : i64, tpu.core_type = #tpu.core_type<tc>, window_params = [{transform_indices = @transform_0, window_bounds = array<i64: 1, 44, 9, 128>}, {pipeline_mode = #tpu.pipeline_mode<synchronous>, transform_indices = @transform_1, window_bounds = array<i64: 9, 128, 128>}, {pipeline_mode = #tpu.pipeline_mode<synchronous>, transform_indices = @transform_2, window_bounds = array<i64: 1, 128>}, {pipeline_mode = #tpu.pipeline_mode<synchronous>, transform_indices = @transform_3, window_bounds = array<i64: 9, 128, 128>}, {pipeline_mode = #tpu.pipeline_mode<synchronous>, transform_indices = @transform_4, window_bounds = array<i64: 1, 128>}, {pipeline_mode = #tpu.pipeline_mode<synchronous>, transform_indices = @transform_5, window_bounds = array<i64: 128, 128>}, {pipeline_mode = #tpu.pipeline_mode<synchronous>, transform_indices = @transform_6, window_bounds = array<i64: 1, 128>}, {transform_indices = @transform_7, window_bounds = array<i64: 1, 8, 8, 128>}]} {
    %c8_i32 = arith.constant 8 : i32
    %0 = arith.muli %arg1, %c8_i32 : i32
    %c0_i32 = arith.constant 0 : i32
    %1 = arith.addi %c0_i32, %0 : i32
    %c0_i32_0 = arith.constant 0 : i32
    %2 = arith.addi %1, %c0_i32_0 : i32
    %c0_i32_1 = arith.constant 0 : i32
    %c0_i32_2 = arith.constant 0 : i32
    %c0_i32_3 = arith.constant 0 : i32
    %c0_i32_4 = arith.constant 0 : i32
    %3 = tpu.memref_slice %arg2[%c0_i32_1, %c0_i32_2, %c0_i32_3, %c0_i32_4] : memref<1x44x9x128xbf16, #tpu.memory_space<vmem>> -> memref<1x44x9x128xbf16, #tpu.memory_space<vmem>>
    %4 = tpu.memref_squeeze %3 : memref<1x44x9x128xbf16, #tpu.memory_space<vmem>> -> memref<44x9x128xbf16, #tpu.memory_space<vmem>>
    %5 = arith.index_cast %2 : i32 to index
    %c0 = arith.constant 0 : index
    %c0_5 = arith.constant 0 : index
    %6 = vector.load %4[%5, %c0, %c0_5] : memref<44x9x128xbf16, #tpu.memory_space<vmem>>, vector<10x8x128xbf16>
    %7 = vector.shape_cast %6 : vector<10x8x128xbf16> to vector<80x128xbf16>
    %c0_6 = arith.constant 0 : index
    %c0_7 = arith.constant 0 : index
    %c0_8 = arith.constant 0 : index
    %8 = vector.load %arg3[%c0_6, %c0_7, %c0_8] : memref<9x128x128xbf16, #tpu.memory_space<vmem>>, vector<1x128x128xbf16>
    %9 = vector.shape_cast %8 : vector<1x128x128xbf16> to vector<128x128xbf16>
    %cst = arith.constant dense<0.000000e+00> : vector<80x128xf32>
    %10 = tpu.matmul %7, %9, %cst {dimension_numbers = #tpu.dot_dimension_numbers<[1], [0], [0], [1], [0, 0, 1, 1], [], []>} : vector<80x128xbf16>, vector<128x128xbf16>, vector<80x128xf32> -> vector<80x128xf32>
    %c8_i32_9 = arith.constant 8 : i32
    %11 = arith.muli %arg1, %c8_i32_9 : i32
    %c11_i32 = arith.constant 11 : i32
    %12 = arith.addi %c11_i32, %11 : i32
    %c0_i32_10 = arith.constant 0 : i32
    %13 = arith.addi %12, %c0_i32_10 : i32
    %c0_i32_11 = arith.constant 0 : i32
    %c0_i32_12 = arith.constant 0 : i32
    %c0_i32_13 = arith.constant 0 : i32
    %c0_i32_14 = arith.constant 0 : i32
    %14 = tpu.memref_slice %arg2[%c0_i32_11, %c0_i32_12, %c0_i32_13, %c0_i32_14] : memref<1x44x9x128xbf16, #tpu.memory_space<vmem>> -> memref<1x44x9x128xbf16, #tpu.memory_space<vmem>>
    %15 = tpu.memref_squeeze %14 : memref<1x44x9x128xbf16, #tpu.memory_space<vmem>> -> memref<44x9x128xbf16, #tpu.memory_space<vmem>>
    %16 = arith.index_cast %13 : i32 to index
    %c0_15 = arith.constant 0 : index
    %c0_16 = arith.constant 0 : index
    %17 = vector.load %15[%16, %c0_15, %c0_16] : memref<44x9x128xbf16, #tpu.memory_space<vmem>>, vector<10x8x128xbf16>
    %18 = vector.shape_cast %17 : vector<10x8x128xbf16> to vector<80x128xbf16>
    %c1 = arith.constant 1 : index
    %c0_17 = arith.constant 0 : index
    %c0_18 = arith.constant 0 : index
    %19 = vector.load %arg3[%c1, %c0_17, %c0_18] : memref<9x128x128xbf16, #tpu.memory_space<vmem>>, vector<1x128x128xbf16>
    %20 = vector.shape_cast %19 : vector<1x128x128xbf16> to vector<128x128xbf16>
    %cst_19 = arith.constant dense<0.000000e+00> : vector<80x128xf32>
    %21 = tpu.matmul %18, %20, %cst_19 {dimension_numbers = #tpu.dot_dimension_numbers<[1], [0], [0], [1], [0, 0, 1, 1], [], []>} : vector<80x128xbf16>, vector<128x128xbf16>, vector<80x128xf32> -> vector<80x128xf32>
    %22 = arith.addf %10, %21 : vector<80x128xf32>
    %c8_i32_20 = arith.constant 8 : i32
    %23 = arith.muli %arg1, %c8_i32_20 : i32
    %c0_i32_21 = arith.constant 0 : i32
    %24 = arith.addi %c0_i32_21, %23 : i32
    %c0_i32_22 = arith.constant 0 : i32
    %25 = arith.addi %24, %c0_i32_22 : i32
    %c0_i32_23 = arith.constant 0 : i32
    %c0_i32_24 = arith.constant 0 : i32
    %c0_i32_25 = arith.constant 0 : i32
    %c0_i32_26 = arith.constant 0 : i32
    %26 = tpu.memref_slice %arg2[%c0_i32_23, %c0_i32_24, %c0_i32_25, %c0_i32_26] : memref<1x44x9x128xbf16, #tpu.memory_space<vmem>> -> memref<1x44x9x128xbf16, #tpu.memory_space<vmem>>
    %27 = tpu.memref_squeeze %26 : memref<1x44x9x128xbf16, #tpu.memory_space<vmem>> -> memref<44x9x128xbf16, #tpu.memory_space<vmem>>
    %28 = arith.index_cast %25 : i32 to index
    %c1_27 = arith.constant 1 : index
    %c0_28 = arith.constant 0 : index
    %29 = vector.load %27[%28, %c1_27, %c0_28] : memref<44x9x128xbf16, #tpu.memory_space<vmem>>, vector<10x8x128xbf16>
    %30 = vector.shape_cast %29 : vector<10x8x128xbf16> to vector<80x128xbf16>
    %c2 = arith.constant 2 : index
    %c0_29 = arith.constant 0 : index
    %c0_30 = arith.constant 0 : index
    %31 = vector.load %arg3[%c2, %c0_29, %c0_30] : memref<9x128x128xbf16, #tpu.memory_space<vmem>>, vector<1x128x128xbf16>
    %32 = vector.shape_cast %31 : vector<1x128x128xbf16> to vector<128x128xbf16>
    %cst_31 = arith.constant dense<0.000000e+00> : vector<80x128xf32>
    %33 = tpu.matmul %30, %32, %cst_31 {dimension_numbers = #tpu.dot_dimension_numbers<[1], [0], [0], [1], [0, 0, 1, 1], [], []>} : vector<80x128xbf16>, vector<128x128xbf16>, vector<80x128xf32> -> vector<80x128xf32>
    %34 = arith.addf %22, %33 : vector<80x128xf32>
    %c8_i32_32 = arith.constant 8 : i32
    %35 = arith.muli %arg1, %c8_i32_32 : i32
    %c22_i32 = arith.constant 22 : i32
    %36 = arith.addi %c22_i32, %35 : i32
    %c0_i32_33 = arith.constant 0 : i32
    %37 = arith.addi %36, %c0_i32_33 : i32
    %c0_i32_34 = arith.constant 0 : i32
    %c0_i32_35 = arith.constant 0 : i32
    %c0_i32_36 = arith.constant 0 : i32
    %c0_i32_37 = arith.constant 0 : i32
    %38 = tpu.memref_slice %arg2[%c0_i32_34, %c0_i32_35, %c0_i32_36, %c0_i32_37] : memref<1x44x9x128xbf16, #tpu.memory_space<vmem>> -> memref<1x44x9x128xbf16, #tpu.memory_space<vmem>>
    %39 = tpu.memref_squeeze %38 : memref<1x44x9x128xbf16, #tpu.memory_space<vmem>> -> memref<44x9x128xbf16, #tpu.memory_space<vmem>>
    %40 = arith.index_cast %37 : i32 to index
    %c0_38 = arith.constant 0 : index
    %c0_39 = arith.constant 0 : index
    %41 = vector.load %39[%40, %c0_38, %c0_39] : memref<44x9x128xbf16, #tpu.memory_space<vmem>>, vector<10x8x128xbf16>
    %42 = vector.shape_cast %41 : vector<10x8x128xbf16> to vector<80x128xbf16>
    %c3 = arith.constant 3 : index
    %c0_40 = arith.constant 0 : index
    %c0_41 = arith.constant 0 : index
    %43 = vector.load %arg3[%c3, %c0_40, %c0_41] : memref<9x128x128xbf16, #tpu.memory_space<vmem>>, vector<1x128x128xbf16>
    %44 = vector.shape_cast %43 : vector<1x128x128xbf16> to vector<128x128xbf16>
    %cst_42 = arith.constant dense<0.000000e+00> : vector<80x128xf32>
    %45 = tpu.matmul %42, %44, %cst_42 {dimension_numbers = #tpu.dot_dimension_numbers<[1], [0], [0], [1], [0, 0, 1, 1], [], []>} : vector<80x128xbf16>, vector<128x128xbf16>, vector<80x128xf32> -> vector<80x128xf32>
    %46 = arith.addf %34, %45 : vector<80x128xf32>
    %c8_i32_43 = arith.constant 8 : i32
    %47 = arith.muli %arg1, %c8_i32_43 : i32
    %c33_i32 = arith.constant 33 : i32
    %48 = arith.addi %c33_i32, %47 : i32
    %c0_i32_44 = arith.constant 0 : i32
    %49 = arith.addi %48, %c0_i32_44 : i32
    %c0_i32_45 = arith.constant 0 : i32
    %c0_i32_46 = arith.constant 0 : i32
    %c0_i32_47 = arith.constant 0 : i32
    %c0_i32_48 = arith.constant 0 : i32
    %50 = tpu.memref_slice %arg2[%c0_i32_45, %c0_i32_46, %c0_i32_47, %c0_i32_48] : memref<1x44x9x128xbf16, #tpu.memory_space<vmem>> -> memref<1x44x9x128xbf16, #tpu.memory_space<vmem>>
    %51 = tpu.memref_squeeze %50 : memref<1x44x9x128xbf16, #tpu.memory_space<vmem>> -> memref<44x9x128xbf16, #tpu.memory_space<vmem>>
    %52 = arith.index_cast %49 : i32 to index
    %c0_49 = arith.constant 0 : index
    %c0_50 = arith.constant 0 : index
    %53 = vector.load %51[%52, %c0_49, %c0_50] : memref<44x9x128xbf16, #tpu.memory_space<vmem>>, vector<10x8x128xbf16>
    %54 = vector.shape_cast %53 : vector<10x8x128xbf16> to vector<80x128xbf16>
    %c4 = arith.constant 4 : index
    %c0_51 = arith.constant 0 : index
    %c0_52 = arith.constant 0 : index
    %55 = vector.load %arg3[%c4, %c0_51, %c0_52] : memref<9x128x128xbf16, #tpu.memory_space<vmem>>, vector<1x128x128xbf16>
    %56 = vector.shape_cast %55 : vector<1x128x128xbf16> to vector<128x128xbf16>
    %cst_53 = arith.constant dense<0.000000e+00> : vector<80x128xf32>
    %57 = tpu.matmul %54, %56, %cst_53 {dimension_numbers = #tpu.dot_dimension_numbers<[1], [0], [0], [1], [0, 0, 1, 1], [], []>} : vector<80x128xbf16>, vector<128x128xbf16>, vector<80x128xf32> -> vector<80x128xf32>
    %58 = arith.addf %46, %57 : vector<80x128xf32>
    %c8_i32_54 = arith.constant 8 : i32
    %59 = arith.muli %arg1, %c8_i32_54 : i32
    %c22_i32_55 = arith.constant 22 : i32
    %60 = arith.addi %c22_i32_55, %59 : i32
    %c0_i32_56 = arith.constant 0 : i32
    %61 = arith.addi %60, %c0_i32_56 : i32
    %c0_i32_57 = arith.constant 0 : i32
    %c0_i32_58 = arith.constant 0 : i32
    %c0_i32_59 = arith.constant 0 : i32
    %c0_i32_60 = arith.constant 0 : i32
    %62 = tpu.memref_slice %arg2[%c0_i32_57, %c0_i32_58, %c0_i32_59, %c0_i32_60] : memref<1x44x9x128xbf16, #tpu.memory_space<vmem>> -> memref<1x44x9x128xbf16, #tpu.memory_space<vmem>>
    %63 = tpu.memref_squeeze %62 : memref<1x44x9x128xbf16, #tpu.memory_space<vmem>> -> memref<44x9x128xbf16, #tpu.memory_space<vmem>>
    %64 = arith.index_cast %61 : i32 to index
    %c1_61 = arith.constant 1 : index
    %c0_62 = arith.constant 0 : index
    %65 = vector.load %63[%64, %c1_61, %c0_62] : memref<44x9x128xbf16, #tpu.memory_space<vmem>>, vector<10x8x128xbf16>
    %66 = vector.shape_cast %65 : vector<10x8x128xbf16> to vector<80x128xbf16>
    %c5 = arith.constant 5 : index
    %c0_63 = arith.constant 0 : index
    %c0_64 = arith.constant 0 : index
    %67 = vector.load %arg3[%c5, %c0_63, %c0_64] : memref<9x128x128xbf16, #tpu.memory_space<vmem>>, vector<1x128x128xbf16>
    %68 = vector.shape_cast %67 : vector<1x128x128xbf16> to vector<128x128xbf16>
    %cst_65 = arith.constant dense<0.000000e+00> : vector<80x128xf32>
    %69 = tpu.matmul %66, %68, %cst_65 {dimension_numbers = #tpu.dot_dimension_numbers<[1], [0], [0], [1], [0, 0, 1, 1], [], []>} : vector<80x128xbf16>, vector<128x128xbf16>, vector<80x128xf32> -> vector<80x128xf32>
    %70 = arith.addf %58, %69 : vector<80x128xf32>
    %c8_i32_66 = arith.constant 8 : i32
    %71 = arith.muli %arg1, %c8_i32_66 : i32
    %c0_i32_67 = arith.constant 0 : i32
    %72 = arith.addi %c0_i32_67, %71 : i32
    %c1_i32 = arith.constant 1 : i32
    %73 = arith.addi %72, %c1_i32 : i32
    %c0_i32_68 = arith.constant 0 : i32
    %c0_i32_69 = arith.constant 0 : i32
    %c0_i32_70 = arith.constant 0 : i32
    %c0_i32_71 = arith.constant 0 : i32
    %74 = tpu.memref_slice %arg2[%c0_i32_68, %c0_i32_69, %c0_i32_70, %c0_i32_71] : memref<1x44x9x128xbf16, #tpu.memory_space<vmem>> -> memref<1x44x9x128xbf16, #tpu.memory_space<vmem>>
    %75 = tpu.memref_squeeze %74 : memref<1x44x9x128xbf16, #tpu.memory_space<vmem>> -> memref<44x9x128xbf16, #tpu.memory_space<vmem>>
    %76 = arith.index_cast %73 : i32 to index
    %c0_72 = arith.constant 0 : index
    %c0_73 = arith.constant 0 : index
    %77 = vector.load %75[%76, %c0_72, %c0_73] : memref<44x9x128xbf16, #tpu.memory_space<vmem>>, vector<10x8x128xbf16>
    %78 = vector.shape_cast %77 : vector<10x8x128xbf16> to vector<80x128xbf16>
    %c6 = arith.constant 6 : index
    %c0_74 = arith.constant 0 : index
    %c0_75 = arith.constant 0 : index
    %79 = vector.load %arg3[%c6, %c0_74, %c0_75] : memref<9x128x128xbf16, #tpu.memory_space<vmem>>, vector<1x128x128xbf16>
    %80 = vector.shape_cast %79 : vector<1x128x128xbf16> to vector<128x128xbf16>
    %cst_76 = arith.constant dense<0.000000e+00> : vector<80x128xf32>
    %81 = tpu.matmul %78, %80, %cst_76 {dimension_numbers = #tpu.dot_dimension_numbers<[1], [0], [0], [1], [0, 0, 1, 1], [], []>} : vector<80x128xbf16>, vector<128x128xbf16>, vector<80x128xf32> -> vector<80x128xf32>
    %82 = arith.addf %70, %81 : vector<80x128xf32>
    %c8_i32_77 = arith.constant 8 : i32
    %83 = arith.muli %arg1, %c8_i32_77 : i32
    %c11_i32_78 = arith.constant 11 : i32
    %84 = arith.addi %c11_i32_78, %83 : i32
    %c1_i32_79 = arith.constant 1 : i32
    %85 = arith.addi %84, %c1_i32_79 : i32
    %c0_i32_80 = arith.constant 0 : i32
    %c0_i32_81 = arith.constant 0 : i32
    %c0_i32_82 = arith.constant 0 : i32
    %c0_i32_83 = arith.constant 0 : i32
    %86 = tpu.memref_slice %arg2[%c0_i32_80, %c0_i32_81, %c0_i32_82, %c0_i32_83] : memref<1x44x9x128xbf16, #tpu.memory_space<vmem>> -> memref<1x44x9x128xbf16, #tpu.memory_space<vmem>>
    %87 = tpu.memref_squeeze %86 : memref<1x44x9x128xbf16, #tpu.memory_space<vmem>> -> memref<44x9x128xbf16, #tpu.memory_space<vmem>>
    %88 = arith.index_cast %85 : i32 to index
    %c0_84 = arith.constant 0 : index
    %c0_85 = arith.constant 0 : index
    %89 = vector.load %87[%88, %c0_84, %c0_85] : memref<44x9x128xbf16, #tpu.memory_space<vmem>>, vector<10x8x128xbf16>
    %90 = vector.shape_cast %89 : vector<10x8x128xbf16> to vector<80x128xbf16>
    %c7 = arith.constant 7 : index
    %c0_86 = arith.constant 0 : index
    %c0_87 = arith.constant 0 : index
    %91 = vector.load %arg3[%c7, %c0_86, %c0_87] : memref<9x128x128xbf16, #tpu.memory_space<vmem>>, vector<1x128x128xbf16>
    %92 = vector.shape_cast %91 : vector<1x128x128xbf16> to vector<128x128xbf16>
    %cst_88 = arith.constant dense<0.000000e+00> : vector<80x128xf32>
    %93 = tpu.matmul %90, %92, %cst_88 {dimension_numbers = #tpu.dot_dimension_numbers<[1], [0], [0], [1], [0, 0, 1, 1], [], []>} : vector<80x128xbf16>, vector<128x128xbf16>, vector<80x128xf32> -> vector<80x128xf32>
    %94 = arith.addf %82, %93 : vector<80x128xf32>
    %c8_i32_89 = arith.constant 8 : i32
    %95 = arith.muli %arg1, %c8_i32_89 : i32
    %c0_i32_90 = arith.constant 0 : i32
    %96 = arith.addi %c0_i32_90, %95 : i32
    %c1_i32_91 = arith.constant 1 : i32
    %97 = arith.addi %96, %c1_i32_91 : i32
    %c0_i32_92 = arith.constant 0 : i32
    %c0_i32_93 = arith.constant 0 : i32
    %c0_i32_94 = arith.constant 0 : i32
    %c0_i32_95 = arith.constant 0 : i32
    %98 = tpu.memref_slice %arg2[%c0_i32_92, %c0_i32_93, %c0_i32_94, %c0_i32_95] : memref<1x44x9x128xbf16, #tpu.memory_space<vmem>> -> memref<1x44x9x128xbf16, #tpu.memory_space<vmem>>
    %99 = tpu.memref_squeeze %98 : memref<1x44x9x128xbf16, #tpu.memory_space<vmem>> -> memref<44x9x128xbf16, #tpu.memory_space<vmem>>
    %100 = arith.index_cast %97 : i32 to index
    %c1_96 = arith.constant 1 : index
    %c0_97 = arith.constant 0 : index
    %101 = vector.load %99[%100, %c1_96, %c0_97] : memref<44x9x128xbf16, #tpu.memory_space<vmem>>, vector<10x8x128xbf16>
    %102 = vector.shape_cast %101 : vector<10x8x128xbf16> to vector<80x128xbf16>
    %c8 = arith.constant 8 : index
    %c0_98 = arith.constant 0 : index
    %c0_99 = arith.constant 0 : index
    %103 = vector.load %arg3[%c8, %c0_98, %c0_99] : memref<9x128x128xbf16, #tpu.memory_space<vmem>>, vector<1x128x128xbf16>
    %104 = vector.shape_cast %103 : vector<1x128x128xbf16> to vector<128x128xbf16>
    %cst_100 = arith.constant dense<0.000000e+00> : vector<80x128xf32>
    %105 = tpu.matmul %102, %104, %cst_100 {dimension_numbers = #tpu.dot_dimension_numbers<[1], [0], [0], [1], [0, 0, 1, 1], [], []>} : vector<80x128xbf16>, vector<128x128xbf16>, vector<80x128xf32> -> vector<80x128xf32>
    %106 = arith.addf %94, %105 : vector<80x128xf32>
    %c0_101 = arith.constant 0 : index
    %c0_102 = arith.constant 0 : index
    %107 = vector.load %arg4[%c0_101, %c0_102] : memref<1x128xf32, #tpu.memory_space<vmem>>, vector<1x128xf32>
    %108 = vector.broadcast %107 : vector<1x128xf32> to vector<80x128xf32>
    %109 = arith.addf %106, %108 : vector<80x128xf32>
    %cst_103 = arith.constant 0.000000e+00 : f32
    %110 = vector.broadcast %cst_103 : f32 to vector<80x128xf32>
    %111 = arith.maximumf %109, %110 : vector<80x128xf32>
    %112 = arith.truncf %111 : vector<80x128xf32> to vector<80x128xbf16>
    %113 = vector.shape_cast %112 : vector<80x128xbf16> to vector<10x8x128xbf16>
    %c0_104 = arith.constant 0 : index
    %c8_105 = arith.constant 8 : index
    %c0_106 = arith.constant 0 : index
    %114 = vector.load %arg10[%c0_104, %c8_105, %c0_106] : memref<10x24x128xbf16, #tpu.memory_space<vmem>>, vector<10x8x128xbf16>
    tpu.vector_store %arg10[%c0_104, %c8_105, %c0_106], %113 {strides = array<i32>} : memref<10x24x128xbf16, #tpu.memory_space<vmem>>, vector<10x8x128xbf16>,
    %cst_107 = arith.constant 0.000000e+00 : bf16
    %115 = vector.broadcast %cst_107 : bf16 to vector<10x1x128xbf16>
    %c0_108 = arith.constant 0 : index
    %c7_109 = arith.constant 7 : index
    %c0_110 = arith.constant 0 : index
    %116 = vector.load %arg10[%c0_108, %c7_109, %c0_110] : memref<10x24x128xbf16, #tpu.memory_space<vmem>>, vector<10x1x128xbf16>
    tpu.vector_store %arg10[%c0_108, %c7_109, %c0_110], %115 {strides = array<i32>} : memref<10x24x128xbf16, #tpu.memory_space<vmem>>, vector<10x1x128xbf16>,
    %c0_111 = arith.constant 0 : index
    %c16 = arith.constant 16 : index
    %c0_112 = arith.constant 0 : index
    %117 = vector.load %arg10[%c0_111, %c16, %c0_112] : memref<10x24x128xbf16, #tpu.memory_space<vmem>>, vector<10x1x128xbf16>
    tpu.vector_store %arg10[%c0_111, %c16, %c0_112], %115 {strides = array<i32>} : memref<10x24x128xbf16, #tpu.memory_space<vmem>>, vector<10x1x128xbf16>,
    %cst_113 = arith.constant 0.000000e+00 : bf16
    %118 = vector.broadcast %cst_113 : bf16 to vector<1x24x128xbf16>
    %c0_i32_114 = arith.constant 0 : i32
    %119 = arith.cmpi eq, %arg1, %c0_i32_114 : i32
    %120 = arith.extui %119 : i1 to i32
    %c0_i32_115 = arith.constant 0 : i32
    %121 = arith.cmpi ne, %120, %c0_i32_115 : i32
    scf.if %121 {
      %c0_203 = arith.constant 0 : index
      %c0_204 = arith.constant 0 : index
      %c0_205 = arith.constant 0 : index
      %204 = vector.load %arg10[%c0_203, %c0_204, %c0_205] : memref<10x24x128xbf16, #tpu.memory_space<vmem>>, vector<1x24x128xbf16>
      tpu.vector_store %arg10[%c0_203, %c0_204, %c0_205], %118 {strides = array<i32>} : memref<10x24x128xbf16, #tpu.memory_space<vmem>>, vector<1x24x128xbf16>,
    } else {
    }
    %c8_i32_116 = arith.constant 8 : i32
    %122 = arith.muli %arg1, %c8_i32_116 : i32
    %c8_i32_117 = arith.constant 8 : i32
    %123 = arith.subi %c8_i32_117, %122 : i32
    %c1_i32_118 = arith.constant 1 : i32
    %124 = arith.addi %123, %c1_i32_118 : i32
    %c10_i32 = arith.constant 10 : i32
    %125 = arith.cmpi slt, %124, %c10_i32 : i32
    %126 = arith.extui %125 : i1 to i32
    %c0_i32_119 = arith.constant 0 : i32
    %127 = arith.cmpi ne, %126, %c0_i32_119 : i32
    scf.if %127 {
      %204 = arith.index_cast %124 : i32 to index
      %c0_203 = arith.constant 0 : index
      %c0_204 = arith.constant 0 : index
      %205 = vector.load %arg10[%204, %c0_203, %c0_204] : memref<10x24x128xbf16, #tpu.memory_space<vmem>>, vector<1x24x128xbf16>
      tpu.vector_store %arg10[%204, %c0_203, %c0_204], %118 {strides = array<i32>} : memref<10x24x128xbf16, #tpu.memory_space<vmem>>, vector<1x24x128xbf16>,
    } else {
    }
    %c0_120 = arith.constant 0 : index
    %c7_121 = arith.constant 7 : index
    %c0_122 = arith.constant 0 : index
    %128 = vector.load %arg10[%c0_120, %c7_121, %c0_122] : memref<10x24x128xbf16, #tpu.memory_space<vmem>>, vector<8x8x128xbf16>
    %129 = vector.shape_cast %128 : vector<8x8x128xbf16> to vector<64x128xbf16>
    %c0_123 = arith.constant 0 : index
    %c0_124 = arith.constant 0 : index
    %c0_125 = arith.constant 0 : index
    %130 = vector.load %arg5[%c0_123, %c0_124, %c0_125] : memref<9x128x128xbf16, #tpu.memory_space<vmem>>, vector<1x128x128xbf16>
    %131 = vector.shape_cast %130 : vector<1x128x128xbf16> to vector<128x128xbf16>
    %cst_126 = arith.constant dense<0.000000e+00> : vector<64x128xf32>
    %132 = tpu.matmul %129, %131, %cst_126 {dimension_numbers = #tpu.dot_dimension_numbers<[1], [0], [0], [1], [0, 0, 1, 1], [], []>} : vector<64x128xbf16>, vector<128x128xbf16>, vector<64x128xf32> -> vector<64x128xf32>
    %c0_127 = arith.constant 0 : index
    %c8_128 = arith.constant 8 : index
    %c0_129 = arith.constant 0 : index
    %133 = vector.load %arg10[%c0_127, %c8_128, %c0_129] : memref<10x24x128xbf16, #tpu.memory_space<vmem>>, vector<8x8x128xbf16>
    %134 = vector.shape_cast %133 : vector<8x8x128xbf16> to vector<64x128xbf16>
    %c1_130 = arith.constant 1 : index
    %c0_131 = arith.constant 0 : index
    %c0_132 = arith.constant 0 : index
    %135 = vector.load %arg5[%c1_130, %c0_131, %c0_132] : memref<9x128x128xbf16, #tpu.memory_space<vmem>>, vector<1x128x128xbf16>
    %136 = vector.shape_cast %135 : vector<1x128x128xbf16> to vector<128x128xbf16>
    %cst_133 = arith.constant dense<0.000000e+00> : vector<64x128xf32>
    %137 = tpu.matmul %134, %136, %cst_133 {dimension_numbers = #tpu.dot_dimension_numbers<[1], [0], [0], [1], [0, 0, 1, 1], [], []>} : vector<64x128xbf16>, vector<128x128xbf16>, vector<64x128xf32> -> vector<64x128xf32>
    %138 = arith.addf %132, %137 : vector<64x128xf32>
    %c0_134 = arith.constant 0 : index
    %c9 = arith.constant 9 : index
    %c0_135 = arith.constant 0 : index
    %139 = vector.load %arg10[%c0_134, %c9, %c0_135] : memref<10x24x128xbf16, #tpu.memory_space<vmem>>, vector<8x8x128xbf16>
    %140 = vector.shape_cast %139 : vector<8x8x128xbf16> to vector<64x128xbf16>
    %c2_136 = arith.constant 2 : index
    %c0_137 = arith.constant 0 : index
    %c0_138 = arith.constant 0 : index
    %141 = vector.load %arg5[%c2_136, %c0_137, %c0_138] : memref<9x128x128xbf16, #tpu.memory_space<vmem>>, vector<1x128x128xbf16>
    %142 = vector.shape_cast %141 : vector<1x128x128xbf16> to vector<128x128xbf16>
    %cst_139 = arith.constant dense<0.000000e+00> : vector<64x128xf32>
    %143 = tpu.matmul %140, %142, %cst_139 {dimension_numbers = #tpu.dot_dimension_numbers<[1], [0], [0], [1], [0, 0, 1, 1], [], []>} : vector<64x128xbf16>, vector<128x128xbf16>, vector<64x128xf32> -> vector<64x128xf32>
    %144 = arith.addf %138, %143 : vector<64x128xf32>
    %c1_140 = arith.constant 1 : index
    %c7_141 = arith.constant 7 : index
    %c0_142 = arith.constant 0 : index
    %145 = vector.load %arg10[%c1_140, %c7_141, %c0_142] : memref<10x24x128xbf16, #tpu.memory_space<vmem>>, vector<8x8x128xbf16>
    %146 = vector.shape_cast %145 : vector<8x8x128xbf16> to vector<64x128xbf16>
    %c3_143 = arith.constant 3 : index
    %c0_144 = arith.constant 0 : index
    %c0_145 = arith.constant 0 : index
    %147 = vector.load %arg5[%c3_143, %c0_144, %c0_145] : memref<9x128x128xbf16, #tpu.memory_space<vmem>>, vector<1x128x128xbf16>
    %148 = vector.shape_cast %147 : vector<1x128x128xbf16> to vector<128x128xbf16>
    %cst_146 = arith.constant dense<0.000000e+00> : vector<64x128xf32>
    %149 = tpu.matmul %146, %148, %cst_146 {dimension_numbers = #tpu.dot_dimension_numbers<[1], [0], [0], [1], [0, 0, 1, 1], [], []>} : vector<64x128xbf16>, vector<128x128xbf16>, vector<64x128xf32> -> vector<64x128xf32>
    %150 = arith.addf %144, %149 : vector<64x128xf32>
    %c1_147 = arith.constant 1 : index
    %c8_148 = arith.constant 8 : index
    %c0_149 = arith.constant 0 : index
    %151 = vector.load %arg10[%c1_147, %c8_148, %c0_149] : memref<10x24x128xbf16, #tpu.memory_space<vmem>>, vector<8x8x128xbf16>
    %152 = vector.shape_cast %151 : vector<8x8x128xbf16> to vector<64x128xbf16>
    %c4_150 = arith.constant 4 : index
    %c0_151 = arith.constant 0 : index
    %c0_152 = arith.constant 0 : index
    %153 = vector.load %arg5[%c4_150, %c0_151, %c0_152] : memref<9x128x128xbf16, #tpu.memory_space<vmem>>, vector<1x128x128xbf16>
    %154 = vector.shape_cast %153 : vector<1x128x128xbf16> to vector<128x128xbf16>
    %cst_153 = arith.constant dense<0.000000e+00> : vector<64x128xf32>
    %155 = tpu.matmul %152, %154, %cst_153 {dimension_numbers = #tpu.dot_dimension_numbers<[1], [0], [0], [1], [0, 0, 1, 1], [], []>} : vector<64x128xbf16>, vector<128x128xbf16>, vector<64x128xf32> -> vector<64x128xf32>
    %156 = arith.addf %150, %155 : vector<64x128xf32>
    %c1_154 = arith.constant 1 : index
    %c9_155 = arith.constant 9 : index
    %c0_156 = arith.constant 0 : index
    %157 = vector.load %arg10[%c1_154, %c9_155, %c0_156] : memref<10x24x128xbf16, #tpu.memory_space<vmem>>, vector<8x8x128xbf16>
    %158 = vector.shape_cast %157 : vector<8x8x128xbf16> to vector<64x128xbf16>
    %c5_157 = arith.constant 5 : index
    %c0_158 = arith.constant 0 : index
    %c0_159 = arith.constant 0 : index
    %159 = vector.load %arg5[%c5_157, %c0_158, %c0_159] : memref<9x128x128xbf16, #tpu.memory_space<vmem>>, vector<1x128x128xbf16>
    %160 = vector.shape_cast %159 : vector<1x128x128xbf16> to vector<128x128xbf16>
    %cst_160 = arith.constant dense<0.000000e+00> : vector<64x128xf32>
    %161 = tpu.matmul %158, %160, %cst_160 {dimension_numbers = #tpu.dot_dimension_numbers<[1], [0], [0], [1], [0, 0, 1, 1], [], []>} : vector<64x128xbf16>, vector<128x128xbf16>, vector<64x128xf32> -> vector<64x128xf32>
    %162 = arith.addf %156, %161 : vector<64x128xf32>
    %c2_161 = arith.constant 2 : index
    %c7_162 = arith.constant 7 : index
    %c0_163 = arith.constant 0 : index
    %163 = vector.load %arg10[%c2_161, %c7_162, %c0_163] : memref<10x24x128xbf16, #tpu.memory_space<vmem>>, vector<8x8x128xbf16>
    %164 = vector.shape_cast %163 : vector<8x8x128xbf16> to vector<64x128xbf16>
    %c6_164 = arith.constant 6 : index
    %c0_165 = arith.constant 0 : index
    %c0_166 = arith.constant 0 : index
    %165 = vector.load %arg5[%c6_164, %c0_165, %c0_166] : memref<9x128x128xbf16, #tpu.memory_space<vmem>>, vector<1x128x128xbf16>
    %166 = vector.shape_cast %165 : vector<1x128x128xbf16> to vector<128x128xbf16>
    %cst_167 = arith.constant dense<0.000000e+00> : vector<64x128xf32>
    %167 = tpu.matmul %164, %166, %cst_167 {dimension_numbers = #tpu.dot_dimension_numbers<[1], [0], [0], [1], [0, 0, 1, 1], [], []>} : vector<64x128xbf16>, vector<128x128xbf16>, vector<64x128xf32> -> vector<64x128xf32>
    %168 = arith.addf %162, %167 : vector<64x128xf32>
    %c2_168 = arith.constant 2 : index
    %c8_169 = arith.constant 8 : index
    %c0_170 = arith.constant 0 : index
    %169 = vector.load %arg10[%c2_168, %c8_169, %c0_170] : memref<10x24x128xbf16, #tpu.memory_space<vmem>>, vector<8x8x128xbf16>
    %170 = vector.shape_cast %169 : vector<8x8x128xbf16> to vector<64x128xbf16>
    %c7_171 = arith.constant 7 : index
    %c0_172 = arith.constant 0 : index
    %c0_173 = arith.constant 0 : index
    %171 = vector.load %arg5[%c7_171, %c0_172, %c0_173] : memref<9x128x128xbf16, #tpu.memory_space<vmem>>, vector<1x128x128xbf16>
    %172 = vector.shape_cast %171 : vector<1x128x128xbf16> to vector<128x128xbf16>
    %cst_174 = arith.constant dense<0.000000e+00> : vector<64x128xf32>
    %173 = tpu.matmul %170, %172, %cst_174 {dimension_numbers = #tpu.dot_dimension_numbers<[1], [0], [0], [1], [0, 0, 1, 1], [], []>} : vector<64x128xbf16>, vector<128x128xbf16>, vector<64x128xf32> -> vector<64x128xf32>
    %174 = arith.addf %168, %173 : vector<64x128xf32>
    %c2_175 = arith.constant 2 : index
    %c9_176 = arith.constant 9 : index
    %c0_177 = arith.constant 0 : index
    %175 = vector.load %arg10[%c2_175, %c9_176, %c0_177] : memref<10x24x128xbf16, #tpu.memory_space<vmem>>, vector<8x8x128xbf16>
    %176 = vector.shape_cast %175 : vector<8x8x128xbf16> to vector<64x128xbf16>
    %c8_178 = arith.constant 8 : index
    %c0_179 = arith.constant 0 : index
    %c0_180 = arith.constant 0 : index
    %177 = vector.load %arg5[%c8_178, %c0_179, %c0_180] : memref<9x128x128xbf16, #tpu.memory_space<vmem>>, vector<1x128x128xbf16>
    %178 = vector.shape_cast %177 : vector<1x128x128xbf16> to vector<128x128xbf16>
    %cst_181 = arith.constant dense<0.000000e+00> : vector<64x128xf32>
    %179 = tpu.matmul %176, %178, %cst_181 {dimension_numbers = #tpu.dot_dimension_numbers<[1], [0], [0], [1], [0, 0, 1, 1], [], []>} : vector<64x128xbf16>, vector<128x128xbf16>, vector<64x128xf32> -> vector<64x128xf32>
    %180 = arith.addf %174, %179 : vector<64x128xf32>
    %c0_182 = arith.constant 0 : index
    %c0_183 = arith.constant 0 : index
    %181 = vector.load %arg6[%c0_182, %c0_183] : memref<1x128xf32, #tpu.memory_space<vmem>>, vector<1x128xf32>
    %182 = vector.broadcast %181 : vector<1x128xf32> to vector<64x128xf32>
    %183 = arith.addf %180, %182 : vector<64x128xf32>
    %c8_i32_184 = arith.constant 8 : i32
    %184 = arith.muli %arg1, %c8_i32_184 : i32
    %c33_i32_185 = arith.constant 33 : i32
    %185 = arith.addi %c33_i32_185, %184 : i32
    %c1_i32_186 = arith.constant 1 : i32
    %186 = arith.addi %185, %c1_i32_186 : i32
    %c0_i32_187 = arith.constant 0 : i32
    %c0_i32_188 = arith.constant 0 : i32
    %c0_i32_189 = arith.constant 0 : i32
    %c0_i32_190 = arith.constant 0 : i32
    %187 = tpu.memref_slice %arg2[%c0_i32_187, %c0_i32_188, %c0_i32_189, %c0_i32_190] : memref<1x44x9x128xbf16, #tpu.memory_space<vmem>> -> memref<1x44x9x128xbf16, #tpu.memory_space<vmem>>
    %188 = tpu.memref_squeeze %187 : memref<1x44x9x128xbf16, #tpu.memory_space<vmem>> -> memref<44x9x128xbf16, #tpu.memory_space<vmem>>
    %189 = arith.index_cast %186 : i32 to index
    %c0_191 = arith.constant 0 : index
    %c0_192 = arith.constant 0 : index
    %190 = vector.load %188[%189, %c0_191, %c0_192] : memref<44x9x128xbf16, #tpu.memory_space<vmem>>, vector<8x8x128xbf16>
    %191 = vector.shape_cast %190 : vector<8x8x128xbf16> to vector<64x128xbf16>
    %c0_193 = arith.constant 0 : index
    %c0_194 = arith.constant 0 : index
    %192 = vector.load %arg7[%c0_193, %c0_194] : memref<128x128xbf16, #tpu.memory_space<vmem>>, vector<128x128xbf16>
    %cst_195 = arith.constant dense<0.000000e+00> : vector<64x128xf32>
    %193 = tpu.matmul %191, %192, %cst_195 {dimension_numbers = #tpu.dot_dimension_numbers<[1], [0], [0], [1], [0, 0, 1, 1], [], []>} : vector<64x128xbf16>, vector<128x128xbf16>, vector<64x128xf32> -> vector<64x128xf32>
    %c0_196 = arith.constant 0 : index
    %c0_197 = arith.constant 0 : index
    %194 = vector.load %arg8[%c0_196, %c0_197] : memref<1x128xf32, #tpu.memory_space<vmem>>, vector<1x128xf32>
    %195 = vector.broadcast %194 : vector<1x128xf32> to vector<64x128xf32>
    %196 = arith.addf %193, %195 : vector<64x128xf32>
    %197 = arith.addf %183, %196 : vector<64x128xf32>
    %cst_198 = arith.constant 0.000000e+00 : f32
    %198 = vector.broadcast %cst_198 : f32 to vector<64x128xf32>
    %199 = arith.maximumf %197, %198 : vector<64x128xf32>
    %200 = vector.shape_cast %199 : vector<64x128xf32> to vector<8x8x128xf32>
    %c0_199 = arith.constant 0 : index
    %c0_200 = arith.constant 0 : index
    %c0_201 = arith.constant 0 : index
    %c0_202 = arith.constant 0 : index
    %201 = vector.load %arg9[%c0_199, %c0_200, %c0_201, %c0_202] : memref<1x8x8x128xf32, #tpu.memory_space<vmem>>, vector<1x8x8x128xf32>
    %202 = vector.shape_cast %201 : vector<1x8x8x128xf32> to vector<8x8x128xf32>
    %203 = vector.shape_cast %200 : vector<8x8x128xf32> to vector<1x8x8x128xf32>
    tpu.vector_store %arg9[%c0_199, %c0_200, %c0_201, %c0_202], %203 {strides = array<i32>} : memref<1x8x8x128xf32, #tpu.memory_space<vmem>>, vector<1x8x8x128xf32>,
    return
  }
  func.func @transform_0(%arg0: i32, %arg1: i32) -> (i32, i32, i32, i32) {
    %c0_i32 = arith.constant 0 : i32
    %c0_i32_0 = arith.constant 0 : i32
    %c0_i32_1 = arith.constant 0 : i32
    %c0_i32_2 = arith.constant 0 : i32
    return %arg0, %c0_i32, %c0_i32_0, %c0_i32_1 : i32, i32, i32, i32
  }
  func.func @transform_1(%arg0: i32, %arg1: i32) -> (i32, i32, i32) {
    %c0_i32 = arith.constant 0 : i32
    %c0_i32_0 = arith.constant 0 : i32
    %c0_i32_1 = arith.constant 0 : i32
    %c0_i32_2 = arith.constant 0 : i32
    return %c0_i32, %c0_i32_0, %c0_i32_1 : i32, i32, i32
  }
  func.func @transform_2(%arg0: i32, %arg1: i32) -> (i32, i32) {
    %c0_i32 = arith.constant 0 : i32
    %c0_i32_0 = arith.constant 0 : i32
    %c0_i32_1 = arith.constant 0 : i32
    return %c0_i32, %c0_i32_0 : i32, i32
  }
  func.func @transform_3(%arg0: i32, %arg1: i32) -> (i32, i32, i32) {
    %c0_i32 = arith.constant 0 : i32
    %c0_i32_0 = arith.constant 0 : i32
    %c0_i32_1 = arith.constant 0 : i32
    %c0_i32_2 = arith.constant 0 : i32
    return %c0_i32, %c0_i32_0, %c0_i32_1 : i32, i32, i32
  }
  func.func @transform_4(%arg0: i32, %arg1: i32) -> (i32, i32) {
    %c0_i32 = arith.constant 0 : i32
    %c0_i32_0 = arith.constant 0 : i32
    %c0_i32_1 = arith.constant 0 : i32
    return %c0_i32, %c0_i32_0 : i32, i32
  }
  func.func @transform_5(%arg0: i32, %arg1: i32) -> (i32, i32) {
    %c0_i32 = arith.constant 0 : i32
    %c0_i32_0 = arith.constant 0 : i32
    %c0_i32_1 = arith.constant 0 : i32
    return %c0_i32, %c0_i32_0 : i32, i32
  }
  func.func @transform_6(%arg0: i32, %arg1: i32) -> (i32, i32) {
    %c0_i32 = arith.constant 0 : i32
    %c0_i32_0 = arith.constant 0 : i32
    %c0_i32_1 = arith.constant 0 : i32
    return %c0_i32, %c0_i32_0 : i32, i32
  }
  func.func @transform_7(%arg0: i32, %arg1: i32) -> (i32, i32, i32, i32) {
    %c0_i32 = arith.constant 0 : i32
    %c0_i32_0 = arith.constant 0 : i32
    %c0_i32_1 = arith.constant 0 : i32
    return %arg0, %arg1, %c0_i32, %c0_i32_0 : i32, i32, i32, i32
  }
}

</mosaic_0001>

<bundles_post_ra>
// kernel: residual_block_2d.1
= control target key start
LH: loop header
LB: loop body
LE: loop exit
PB: predicated region body
PF: predicated region fallthrough
CT: control target
= control target key end

     0   :  { %s6877_s24 = smov 0   ;;  %s6879_s25 = smov 0   ;;  %s8137_s0 = inlined_call_operand.vmem [shape: bf16[2,44,9,128], index: 0, kind: input, shape index: {}]   ;;  %s8138_s1 = inlined_call_operand.vmem [shape: bf16[9,128,128], index: 1, kind: input, shape index: {}]   ;;  %s8139_s2 = inlined_call_operand.vmem [shape: f32[1,128], index: 2, kind: input, shape index: {}]   ;;  %s8140_s3 = inlined_call_operand.vmem [shape: bf16[9,128,128], index: 3, kind: input, shape index: {}]   ;;  %s8141_s4 = inlined_call_operand.vmem [shape: f32[1,128], index: 4, kind: input, shape index: {}]   ;;  %s8142_s5 = inlined_call_operand.vmem [shape: bf16[128,128], index: 5, kind: input, shape index: {}]   ;;  %s8143_s6 = inlined_call_operand.vmem [shape: f32[1,128], index: 6, kind: input, shape index: {}]   ;;  %s8144_s7 = inlined_call_operand.vmem [shape: f32[2,8,8,128], index: 7, kind: output, shape index: {}]  }
   0x1   :  { %s6881_s26 = smov 0  }
   0x2 LB: > { %s29_s27 = sadd.s32 1, %s6828_s25  ;;  %p5047_p0 = scmp.ge.s32.totalorder %s6832_s26, 1  ;;  %s6832_s26 = sphi %s6881_s26, %s17_s26   ;;  %s6828_s25 = sphi %s6879_s25, %s8154_s25   ;;  %s6824_s24 = sphi %s6877_s24, %s8153_s24  }
   0x3   : > { %p31_p1 = scmp.ge.s32.totalorder %s29_s27, 2  ;;  %p251_p2 = scmp.lt.s32.totalorder %s6832_s26, 3 }
   0x5   : > { %s8156_s27 = smov (%p31_p1, %s29_s27), 0  ;;  %p252_p3 = pnand %p5047_p0, %p251_p2 }
   0x6   : > { %v6612_v0 = vld [vmem:[%s8138_s1 + $0x40] sm:$0xff] (!%p252_p3)   ;;  %v6834_v1 = vmov (!%p252_p3), 0.0   ;;  %v6613_v2 = vld [vmem:[%s8138_s1 + $0x48] sm:$0xff] (!%p252_p3)   ;;  %vm6835_vm0 = vmmov (!%p252_p3), 0   ;;  %p287_p4 = scmp.lt.s32.totalorder (!%p252_p3), %s6824_s24, 1  ;;  %v6614_v3 = vld [vmem:[%s8138_s1 + $0x50] sm:$0xff] (!%p252_p3)  }
   0x7   : > { %255 = sbr.rel (%p252_p3) target bundleno = 1050 (0x41a), region = 48  ;;  %5932 = vmatprep.subr.bf16.mxu0 (!%p252_p3), %v6834_v1  ;;  %6184 = vmatprep.subr.bf16.mxu1 (!%p252_p3), %v6834_v1  ;;  %v6615_v4 = vld [vmem:[%s8138_s1 + $0x58] sm:$0xff] (!%p252_p3)   ;;  %v6616_v5 = vld [vmem:[%s8138_s1 + $0x60] sm:$0xff] (!%p252_p3)   ;;  %v6617_v6 = vld [vmem:[%s8138_s1 + $0x68] sm:$0xff] (!%p252_p3)   ;;  %vm686_vm1 = vsmask.f32 (!%p252_p3), 3328 }
   0x8   : > { %5933 = vmatpush3.bf16.msra.mxu0 (!%p252_p3), %v6612_v0  ;;  %5948 = vmatprep.mubr.msk.bf16.mxu0 (!%p252_p3), %vm6835_vm0, %v6834_v1  ;;  %v6618_v7 = vld [vmem:[%s8138_s1 + $0x70] sm:$0xff] (!%p252_p3)   ;;  %v6619_v8 = vld [vmem:[%s8138_s1 + $0x78] sm:$0xff] (!%p252_p3)   ;;  %v6621_v10 = vld [vmem:[%s8138_s1] sm:$0xff] (!%p252_p3)   ;;  %vm687_vm2 = vsmask.f32 (!%p252_p3), 7440  ;;  %vm2498_vm4 = vcmask (!%p252_p3), 1043459  }
   0x9   : > { %5934 = vmatprep.subr.bf16.mxu0 (!%p252_p3), %v6834_v1  ;;  %6200 = vmatprep.mubr.msk.bf16.mxu1 (!%p252_p3), %vm6835_vm0, %v6834_v1  ;;  %v6622_v11 = vld [vmem:[%s8138_s1 + $0x8] sm:$0xff] (!%p252_p3)   ;;  %v6624_v13 = vld [vmem:[%s8138_s1 + $0x10] sm:$0xff] (!%p252_p3)   ;;  %v6626_v14 = vld [vmem:[%s8138_s1 + $0x18] sm:$0xff] (!%p252_p3)   ;;  %vm2499_vm5 = vsmask.f32 (!%p252_p3), 7950  ;;  %vm2531_vm7 = vcmask (!%p252_p3), 1040384  }
   0xa   : > { %v6627_v16 = vld [vmem:[%s8138_s1 + $0x20] sm:$0xff] (!%p252_p3)   ;;  %v6629_v17 = vld [vmem:[%s8138_s1 + $0x28] sm:$0xff] (!%p252_p3)   ;;  %v6630_v19 = vld [vmem:[%s8138_s1 + $0x30] sm:$0xff] (!%p252_p3)   ;;  %vm2532_vm8 = vsmask.f32 (!%p252_p3), 256 }
   0xb   : > { %v6632_v20 = vld [vmem:[%s8138_s1 + $0x38] sm:$0xff] (!%p252_p3)   ;;  %v6634_v23 = vld [vmem:[%s8138_s1 + $0x80] sm:$0xff] (!%p252_p3)   ;;  %v6635_v24 = vld [vmem:[%s8138_s1 + $0x88] sm:$0xff] (!%p252_p3)   ;;  %vm2598_vm10 = vsmask.f32 (!%p252_p3), 4368 }
   0xc   : > { %5935 = vmatpush3.bf16.msra.mxu0 (!%p252_p3), %v6613_v2  ;;  %v6637_v26 = vld [vmem:[%s8138_s1 + $0x90] sm:$0xff] (!%p252_p3)   ;;  %v6639_v29 = vld [vmem:[%s8138_s1 + $0x98] sm:$0xff] (!%p252_p3)   ;;  %v6640_v35 = vld [vmem:[%s8138_s1 + $0xa0] sm:$0xff] (!%p252_p3)  }
   0xd   : > { %5936 = vmatprep.subr.bf16.mxu0 (!%p252_p3), %v6834_v1  ;;  %v6642_v38 = vld [vmem:[%s8138_s1 + $0xa8] sm:$0xff] (!%p252_p3)   ;;  %v6643_v46 = vld [vmem:[%s8138_s1 + $0xb0] sm:$0xff] (!%p252_p3)   ;;  %v6645_v51 = vld [vmem:[%s8138_s1 + $0xb8] sm:$0xff] (!%p252_p3)  }
   0xe   : > { %s8158_s24 = smov (!%p287_p4, %s6824_s24), 1  ;;  %vm7044_vm3 = vmor %vm686_vm1, %vm687_vm2 }
   0xf   : > { %s6584_s11 = smul.u32 352, %s8158_s24  ;;  %vm7555_vm6 = vmand %vm2498_vm4, %vm2499_vm5  ;;  %s5684_s12 = sshll.u32 %s8158_s24, 6 }
  0x10   : > { %5937 = vmatpush3.bf16.msra.mxu0 %v6614_v3  ;;  %vm7567_vm9 = vmand %vm2531_vm7, %vm2532_vm8  ;;  %s8116_s15 = scalar_lea.vmem %s8144_s7, %s5684_s12 }
  0x11   : > { %s6918_s14 = scalar_lea.vmem %s8137_s0, %s6584_s11  ;;  %5938 = vmatprep.subr.bf16.mxu0 %v6834_v1  ;;  %vm7700_vm11 = vmor %vm2532_vm8, %vm2598_vm10 }
  0x12   : > { %v6620_v9 = vld [vmem:[%s6918_s14 + $0x58] ss:$8 sps:$4 sm:$0xff]   ;;  %v6623_v12 = vld [vmem:[%s6918_s14 + $0x68] ss:$8 sps:$4 sm:$0xff]   ;;  %v667_v36 = vld [vmem:[%s6918_s14 + $0x4] sm:$0x1] }
  0x13   : > { %v6625_v15 = vld [vmem:[%s6918_s14 + $0x78] ss:$8 sps:$4 sm:$0xff]   ;;  %v6628_v18 = vld [vmem:[%s6918_s14 + $0x88] ss:$8 sps:$4 sm:$0xff]   ;;  %v669_v37 = vld [vmem:[%s6918_s14 + $0xc] sm:$0x1] }
  0x14   : > { %5939 = vmatpush3.bf16.msra.mxu0 %v6615_v4  ;;  %v6631_v21 = vld [vmem:[%s6918_s14 + $0x98] ss:$8 sps:$4 sm:$0xff]   ;;  %v668_v28 = vld [vmem:[%s6918_s14 + $0x8] sm:$0xf]  ;;  %v699_v39 = vshll.u32 %v667_v36, 16  ;;  %v713_v40 = vshll.u32 %v669_v37, 16 }
  0x15   : > { %5940 = vmatprep.subr.bf16.mxu0 %v6834_v1  ;;  %v6633_v22 = vld [vmem:[%s6918_s14] ss:$8 sps:$4 sm:$0xff]   ;;  %v6636_v25 = vld [vmem:[%s6918_s14 + $0x10] ss:$8 sps:$4 sm:$0xff]   ;;  %v704_v32 = vshrl.u32 %v668_v28, 16  ;;  %v707_v33 = vshll.u32 %v668_v28, 16 }
  0x16   : > { %v666_v27 = vld [vmem:[%s6918_s14] sm:$0xf]  ;;  %v6641_v45 = vld [vmem:[%s6918_s14 + $0x30] ss:$8 sps:$4 sm:$0xff]   ;;  %v671_v50 = vld [vmem:[%s6918_s14 + $0x14] sm:$0x1] }
  0x17   : > { %v690_v30 = vshrl.u32 %v666_v27, 16  ;;  %v693_v31 = vshll.u32 %v666_v27, 16  ;;  %v6638_v34 = vld [vmem:[%s6918_s14 + $0x20] ss:$8 sps:$4 sm:$0xff]   ;;  %v706_v43 = vrot.slane %v704_v32, 4  ;;  %v709_v44 = vrot.slane %v707_v33, 5 }
  0x18   : > { %5941 = vmatpush3.bf16.msra.mxu0 %v6616_v5  ;;  %v670_v47 = vld [vmem:[%s6918_s14 + $0x10] sm:$0xf]  ;;  %v672_v48 = vld [vmem:[%s6918_s14 + $0x18] sm:$0xf]  ;;  %v701_v56 = vrot.slane %v699_v39, 5  ;;  %v715_v58 = vrot.slane %v713_v40, 5 }
  0x19   : > { %5942 = vmatprep.subr.bf16.mxu0 %v6834_v1  ;;  %v692_v41 = vrot.slane %v690_v30, 4  ;;  %v695_v42 = vrot.slane %v693_v31, 5  ;;  %v718_v52 = vshrl.u32 %v670_v47, 16  ;;  %v721_v53 = vshll.u32 %v670_v47, 16  ;;  %v673_v59 = vld [vmem:[%s6918_s14 + $0x1c] sm:$0x1] }
  0x1a   : > { %v732_v54 = vshrl.u32 %v672_v48, 16  ;;  %v735_v55 = vshll.u32 %v672_v48, 16  ;;  %v710_v57 = vor.u32 %v709_v44, %v706_v43  ;;  %v727_v61 = vshll.u32 %v671_v50, 16  ;;  %v6644_v62 = vld [vmem:[%s6918_s14 + $0x40] ss:$8 sps:$4 sm:$0xff]  }
  0x1b   : > { %v696_v49 = vor.u32 %v695_v42, %v692_v41  ;;  %v720_v63 = vrot.slane %v718_v52, 4  ;;  %v723_v0 = vrot.slane %v721_v53, 5  ;;  %v741_v5 = vshll.u32 %v673_v59, 16  ;;  %v678_v30 = vld [vmem:[%s6918_s14 + $0x30] sm:$0xf]  ;;  %v6647_v40 = vld [vmem:[%s8138_s1 + $0xc8] sm:$0xff]  }
  0x1c   : > { %5943 = vmatpush3.bf16.msra.mxu0 %v6617_v6  ;;  %v734_v2 = vrot.slane %v732_v54, 4  ;;  %v737_v3 = vrot.slane %v735_v55, 5  ;;  %v711_v4 = vrot.slane %v710_v57, 4  ;;  %v674_v6 = vld [vmem:[%s6918_s14 + $0x20] sm:$0xf]  ;;  %v774_v37 = vshrl.u32 %v678_v30, 16 }
  0x1d   : > { %5944 = vmatprep.subr.bf16.mxu0 %v6834_v1  ;;  %v697_v60 = vrot.slane %v696_v49, 4  ;;  %v680_v31 = vld [vmem:[%s6918_s14 + $0x38] sm:$0xf]  ;;  %v6683_v43 = vld [vmem:[%s8138_s1 + $0x1c0] sm:$0xff]   ;;  %v679_v48 = vld [vmem:[%s6918_s14 + $0x34] sm:$0x1] }
  0x1e   : > { %v788_v39 = vshrl.u32 %v680_v31, 16  ;;  %v791_v42 = vshll.u32 %v680_v31, 16  ;;  %6185 = vmatpush3.bf16.msra.mxu1 %v6683_v43  ;;  %v681_v50 = vld [vmem:[%s6918_s14 + $0x3c] sm:$0x1]  ;;  %v682_v55 = vld [vmem:[%s6918_s14 + $0x40] sm:$0xf] }
  0x1f   : > { %6186 = vmatprep.subr.bf16.mxu1 %v6834_v1  ;;  %v684_v57 = vld [vmem:[%s6918_s14 + $0x48] sm:$0xf]  ;;  %v797_v59 = vshll.u32 %v681_v50, 16  ;;  %v6654_v43 = vld [vmem:[%s6918_s14 + $0xb0] ss:$8 sps:$4 sm:$0xff]  }
  0x20   : > { %5945 = vmatpush3.bf16.msra.mxu0 %v6618_v7  ;;  %v676_v7 = vld [vmem:[%s6918_s14 + $0x28] sm:$0xf]  ;;  %v790_v53 = vrot.slane %v788_v39, 4  ;;  %v793_v54 = vrot.slane %v791_v42, 5  ;;  %v6693_v39 = vld [vmem:[%s8138_s1 + $0x1f0] sm:$0xff]  }
  0x21   : > { %5946 = vmatprep.subr.bf16.mxu0 %v6834_v1  ;;  %v6698_v42 = vld [vmem:[%s6918_s14 + $0x60] ss:$8 sps:$4 sm:$0xff]  }
  0x22   : > { %v6705_v50 = vld [vmem:[%s6918_s14 + $0x80] ss:$8 sps:$4 sm:$0xff]  }
  0x24   : > { %5947 = vmatpush3.bf16.msra.mxu0 %v6619_v8  ;;  %v6803_v8 = vld [vmem:[%s8142_s5 + $0x28] sm:$0xff]  }
  0x25   : > { %5968 = vmatprep.subr.bf16.mxu0 %v6834_v1 }
  0x27   : > { %5949 = vmatmul.mubr.bf16.vlgmr.msra.gmra.mrb[0].mxu0 %v6620_v9  ;;  %v724_v9 = vor.u32 %v723_v0, %v720_v63  ;;  %v805_v63 = vshll.u32 %v682_v55, 16  ;;  %v6649_v0 = vld [vmem:[%s8138_s1 + $0xd8] sm:$0xff]  }
  0x28   : > { %5969 = vmatpush3.bf16.msra.mxu0 %v6621_v10  ;;  %5952 = vmatprep.mubr.msk.bf16.mxu0 %vm6835_vm0, %v6834_v1  ;;  %v738_v10 = vor.u32 %v737_v3, %v734_v2  ;;  %v794_v3 = vor.u32 %v793_v54, %v790_v53  ;;  %v6663_v53 = vld [vmem:[%s8138_s1 + $0x128] sm:$0xff]   ;;  %v6708_v54 = vld [vmem:[%s6918_s14 + $0x90] ss:$8 sps:$4 sm:$0xff]  }
  0x29   : > { %5970 = vmatprep.subr.bf16.mxu0 %v6834_v1 }
  0x2c   : > { %5971 = vmatpush3.bf16.msra.mxu0 %v6622_v11  ;;  %v746_v11 = vshrl.u32 %v674_v6, 16 }
  0x2d   : > { %5972 = vmatprep.subr.bf16.mxu0 %v6834_v1 }
  0x2f   : > { %5953 = vmatmul.mubr.bf16.gmra.mrb[4].mxu0 %v6623_v12  ;;  %v749_v12 = vshll.u32 %v674_v6, 16  ;;  %v6686_v6 = vld [vmem:[%s8138_s1 + $0x1d0] sm:$0xff]  }
  0x30   : > { %5973 = vmatpush3.bf16.msra.mxu0 %v6624_v13  ;;  %5956 = vmatprep.mubr.msk.bf16.mxu0 %vm6835_vm0, %v6834_v1  ;;  %v760_v13 = vshrl.u32 %v676_v7, 16 }
  0x31   : > { %5974 = vmatprep.subr.bf16.mxu0 %v6834_v1 }
  0x32   : > { %v762_v28 = vrot.slane %v760_v13, 4 }
  0x34   : > { %5975 = vmatpush3.bf16.msra.mxu0 %v6626_v14  ;;  %v763_v14 = vshll.u32 %v676_v7, 16 }
  0x35   : > { %5976 = vmatprep.subr.bf16.mxu0 %v6834_v1 }
  0x37   : > { %5957 = vmatmul.mubr.bf16.gmra.mrb[8].mxu0 %v6625_v15  ;;  %v702_v15 = vsel %vm7044_vm3, %v697_v60, %v701_v56  ;;  %v6684_v56 = vld [vmem:[%s8138_s1 + $0x1c8] sm:$0xff]  }
  0x38   : > { %5977 = vmatpush3.bf16.msra.mxu0 %v6627_v16  ;;  %5960 = vmatprep.mubr.msk.bf16.mxu0 %vm6835_vm0, %v6834_v1  ;;  %v716_v16 = vsel %vm7044_vm3, %v711_v4, %v715_v58  ;;  %v783_v58 = vshll.u32 %v679_v48, 16  ;;  %v816_v4 = vshrl.u32 %v684_v57, 16  ;;  %v6657_v48 = vld [vmem:[%s6918_s14 + $0xc0] ss:$8 sps:$4 sm:$0xff]  }
  0x39   : > { %5978 = vmatprep.subr.bf16.mxu0 %v6834_v1  ;;  %6187 = vmatpush3.bf16.msra.mxu1 %v6684_v56  ;;  %v6664_v56 = vld [vmem:[%s8138_s1 + $0x130] sm:$0xff]  }
  0x3a   : > { %6188 = vmatprep.subr.bf16.mxu1 %v6834_v1  ;;  %v785_v7 = vrot.slane %v783_v58, 5  ;;  %v6666_v58 = vld [vmem:[%s8138_s1 + $0x138] sm:$0xff]  }
  0x3c   : > { %5979 = vmatpush3.bf16.msra.mxu0 %v6629_v17  ;;  %v729_v17 = vrot.slane %v727_v61, 5 }
  0x3d   : > { %5980 = vmatprep.subr.bf16.mxu0 %v6834_v1  ;;  %6189 = vmatpush3.bf16.msra.mxu1 %v6686_v6 }
  0x3e   : > { %6190 = vmatprep.subr.bf16.mxu1 %v6834_v1 }
  0x3f   : > { %5961 = vmatmul.mubr.bf16.gmra.mrb[12].mxu0 %v6628_v18  ;;  %v743_v18 = vrot.slane %v741_v5, 5  ;;  %v819_v5 = vshll.u32 %v684_v57, 16  ;;  %v6712_v57 = vld [vmem:[%s6918_s14 + $0xa0] ss:$8 sps:$4 sm:$0xff]  }
  0x40   : > { %5964 = vmatprep.mubr.msk.bf16.mxu0 %vm6835_vm0, %v6834_v1  ;;  %5981 = vmatpush3.bf16.msra.mxu0 %v6630_v19  ;;  %v675_v19 = vld [vmem:[%s6918_s14 + $0x24] sm:$0x1] }
  0x41   : > { %5982 = vmatprep.subr.bf16.mxu0 %v6834_v1  ;;  %v755_v27 = vshll.u32 %v675_v19, 16  ;;  %v821_v19 = vrot.slane %v819_v5, 5  ;;  %v5212_v5 = vld [vmem:[%s6918_s14 + $0xb8] sm:$0xf] }
  0x43   : > { %v757_v41 = vrot.slane %v755_v27, 5 }
  0x44   : > { %5983 = vmatpush3.bf16.msra.mxu0 %v6632_v20  ;;  %v677_v20 = vld [vmem:[%s6918_s14 + $0x2c] sm:$0x1] }
  0x45   : > { %6004 = vmatprep.subr.bf16.mxu0 %v6834_v1 }
  0x47   : > { %5965 = vmatmul.mubr.bf16.gmra.mrb[16].mxu0 %v6631_v21  ;;  %v725_v21 = vrot.slane %v724_v9, 4  ;;  %v799_v9 = vrot.slane %v797_v59, 5  ;;  %v6665_v59 = vld [vmem:[%s6918_s14 + $0xf0] ss:$8 sps:$4 sm:$0xff]  }
  0x48   : > { %5984 = vmatprep.mubr.msk.bf16.mxu0 %vm6835_vm0, %v6834_v1 }
  0x49   : > { %v730_v32 = vsel %vm7044_vm3, %v725_v21, %v729_v17  ;;  %v795_v17 = vrot.slane %v794_v3, 4  ;;  %v5210_v3 = vld [vmem:[%s6918_s14 + $0xb0] sm:$0xf] }
  0x4a   : > { %v1402_v6 = vshrl.u32 %v5210_v3, 16 }
  0x4f   : > { %5985 = vmatmul.mubr.bf16.vlgmr.msra.gmra.mrb[20].mxu0 %v6633_v22  ;;  %v739_v22 = vrot.slane %v738_v10, 4 }
  0x50   : > { %6005 = vmatpush3.bf16.msra.mxu0 %v6634_v23  ;;  %5988 = vmatprep.mubr.msk.bf16.mxu0 %vm6835_vm0, %v6834_v1  ;;  %v748_v23 = vrot.slane %v746_v11, 4  ;;  %v683_v11 = vld [vmem:[%s6918_s14 + $0x44] sm:$0x1] }
  0x51   : > { %6006 = vmatprep.subr.bf16.mxu0 %v6834_v1  ;;  %v744_v33 = vsel %vm7044_vm3, %v739_v22, %v743_v18  ;;  %v818_v18 = vrot.slane %v816_v4, 4  ;;  %v811_v21 = vshll.u32 %v683_v11, 16  ;;  %v6672_v4 = vld [vmem:[%s6918_s14 + $0x128] ss:$8 sps:$4 sm:$0xff]   ;;  %v1419_v11 = vshll.u32 %v5212_v5, 16 }
  0x52   : > { %v5120_v44 = vcombine.low %v730_v32, %v744_v33 }
  0x53   : > { %v822_v27 = vor.u32 %v821_v19, %v818_v18  ;;  %v1421_v19 = vrot.slane %v1419_v11, 5 }
  0x54   : > { %6007 = vmatpush3.bf16.msra.mxu0 %v6635_v24  ;;  %v751_v24 = vrot.slane %v749_v12, 5  ;;  %v685_v12 = vld [vmem:[%s6918_s14 + $0x4c] sm:$0x1] }
  0x55   : > { %6008 = vmatprep.subr.bf16.mxu0 %v6834_v1 }
  0x57   : > { %5989 = vmatmul.mubr.bf16.gmra.mrb[24].mxu0 %v6636_v25  ;;  %v5119_v25 = vcombine.low %v702_v15, %v716_v16  ;;  %v6650_v15 = vld [vmem:[%s8138_s1 + $0xe0] sm:$0xff]  }
  0x58   : > { %6009 = vmatpush3.bf16.msra.mxu0 %v6637_v26  ;;  %5992 = vmatprep.mubr.msk.bf16.mxu0 %vm6835_vm0, %v6834_v1  ;;  %v6646_v26 = vld [vmem:[%s8138_s1 + $0xc0] sm:$0xff]  }
  0x59   : > { %6010 = vmatprep.subr.bf16.mxu0 %v6834_v1 }
  0x5c   : > { %6011 = vmatpush3.bf16.msra.mxu0 %v6639_v29  ;;  %v765_v29 = vrot.slane %v763_v14, 5  ;;  %v807_v14 = vrot.slane %v805_v63, 5  ;;  %v6670_v63 = vld [vmem:[%s6918_s14 + $0x118] ss:$8 sps:$4 sm:$0xff]  }
  0x5d   : > { %6012 = vmatprep.subr.bf16.mxu0 %v6834_v1 }
  0x5e   : > { %v766_v36 = vor.u32 %v765_v29, %v762_v28  ;;  %v6690_v28 = vld [vmem:[%s8138_s1 + $0x1e0] sm:$0xff]   ;;  %v6652_v29 = vld [vmem:[%s8138_s1 + $0xf0] sm:$0xff]  }
  0x5f   : > { %5993 = vmatmul.mubr.bf16.gmra.mrb[28].mxu0 %v6638_v34  ;;  %v752_v34 = vor.u32 %v751_v24, %v748_v23  ;;  %v825_v23 = vshll.u32 %v685_v12, 16  ;;  %v6676_v12 = vld [vmem:[%s8138_s1 + $0x168] sm:$0xff]  }
  0x60   : > { %6013 = vmatpush3.bf16.msra.mxu0 %v6640_v35  ;;  %5996 = vmatprep.mubr.msk.bf16.mxu0 %vm6835_vm0, %v6834_v1  ;;  %v769_v35 = vshll.u32 %v677_v20, 16  ;;  %v767_v49 = vrot.slane %v766_v36, 4  ;;  %v6688_v20 = vld [vmem:[%s8138_s1 + $0x1d8] sm:$0xff]  }
  0x61   : > { %6014 = vmatprep.subr.bf16.mxu0 %v6834_v1  ;;  %6191 = vmatpush3.bf16.msra.mxu1 %v6688_v20  ;;  %v827_v33 = vrot.slane %v825_v23, 5  ;;  %v6653_v36 = vld [vmem:[%s8138_s1 + $0xf8] sm:$0xff]   ;;  %v5216_v20 = vld [vmem:[%s6918_s14 + $0xc8] sm:$0xf] }
  0x62   : > { %v771_v47 = vrot.slane %v769_v35, 5  ;;  %6192 = vmatprep.subr.bf16.mxu1 %v6834_v1  ;;  %v6692_v35 = vld [vmem:[%s8138_s1 + $0x1e8] sm:$0xff]  }
  0x64   : > { %6015 = vmatpush3.bf16.msra.mxu0 %v6642_v38  ;;  %v777_v38 = vshll.u32 %v678_v30, 16  ;;  %v772_v61 = vsel %vm7044_vm3, %v767_v49, %v771_v47  ;;  %v813_v30 = vrot.slane %v811_v21, 5  ;;  %v6658_v47 = vld [vmem:[%s8138_s1 + $0x110] sm:$0xff]   ;;  %v6660_v49 = vld [vmem:[%s8138_s1 + $0x118] sm:$0xff]  }
  0x65   : > { %6016 = vmatprep.subr.bf16.mxu0 %v6834_v1  ;;  %6193 = vmatpush3.bf16.msra.mxu1 %v6690_v28  ;;  %v5211_v21 = vld [vmem:[%s6918_s14 + $0xb4] sm:$0x1] }
  0x66   : > { %v779_v52 = vrot.slane %v777_v38, 5  ;;  %6194 = vmatprep.subr.bf16.mxu1 %v6834_v1 }
  0x67   : > { %5997 = vmatmul.mubr.bf16.gmra.mrb[32].mxu0 %v6641_v45  ;;  %v6648_v45 = vld [vmem:[%s8138_s1 + $0xd0] sm:$0xff]  }
  0x68   : > { %6000 = vmatprep.mubr.msk.bf16.mxu0 %vm6835_vm0, %v6834_v1  ;;  %6017 = vmatpush3.bf16.msra.mxu0 %v6643_v46  ;;  %v753_v46 = vrot.slane %v752_v34, 4  ;;  %v823_v34 = vrot.slane %v822_v27, 4  ;;  %v6679_v27 = vld [vmem:[%s8138_s1 + $0x178] sm:$0xff]  }
  0x69   : > { %6018 = vmatprep.subr.bf16.mxu0 %v6834_v1  ;;  %6195 = vmatpush3.bf16.msra.mxu1 %v6692_v35 }
  0x6a   : > { %v758_v60 = vsel %vm7044_vm3, %v753_v46, %v757_v41  ;;  %6196 = vmatprep.subr.bf16.mxu1 %v6834_v1  ;;  %v828_v38 = vsel %vm7044_vm3, %v823_v34, %v827_v33  ;;  %v6695_v41 = vld [vmem:[%s8138_s1 + $0x1f8] sm:$0xff]  }
  0x6b   : > { %v5121_v10 = vcombine.low %v758_v60, %v772_v61  ;;  %v6701_v46 = vld [vmem:[%s6918_s14 + $0x70] ss:$8 sps:$4 sm:$0xff]   ;;  %v6668_v61 = vld [vmem:[%s8138_s1 + $0x140] sm:$0xff]  }
  0x6c   : > { %6019 = vmatpush3.bf16.msra.mxu0 %v6645_v51  ;;  %v776_v51 = vrot.slane %v774_v37, 4  ;;  %v6667_v60 = vld [vmem:[%s6918_s14 + $0x108] ss:$8 sps:$4 sm:$0xff]  }
  0x6d   : > { %6040 = vmatprep.subr.bf16.mxu0 %v6834_v1  ;;  %6197 = vmatpush3.bf16.msra.mxu1 %v6693_v39  ;;  %v5218_v39 = vld [vmem:[%s6918_s14 + $0xd0] sm:$0xf] }
  0x6e   : > { %v780_v2 = vor.u32 %v779_v52, %v776_v51  ;;  %6198 = vmatprep.subr.bf16.mxu1 %v6834_v1  ;;  %v6659_v51 = vld [vmem:[%s6918_s14 + $0xd0] ss:$8 sps:$4 sm:$0xff]   ;;  %v6661_v52 = vld [vmem:[%s8138_s1 + $0x120] sm:$0xff]  }
  0x6f   : > { %6001 = vmatmul.mubr.bf16.gmra.mrb[36].mxu0 %v6644_v62  ;;  %v802_v62 = vshrl.u32 %v682_v55, 16  ;;  %v6662_v55 = vld [vmem:[%s6918_s14 + $0xe0] ss:$8 sps:$4 sm:$0xff]  }
  0x70   : > { %6020 = vmatprep.mubr.msk.bf16.mxu0 %vm6835_vm0, %v6834_v1  ;;  %v781_v16 = vrot.slane %v780_v2, 4  ;;  %v6673_v2 = vld [vmem:[%s8138_s1 + $0x158] sm:$0xff]  }
  0x71   : > { %v804_v13 = vrot.slane %v802_v62, 4  ;;  %6199 = vmatpush3.bf16.msra.mxu1 %v6695_v41  ;;  %v6669_v62 = vld [vmem:[%s8138_s1 + $0x148] sm:$0xff]  }
  0x72   : > { %v786_v24 = vsel %vm7044_vm3, %v781_v16, %v785_v7  ;;  %v1405_v7 = vshll.u32 %v5210_v3, 16  ;;  %v6675_v16 = vld [vmem:[%s6918_s14 + $0x138] ss:$8 sps:$4 sm:$0xff]  }
  0x73   : > { %v808_v22 = vor.u32 %v807_v14, %v804_v13  ;;  %v1404_v13 = vrot.slane %v1402_v6, 4  ;;  %v6680_v3 = vld [vmem:[%s8138_s1 + $0x180] sm:$0xff]  }
  0x74   : > { %6201 = vmatmul.mubr.bf16.vlgmr.msra.gmra.mrb[0].mxu1 %v6698_v42  ;;  %v1407_v14 = vrot.slane %v1405_v7, 5 }
  0x75   : > { %v809_v32 = vrot.slane %v808_v22, 4  ;;  %6204 = vmatprep.mubr.msk.bf16.mxu1 %vm6835_vm0, %v6834_v1  ;;  %v5213_v22 = vld [vmem:[%s6918_s14 + $0xbc] sm:$0x1] }
  0x76   : > { %v1408_v28 = vor.u32 %v1407_v14, %v1404_v13 }
  0x77   : > { %6021 = vmatmul.mubr.bf16.vlgmr.msra.gmra.mrb[40].mxu0 %v5119_v25  ;;  %v800_v25 = vsel %vm7044_vm3, %v795_v17, %v799_v9  ;;  %v814_v37 = vsel %vm7044_vm3, %v809_v32, %v813_v30  ;;  %v6674_v9 = vld [vmem:[%s8138_s1 + $0x160] sm:$0xff]   ;;  %v6677_v17 = vld [vmem:[%s8138_s1 + $0x170] sm:$0xff]  }
  0x78   : > { %6041 = vmatpush3.bf16.msra.mxu0 %v6646_v26  ;;  %6024 = vmatprep.mubr.msk.bf16.mxu0 %vm6835_vm0, %v6834_v1  ;;  %v6651_v26 = vld [vmem:[%s8138_s1 + $0xe8] sm:$0xff]   ;;  %v5122_v31 = vcombine.low %v786_v24, %v800_v25  ;;  %v1444_v25 = vshrl.u32 %v5216_v20, 16  ;;  %v1409_v41 = vrot.slane %v1408_v28, 4  ;;  %v5223_v28 = vld [vmem:[%s6918_s14 + $0xe4] sm:$0x1] }
  0x79   : > { %6042 = vmatprep.subr.bf16.mxu0 %v6834_v1 }
  0x7a   : > { %v1446_v34 = vrot.slane %v1444_v25, 4 }
  0x7c   : > { %6043 = vmatpush3.bf16.msra.mxu0 %v6647_v40  ;;  %v5123_v40 = vcombine.low %v814_v37, %v828_v38  ;;  %6205 = vmatmul.mubr.bf16.gmra.mrb[4].mxu1 %v6701_v46  ;;  %v5217_v37 = vld [vmem:[%s6918_s14 + $0xcc] sm:$0x1]  ;;  %v6678_v38 = vld [vmem:[%s6918_s14 + $0x148] ss:$8 sps:$4 sm:$0xff]  }
  0x7d   : > { %6044 = vmatprep.subr.bf16.mxu0 %v6834_v1  ;;  %6208 = vmatprep.mubr.msk.bf16.mxu1 %vm6835_vm0, %v6834_v1 }
  0x7f   : > { %6025 = vmatmul.mubr.bf16.gmra.mrb[44].mxu0 %v5120_v44  ;;  %v6655_v44 = vld [vmem:[%s8138_s1 + $0x100] sm:$0xff]  }
  0x80   : > { %6045 = vmatpush3.bf16.msra.mxu0 %v6648_v45  ;;  %6028 = vmatprep.mubr.msk.bf16.mxu0 %vm6835_vm0, %v6834_v1  ;;  %v6656_v45 = vld [vmem:[%s8138_s1 + $0x108] sm:$0xff]  }
  0x81   : > { %6046 = vmatprep.subr.bf16.mxu0 %v6834_v1 }
  0x84   : > { %6047 = vmatpush3.bf16.msra.mxu0 %v6649_v0  ;;  %6209 = vmatmul.mubr.bf16.gmra.mrb[8].mxu1 %v6705_v50  ;;  %v6671_v0 = vld [vmem:[%s8138_s1 + $0x150] sm:$0xff]   ;;  %v1461_v50 = vshll.u32 %v5218_v39, 16 }
  0x85   : > { %6048 = vmatprep.subr.bf16.mxu0 %v6834_v1  ;;  %6212 = vmatprep.mubr.msk.bf16.mxu1 %vm6835_vm0, %v6834_v1 }
  0x87   : > { %6029 = vmatmul.mubr.bf16.gmra.mrb[48].mxu0 %v5121_v10  ;;  %v1416_v10 = vshrl.u32 %v5212_v5, 16  ;;  %v5224_v5 = vld [vmem:[%s6918_s14 + $0xe8] sm:$0xf] }
  0x88   : > { %6049 = vmatpush3.bf16.msra.mxu0 %v6650_v15  ;;  %6032 = vmatprep.mubr.msk.bf16.mxu0 %vm6835_vm0, %v6834_v1  ;;  %v5214_v15 = vld [vmem:[%s6918_s14 + $0xc0] sm:$0xf] }
  0x89   : > { %6050 = vmatprep.subr.bf16.mxu0 %v6834_v1  ;;  %v1418_v18 = vrot.slane %v1416_v10, 4  ;;  %v1430_v23 = vshrl.u32 %v5214_v15, 16  ;;  %v1433_v24 = vshll.u32 %v5214_v15, 16  ;;  %v1500_v15 = vshrl.u32 %v5224_v5, 16 }
  0x8b   : > { %v1422_v30 = vor.u32 %v1421_v19, %v1418_v18  ;;  %v1432_v32 = vrot.slane %v1430_v23, 4  ;;  %v1435_v33 = vrot.slane %v1433_v24, 5  ;;  %v1502_v25 = vrot.slane %v1500_v15, 4 }
  0x8c   : > { %6051 = vmatpush3.bf16.msra.mxu0 %v6651_v26  ;;  %6213 = vmatmul.mubr.bf16.gmra.mrb[12].mxu1 %v6708_v54  ;;  %v1447_v26 = vshll.u32 %v5216_v20, 16 }
  0x8d   : > { %6052 = vmatprep.subr.bf16.mxu0 %v6834_v1  ;;  %6216 = vmatprep.mubr.msk.bf16.mxu1 %vm6835_vm0, %v6834_v1 }
  0x8e   : > { %v1449_v35 = vrot.slane %v1447_v26, 5 }
  0x8f   : > { %6033 = vmatmul.mubr.bf16.gmra.mrb[52].mxu0 %v5122_v31  ;;  %v1425_v31 = vshll.u32 %v5213_v22, 16 }
  0x90   : > { %6036 = vmatprep.mubr.msk.bf16.mxu0 %vm6835_vm0, %v6834_v1  ;;  %6053 = vmatpush3.bf16.msra.mxu0 %v6652_v29  ;;  %v1411_v29 = vshll.u32 %v5211_v21, 16 }
  0x91   : > { %6054 = vmatprep.subr.bf16.mxu0 %v6834_v1 }
  0x92   : > { %v1413_v42 = vrot.slane %v1411_v29, 5  ;;  %v5225_v29 = vld [vmem:[%s6918_s14 + $0xec] sm:$0x1] }
  0x94   : > { %6055 = vmatpush3.bf16.msra.mxu0 %v6653_v36  ;;  %6217 = vmatmul.mubr.bf16.gmra.mrb[16].mxu1 %v6712_v57  ;;  %v5215_v36 = vld [vmem:[%s6918_s14 + $0xc4] sm:$0x1] }
  0x95   : > { %6076 = vmatprep.subr.bf16.mxu0 %v6834_v1  ;;  %v1439_v46 = vshll.u32 %v5215_v36, 16 }
  0x97   : > { %6037 = vmatmul.mubr.bf16.gmra.mrb[56].mxu0 %v5123_v40  ;;  %v5220_v40 = vld [vmem:[%s6918_s14 + $0xd8] sm:$0xf] }
  0x98   : > { %6056 = vmatprep.mubr.msk.bf16.mxu0 %vm6835_vm0, %v6834_v1 }
  0x9f   : > { %6057 = vmatmul.mubr.bf16.vlgmr.msra.gmra.mrb[60].mxu0 %v6654_v43  ;;  %v1423_v43 = vrot.slane %v1422_v30, 4  ;;  %v5226_v30 = vld [vmem:[%s6918_s14 + $0xf0] sm:$0xf] }
  0xa0   : > { %6077 = vmatpush3.bf16.msra.mxu0 %v6655_v44  ;;  %6060 = vmatprep.mubr.msk.bf16.mxu0 %vm6835_vm0, %v6834_v1  ;;  %v1427_v44 = vrot.slane %v1425_v31, 5  ;;  %v5228_v31 = vld [vmem:[%s6918_s14 + $0xf8] sm:$0xf] }
  0xa1   : > { %6078 = vmatprep.subr.bf16.mxu0 %v6834_v1 }
  0xa2   : > { %v1428_v54 = vsel %vm7044_vm3, %v1423_v43, %v1427_v44 }
  0xa4   : > { %6079 = vmatpush3.bf16.msra.mxu0 %v6656_v45  ;;  %v1436_v45 = vor.u32 %v1435_v33, %v1432_v32 }
  0xa5   : > { %6080 = vmatprep.subr.bf16.mxu0 %v6834_v1 }
  0xa7   : > { %6061 = vmatmul.mubr.bf16.gmra.mrb[64].mxu0 %v6657_v48  ;;  %v1453_v48 = vshll.u32 %v5217_v37, 16  ;;  %v1509_v37 = vshll.u32 %v5225_v29, 16 }
  0xa8   : > { %6081 = vmatpush3.bf16.msra.mxu0 %v6658_v47  ;;  %6064 = vmatprep.mubr.msk.bf16.mxu0 %vm6835_vm0, %v6834_v1  ;;  %v1450_v47 = vor.u32 %v1449_v35, %v1446_v34  ;;  %v1495_v35 = vshll.u32 %v5223_v28, 16  ;;  %v6699_v28 = vld [vmem:[%s8138_s1 + $0x208] sm:$0xff]  }
  0xa9   : > { %6082 = vmatprep.subr.bf16.mxu0 %v6834_v1 }
  0xaa   : > { %v1451_v57 = vrot.slane %v1450_v47, 4  ;;  %v1497_v47 = vrot.slane %v1495_v35, 5  ;;  %v6704_v35 = vld [vmem:[%s8138_s1 + $0x218] sm:$0xff]  }
  0xac   : > { %6083 = vmatpush3.bf16.msra.mxu0 %v6660_v49  ;;  %v1458_v49 = vshrl.u32 %v5218_v39, 16  ;;  %v1514_v39 = vshrl.u32 %v5226_v30, 16 }
  0xad   : > { %6084 = vmatprep.subr.bf16.mxu0 %v6834_v1 }
  0xaf   : > { %6065 = vmatmul.mubr.bf16.gmra.mrb[68].mxu0 %v6659_v51  ;;  %v1472_v51 = vshrl.u32 %v5220_v40, 16 }
  0xb0   : > { %6085 = vmatpush3.bf16.msra.mxu0 %v6661_v52  ;;  %6068 = vmatprep.mubr.msk.bf16.mxu0 %vm6835_vm0, %v6834_v1  ;;  %v1475_v52 = vshll.u32 %v5220_v40, 16  ;;  %v1517_v40 = vshll.u32 %v5226_v30, 16 }
  0xb1   : > { %6086 = vmatprep.subr.bf16.mxu0 %v6834_v1 }
  0xb4   : > { %6087 = vmatpush3.bf16.msra.mxu0 %v6663_v53  ;;  %v1414_v53 = vsel %vm7044_vm3, %v1409_v41, %v1413_v42  ;;  %v1528_v41 = vshrl.u32 %v5228_v31, 16  ;;  %v1531_v42 = vshll.u32 %v5228_v31, 16  ;;  %v6700_v31 = vld [vmem:[%s6918_s14 + $0x18] ss:$8 sps:$4 sm:$0xff]  }
  0xb5   : > { %6088 = vmatprep.subr.bf16.mxu0 %v6834_v1 }
  0xb7   : > { %6069 = vmatmul.mubr.bf16.gmra.mrb[72].mxu0 %v6662_v55  ;;  %v1437_v55 = vrot.slane %v1436_v45, 4 }
  0xb8   : > { %6072 = vmatprep.mubr.msk.bf16.mxu0 %vm6835_vm0, %v6834_v1  ;;  %6089 = vmatpush3.bf16.msra.mxu0 %v6664_v56  ;;  %v1441_v56 = vrot.slane %v1439_v46, 5 }
  0xb9   : > { %6090 = vmatprep.subr.bf16.mxu0 %v6834_v1 }
  0xba   : > { %v1442_v6 = vsel %vm7044_vm3, %v1437_v55, %v1441_v56  ;;  %v1533_v55 = vrot.slane %v1531_v42, 5  ;;  %v6706_v42 = vld [vmem:[%s8138_s1 + $0x220] sm:$0xff]  }
  0xbc   : > { %6091 = vmatpush3.bf16.msra.mxu0 %v6666_v58  ;;  %v1455_v58 = vrot.slane %v1453_v48, 5 }
  0xbd   : > { %6112 = vmatprep.subr.bf16.mxu0 %v6834_v1 }
  0xbe   : > { %v1456_v7 = vsel %vm7044_vm3, %v1451_v57, %v1455_v58  ;;  %v5227_v57 = vld [vmem:[%s6918_s14 + $0xf4] sm:$0x1]  ;;  %v5229_v58 = vld [vmem:[%s6918_s14 + $0xfc] sm:$0x1] }
  0xbf   : > { %6073 = vmatmul.mubr.bf16.gmra.mrb[76].mxu0 %v6665_v59  ;;  %v1460_v59 = vrot.slane %v1458_v49, 4  ;;  %v5247_v18 = vcombine.low %v1442_v6, %v1456_v7  ;;  %v1511_v49 = vrot.slane %v1509_v37, 5  ;;  %v6691_v7 = vld [vmem:[%s8138_s1 + $0x1b0] sm:$0xff]  }
  0xc0   : > { %6092 = vmatprep.mubr.msk.bf16.mxu0 %vm6835_vm0, %v6834_v1 }
  0xc7   : > { %6093 = vmatmul.mubr.bf16.vlgmr.msra.gmra.mrb[80].mxu0 %v6667_v60  ;;  %v1463_v60 = vrot.slane %v1461_v50, 5 }
  0xc8   : > { %6113 = vmatpush3.bf16.msra.mxu0 %v6668_v61  ;;  %6096 = vmatprep.mubr.msk.bf16.mxu0 %vm6835_vm0, %v6834_v1  ;;  %v1474_v61 = vrot.slane %v1472_v51, 4  ;;  %v6687_v51 = vld [vmem:[%s8138_s1 + $0x1a0] sm:$0xff]  }
  0xc9   : > { %6114 = vmatprep.subr.bf16.mxu0 %v6834_v1 }
  0xcc   : > { %6115 = vmatpush3.bf16.msra.mxu0 %v6669_v62  ;;  %v1477_v62 = vrot.slane %v1475_v52, 5  ;;  %v1516_v52 = vrot.slane %v1514_v39, 4  ;;  %v6703_v39 = vld [vmem:[%s6918_s14 + $0x28] ss:$8 sps:$4 sm:$0xff]  }
  0xcd   : > { %6116 = vmatprep.subr.bf16.mxu0 %v6834_v1 }
  0xce   : > { %v1478_v11 = vor.u32 %v1477_v62, %v1474_v61  ;;  %v6689_v61 = vld [vmem:[%s8138_s1 + $0x1a8] sm:$0xff]  }
  0xcf   : > { %6097 = vmatmul.mubr.bf16.gmra.mrb[84].mxu0 %v6670_v63  ;;  %v5246_v63 = vcombine.low %v1414_v53, %v1428_v54  ;;  %v1519_v53 = vrot.slane %v1517_v40, 5  ;;  %v1530_v54 = vrot.slane %v1528_v41, 4  ;;  %v5337_v40 = vld [vmem:[%s6918_s14 + $0x8] sm:$0xf] }
  0xd0   : > { %6117 = vmatpush3.bf16.msra.mxu0 %v6671_v0  ;;  %6100 = vmatprep.mubr.msk.bf16.mxu0 %vm6835_vm0, %v6834_v1  ;;  %v5219_v0 = vld [vmem:[%s6918_s14 + $0xd4] sm:$0x1]  ;;  %v1479_v21 = vrot.slane %v1478_v11, 4 }
  0xd1   : > { %6118 = vmatprep.subr.bf16.mxu0 %v6834_v1  ;;  %v1467_v10 = vshll.u32 %v5219_v0, 16  ;;  %v1520_v62 = vor.u32 %v1519_v53, %v1516_v52  ;;  %v1534_v0 = vor.u32 %v1533_v55, %v1530_v54  ;;  %v5343_v54 = vld [vmem:[%s6918_s14 + $0x20] sm:$0xf] }
  0xd3   : > { %v1469_v20 = vrot.slane %v1467_v10, 5  ;;  %v1535_v11 = vrot.slane %v1534_v0, 4 }
  0xd4   : > { %6119 = vmatpush3.bf16.msra.mxu0 %v6673_v2  ;;  %v5221_v2 = vld [vmem:[%s6918_s14 + $0xdc] sm:$0x1] }
  0xd5   : > { %6120 = vmatprep.subr.bf16.mxu0 %v6834_v1 }
  0xd7   : > { %6101 = vmatmul.mubr.bf16.gmra.mrb[88].mxu0 %v6672_v4  ;;  %v5222_v4 = vld [vmem:[%s6918_s14 + $0xe0] sm:$0xf] }
  0xd8   : > { %6121 = vmatpush3.bf16.msra.mxu0 %v6674_v9  ;;  %6104 = vmatprep.mubr.msk.bf16.mxu0 %vm6835_vm0, %v6834_v1  ;;  %v1464_v9 = vor.u32 %v1463_v60, %v1460_v59  ;;  %v1486_v13 = vshrl.u32 %v5222_v4, 16  ;;  %v1489_v14 = vshll.u32 %v5222_v4, 16 }
  0xd9   : > { %6122 = vmatprep.subr.bf16.mxu0 %v6834_v1 }
  0xda   : > { %v1465_v19 = vrot.slane %v1464_v9, 4  ;;  %v1488_v23 = vrot.slane %v1486_v13, 4  ;;  %v1491_v24 = vrot.slane %v1489_v14, 5  ;;  %v1521_v9 = vrot.slane %v1520_v62, 4  ;;  %v6710_v62 = vld [vmem:[%s8138_s1 + $0x230] sm:$0xff]  }
  0xdc   : > { %6123 = vmatpush3.bf16.msra.mxu0 %v6676_v12  ;;  %v1481_v12 = vshll.u32 %v5221_v2, 16  ;;  %v1470_v32 = vsel %vm7044_vm3, %v1465_v19, %v1469_v20  ;;  %v1492_v34 = vor.u32 %v1491_v24, %v1488_v23  ;;  %v1537_v2 = vshll.u32 %v5229_v58, 16  ;;  %v6696_v24 = vld [vmem:[%s6918_s14 + $0x8] ss:$8 sps:$4 sm:$0xff]  }
  0xdd   : > { %6124 = vmatprep.subr.bf16.mxu0 %v6834_v1 }
  0xde   : > { %v1483_v22 = vrot.slane %v1481_v12, 5  ;;  %v1493_v46 = vrot.slane %v1492_v34, 4  ;;  %v1539_v12 = vrot.slane %v1537_v2, 5 }
  0xdf   : > { %6105 = vmatmul.mubr.bf16.gmra.mrb[92].mxu0 %v6675_v16  ;;  %v1503_v16 = vshll.u32 %v5224_v5, 16 }
  0xe0   : > { %6108 = vmatprep.mubr.msk.bf16.mxu0 %vm6835_vm0, %v6834_v1  ;;  %6125 = vmatpush3.bf16.msra.mxu0 %v6677_v17  ;;  %v6681_v17 = vld [vmem:[%s8138_s1 + $0x188] sm:$0xff]   ;;  %v1484_v33 = vsel %vm7044_vm3, %v1479_v21, %v1483_v22  ;;  %v1498_v59 = vsel %vm7044_vm3, %v1493_v46, %v1497_v47  ;;  %v1540_v15 = vsel %vm7044_vm3, %v1535_v11, %v1539_v12  ;;  %v2117_v47 = vshll.u32 %v5337_v40, 16 }
  0xe1   : > { %6126 = vmatprep.subr.bf16.mxu0 %v6834_v1  ;;  %v1505_v26 = vrot.slane %v1503_v16, 5  ;;  %v5248_v44 = vcombine.low %v1470_v32, %v1484_v33  ;;  %v6694_v16 = vld [vmem:[%s8138_s1 + $0x1b8] sm:$0xff]   ;;  %v6702_v33 = vld [vmem:[%s8138_s1 + $0x210] sm:$0xff]  }
  0xe2   : > { %v2119_v58 = vrot.slane %v2117_v47, 5 }
  0xe3   : > { %v1506_v36 = vor.u32 %v1505_v26, %v1502_v25  ;;  %v6697_v26 = vld [vmem:[%s8138_s1 + $0x200] sm:$0xff]  }
  0xe4   : > { %6127 = vmatpush3.bf16.msra.mxu0 %v6679_v27  ;;  %v6682_v27 = vld [vmem:[%s8138_s1 + $0x190] sm:$0xff]  }
  0xe5   : > { %6148 = vmatprep.subr.bf16.mxu0 %v6834_v1  ;;  %v1507_v48 = vrot.slane %v1506_v36, 4 }
  0xe7   : > { %6109 = vmatmul.mubr.bf16.gmra.mrb[96].mxu0 %v6678_v38  ;;  %v6685_v38 = vld [vmem:[%s8138_s1 + $0x198] sm:$0xff]   ;;  %v1512_v60 = vsel %vm7044_vm3, %v1507_v48, %v1511_v49 }
  0xe8   : > { %6128 = vmatprep.mubr.msk.bf16.mxu0 %vm6835_vm0, %v6834_v1  ;;  %v5249_v5 = vcombine.low %v1498_v59, %v1512_v60 }
  0xef   : > { %6129 = vmatmul.mubr.bf16.vlgmr.msra.gmra.mrb[100].mxu0 %v5246_v63  ;;  %v1523_v63 = vshll.u32 %v5227_v57, 16  ;;  %v6707_v57 = vld [vmem:[%s6918_s14 + $0x38] ss:$8 sps:$4 sm:$0xff]  }
  0xf0   : > { %6149 = vmatpush3.bf16.msra.mxu0 %v6680_v3  ;;  %6132 = vmatprep.mubr.msk.bf16.mxu0 %vm6835_vm0, %v6834_v1 }
  0xf1   : > { %6150 = vmatprep.subr.bf16.mxu0 %v6834_v1  ;;  %v1525_v10 = vrot.slane %v1523_v63, 5  ;;  %v5338_v63 = vld [vmem:[%s6918_s14 + $0xc] sm:$0x1] }
  0xf2   : > { %v2123_v11 = vshll.u32 %v5338_v63, 16 }
  0xf3   : > { %v1526_v14 = vsel %vm7044_vm3, %v1521_v9, %v1525_v10  ;;  %v2159_v9 = vshll.u32 %v5343_v54, 16 }
  0xf4   : > { %6151 = vmatpush3.bf16.msra.mxu0 %v6681_v17  ;;  %v5250_v19 = vcombine.low %v1526_v14, %v1540_v15 }
  0xf5   : > { %6152 = vmatprep.subr.bf16.mxu0 %v6834_v1 }
  0xf7   : > { %6133 = vmatmul.mubr.bf16.gmra.mrb[104].mxu0 %v5247_v18 }
  0xf8   : > { %6153 = vmatpush3.bf16.msra.mxu0 %v6682_v27  ;;  %6136 = vmatprep.mubr.msk.bf16.mxu0 %vm6835_vm0, %v6834_v1 }
  0xf9   : > { %6154 = vmatprep.subr.bf16.mxu0 %v6834_v1 }
  0xfa   : > { %v7310_v43 = vpop.f32.mrb[0].mxu0 }
  0xfb   : > { %v5950_v45 = vpop.f32.mrb[1].mxu0 }
  0xfc   : > { %v7312_v50 = vpop.f32.mrb[2].mxu0  ;;  %6155 = vmatpush3.bf16.msra.mxu0 %v6685_v38 }
  0xfd   : > { %v5951_v56 = vpop.f32.mrb[3].mxu0  ;;  %6156 = vmatprep.subr.bf16.mxu0 %v6834_v1 }
  0xff   : > { %6137 = vmatmul.mubr.bf16.gmra.mrb[108].mxu0 %v5248_v44  ;;  %v5339_v44 = vld [vmem:[%s6918_s14 + $0x10] sm:$0xf] }
 0x100   : > { %6157 = vmatpush3.bf16.msra.mxu0 %v6687_v51  ;;  %6140 = vmatprep.mubr.msk.bf16.mxu0 %vm6835_vm0, %v6834_v1  ;;  %v2128_v48 = vshrl.u32 %v5339_v44, 16  ;;  %v2131_v49 = vshll.u32 %v5339_v44, 16  ;;  %v6709_v51 = vld [vmem:[%s8138_s1 + $0x228] sm:$0xff]  }
 0x101   : > { %6158 = vmatprep.subr.bf16.mxu0 %v6834_v1 }
 0x102   : > { %v7330_v3 = vpop.f32.mrb[4].mxu0  ;;  %v2130_v59 = vrot.slane %v2128_v48, 4  ;;  %v2133_v60 = vrot.slane %v2131_v49, 5 }
 0x103   : > { %v5954_v4 = vpop.f32.mrb[5].mxu0 }
 0x104   : > { %v7332_v6 = vpop.f32.mrb[6].mxu0  ;;  %6159 = vmatpush3.bf16.msra.mxu0 %v6689_v61  ;;  %v2134_v12 = vor.u32 %v2133_v60, %v2130_v59 }
 0x105   : > { %v5955_v13 = vpop.f32.mrb[7].mxu0  ;;  %6160 = vmatprep.subr.bf16.mxu0 %v6834_v1 }
 0x107   : > { %6141 = vmatmul.mubr.bf16.gmra.mrb[112].mxu0 %v5249_v5 }
 0x108   : > { %6144 = vmatprep.mubr.msk.bf16.mxu0 %vm6835_vm0, %v6834_v1  ;;  %6161 = vmatpush3.bf16.msra.mxu0 %v6691_v7  ;;  %v2156_v7 = vshrl.u32 %v5343_v54, 16 }
 0x109   : > { %6162 = vmatprep.subr.bf16.mxu0 %v6834_v1 }
 0x10a   : > { %v7348_v17 = vpop.f32.mrb[8].mxu0 }
 0x10b   : > { %v5958_v18 = vpop.f32.mrb[9].mxu0 }
 0x10c   : > { %v7350_v20 = vpop.f32.mrb[10].mxu0  ;;  %6163 = vmatpush3.bf16.msra.mxu0 %v6694_v16  ;;  %v5342_v16 = vld [vmem:[%s6918_s14 + $0x1c] sm:$0x1]  ;;  %v5344_v18 = vld [vmem:[%s6918_s14 + $0x24] sm:$0x1] }
 0x10d   : > { %v5959_v21 = vpop.f32.mrb[11].mxu0  ;;  %6220 = vmatprep.subr.bf16.mxu0 %v6834_v1 }
 0x10e   : > { %v2161_v21 = vrot.slane %v2159_v9, 5 }
 0x10f   : > { %6145 = vmatmul.mubr.bf16.gmra.mrb[116].mxu0 %v5250_v19  ;;  %v2158_v19 = vrot.slane %v2156_v7, 4 }
 0x110   : > { %6164 = vmatprep.mubr.msk.bf16.mxu0 %vm6835_vm0, %v6834_v1 }
 0x111   : > { %v2162_v44 = vor.u32 %v2161_v21, %v2158_v19 }
 0x112   : > { %v7355_v22 = vpop.f32.mrb[12].mxu0 }
 0x113   : > { %v5962_v23 = vpop.f32.mrb[13].mxu0 }
 0x114   : > { %v7358_v25 = vpop.f32.mrb[14].mxu0 }
 0x115   : > { %v5963_v27 = vpop.f32.mrb[15].mxu0 }
 0x117   : > { %6165 = vmatmul.mubr.bf16.vlgmr.msra.gmra.mrb[120].mxu0 %v6696_v24  ;;  %v6711_v24 = vld [vmem:[%s6918_s14 + $0x48] ss:$8 sps:$4 sm:$0xff]  }
 0x118   : > { %6221 = vmatpush3.bf16.msra.mxu0 %v6697_v26  ;;  %6168 = vmatprep.mubr.msk.bf16.mxu0 %vm6835_vm0, %v6834_v1  ;;  %v5345_v26 = vld [vmem:[%s6918_s14 + $0x28] sm:$0xf] }
 0x119   : > { %6222 = vmatprep.subr.bf16.mxu0 %v6834_v1 }
 0x11a   : > { %v7369_v29 = vpop.f32.mrb[16].mxu0 }
 0x11b   : > { %v5966_v30 = vpop.f32.mrb[17].mxu0 }
 0x11c   : > { %v7372_v32 = vpop.f32.mrb[18].mxu0  ;;  %6223 = vmatpush3.bf16.msra.mxu0 %v6699_v28 }
 0x11d   : > { %v5967_v34 = vpop.f32.mrb[19].mxu0  ;;  %6224 = vmatprep.subr.bf16.mxu0 %v6834_v1 }
 0x11e   : > { %v5347_v34 = vld [vmem:[%s6918_s14 + $0x30] sm:$0xf] }
 0x11f   : > { %6169 = vmatmul.mubr.bf16.gmra.mrb[124].mxu0 %v6700_v31  ;;  %v2125_v31 = vrot.slane %v2123_v11, 5  ;;  %v2187_v47 = vshll.u32 %v5347_v34, 16 }
 0x120   : > { %6225 = vmatpush3.bf16.msra.mxu0 %v6702_v33  ;;  %6172 = vmatprep.mubr.msk.bf16.mxu0 %vm6835_vm0, %v6834_v1  ;;  %v2135_v33 = vrot.slane %v2134_v12, 4 }
 0x121   : > { %6226 = vmatprep.subr.bf16.mxu0 %v6834_v1  ;;  %v2189_v63 = vrot.slane %v2187_v47, 5 }
 0x122   : > { %v627_v36 = vpop.f32.mrb[20].mxu0 }
 0x123   : > { %v7385_v37 = vadd.f32 %v627_v36, %v7310_v43  ;;  %v5986_v38 = vpop.f32.mrb[21].mxu0  ;;  %v2114_v43 = vshrl.u32 %v5337_v40, 16  ;;  %v2165_v40 = vshll.u32 %v5344_v18, 16 }
 0x124   : > { %v630_v41 = vpop.f32.mrb[22].mxu0  ;;  %6227 = vmatpush3.bf16.msra.mxu0 %v6704_v35 }
 0x125   : > { %v7394_v45 = vadd.f32 %v630_v41, %v7312_v50  ;;  %v5987_v46 = vpop.f32.mrb[23].mxu0  ;;  %6228 = vmatprep.subr.bf16.mxu0 %v6834_v1  ;;  %v5341_v50 = vld [vmem:[%s6918_s14 + $0x18] sm:$0xf]  ;;  %v2116_v53 = vrot.slane %v2114_v43, 4  ;;  %v2184_v43 = vshrl.u32 %v5347_v34, 16 }
 0x126   : > { %v2142_v0 = vshrl.u32 %v5341_v50, 16  ;;  %v2145_v2 = vshll.u32 %v5341_v50, 16  ;;  %v2170_v46 = vshrl.u32 %v5345_v26, 16  ;;  %v2163_v50 = vrot.slane %v2162_v44, 4  ;;  %v5355_v44 = vld [vmem:[%s6918_s14 + $0x50] sm:$0xf] }
 0x127   : > { %6173 = vmatmul.mubr.bf16.gmra.mrb[128].mxu0 %v6703_v39  ;;  %v2120_v10 = vor.u32 %v2119_v58, %v2116_v53  ;;  %v2151_v39 = vshll.u32 %v5342_v16, 16  ;;  %v2186_v58 = vrot.slane %v2184_v43, 4 }
 0x128   : > { %6229 = vmatpush3.bf16.msra.mxu0 %v6706_v42  ;;  %6176 = vmatprep.mubr.msk.bf16.mxu0 %vm6835_vm0, %v6834_v1  ;;  %v2144_v14 = vrot.slane %v2142_v0, 4  ;;  %v2147_v15 = vrot.slane %v2145_v2, 5  ;;  %v2172_v53 = vrot.slane %v2170_v46, 4  ;;  %v5349_v0 = vld [vmem:[%s6918_s14 + $0x38] sm:$0xf] }
 0x129   : > { %6230 = vmatprep.subr.bf16.mxu0 %v6834_v1  ;;  %v2121_v30 = vrot.slane %v2120_v10, 4 }
 0x12a   : > { %v635_v52 = vpop.f32.mrb[24].mxu0  ;;  %v2148_v38 = vor.u32 %v2147_v15, %v2144_v14  ;;  %v2190_v14 = vor.u32 %v2189_v63, %v2186_v58 }
 0x12b   : > { %v7406_v55 = vadd.f32 %v635_v52, %v7330_v3  ;;  %v5990_v56 = vpop.f32.mrb[25].mxu0  ;;  %v5340_v3 = vld [vmem:[%s6918_s14 + $0x14] sm:$0x1]  ;;  %v2126_v48 = vsel %vm7044_vm3, %v2121_v30, %v2125_v31  ;;  %v2167_v52 = vrot.slane %v2165_v40, 5 }
 0x12c   : > { %v638_v61 = vpop.f32.mrb[26].mxu0  ;;  %6231 = vmatpush3.bf16.msra.mxu0 %v6709_v51  ;;  %v2137_v13 = vshll.u32 %v5340_v3, 16  ;;  %v2149_v49 = vrot.slane %v2148_v38, 4  ;;  %v2153_v51 = vrot.slane %v2151_v39, 5  ;;  %v2191_v31 = vrot.slane %v2190_v14, 4 }
 0x12d   : > { %v7414_v4 = vadd.f32 %v638_v61, %v7332_v6  ;;  %v5991_v5 = vpop.f32.mrb[27].mxu0  ;;  %6232 = vmatprep.subr.bf16.mxu0 %v6834_v1  ;;  %v6713_v6 = vld [vmem:[%s8138_s1 + $0x238] sm:$0xff]   ;;  %v2168_v10 = vsel %vm7044_vm3, %v2163_v50, %v2167_v52  ;;  %v5352_v38 = vld [vmem:[%s6918_s14 + $0x44] sm:$0x1] }
 0x12e   : > { %v2139_v36 = vrot.slane %v2137_v13, 5  ;;  %v5351_v5 = vld [vmem:[%s6918_s14 + $0x40] sm:$0xf]  ;;  %v2154_v9 = vsel %vm7044_vm3, %v2149_v49, %v2153_v51  ;;  %v2201_v13 = vshll.u32 %v5349_v0, 16  ;;  %v2240_v49 = vshrl.u32 %v5355_v44, 16 }
 0x12f   : > { %6177 = vmatmul.mubr.bf16.gmra.mrb[132].mxu0 %v6707_v57  ;;  %v5346_v57 = vld [vmem:[%s6918_s14 + $0x2c] sm:$0x1]  ;;  %v2212_v15 = vshrl.u32 %v5351_v5, 16  ;;  %v2215_v16 = vshll.u32 %v5351_v5, 16  ;;  %v2243_v51 = vshll.u32 %v5355_v44, 16 }
 0x130   : > { %6180 = vmatprep.mubr.msk.bf16.mxu0 %vm6835_vm0, %v6834_v1  ;;  %6233 = vmatpush3.bf16.msra.mxu0 %v6710_v62  ;;  %v5348_v62 = vld [vmem:[%s6918_s14 + $0x34] sm:$0x1] }
 0x131   : > { %6234 = vmatprep.subr.bf16.mxu0 %v6834_v1  ;;  %v2193_v12 = vshll.u32 %v5348_v62, 16  ;;  %v2217_v34 = vrot.slane %v2215_v16, 5 }
 0x132   : > { %v643_v23 = vpop.f32.mrb[28].mxu0 }
 0x133   : > { %v7429_v27 = vadd.f32 %v643_v23, %v7348_v17  ;;  %v5994_v28 = vpop.f32.mrb[29].mxu0  ;;  %v2173_v17 = vshll.u32 %v5345_v26, 16  ;;  %v2195_v23 = vrot.slane %v2193_v12, 5  ;;  %v2203_v26 = vrot.slane %v2201_v13, 5 }
 0x134   : > { %v646_v35 = vpop.f32.mrb[30].mxu0  ;;  %6235 = vmatpush3.bf16.msra.mxu0 %v6713_v6  ;;  %v2198_v6 = vshrl.u32 %v5349_v0, 16  ;;  %v2242_v0 = vrot.slane %v2240_v49, 4 }
 0x135   : > { %v7433_v41 = vadd.f32 %v646_v35, %v7350_v20  ;;  %v5995_v42 = vpop.f32.mrb[31].mxu0  ;;  %v2140_v20 = vsel %vm7044_vm3, %v2135_v33, %v2139_v36  ;;  %v2175_v54 = vrot.slane %v2173_v17, 5  ;;  %v2214_v33 = vrot.slane %v2212_v15, 4  ;;  %v5350_v36 = vld [vmem:[%s6918_s14 + $0x3c] sm:$0x1] }
 0x136   : > { %v5373_v61 = vcombine.low %v2126_v48, %v2140_v20  ;;  %v5353_v42 = vld [vmem:[%s6918_s14 + $0x48] sm:$0xf]  ;;  %v2207_v43 = vshll.u32 %v5350_v36, 16  ;;  %v2221_v48 = vshll.u32 %v5352_v38, 16 }
 0x137   : > { %6181 = vmatmul.mubr.bf16.gmra.mrb[136].mxu0 %v6711_v24  ;;  %v2176_v11 = vor.u32 %v2175_v54, %v2172_v53  ;;  %v2200_v24 = vrot.slane %v2198_v6, 4  ;;  %v2218_v47 = vor.u32 %v2217_v34, %v2214_v33  ;;  %v2226_v20 = vshrl.u32 %v5353_v42, 16 }
 0x138   : > { %6236 = vmatprep.mubr.msk.bf16.mxu0 %vm6835_vm0, %v6834_v1 }
 0x139   : > { %v2177_v18 = vrot.slane %v2176_v11, 4  ;;  %v2204_v17 = vor.u32 %v2203_v26, %v2200_v24  ;;  %v2219_v58 = vrot.slane %v2218_v47, 4  ;;  %v2228_v62 = vrot.slane %v2226_v20, 4 }
 0x13a   : > { %v651_v56 = vpop.f32.mrb[32].mxu0 }
 0x13b   : > { %v7443_v59 = vadd.f32 %v651_v56, %v7355_v22  ;;  %v5998_v60 = vpop.f32.mrb[33].mxu0  ;;  %v2179_v22 = vshll.u32 %v5346_v57, 16  ;;  %v2205_v53 = vrot.slane %v2204_v17, 4  ;;  %v2209_v57 = vrot.slane %v2207_v43, 5 }
 0x13c   : > { %v654_v2 = vpop.f32.mrb[34].mxu0  ;;  %v2223_v60 = vrot.slane %v2221_v48, 5 }
 0x13d   : > { %v7449_v3 = vadd.f32 %v654_v2, %v7358_v25  ;;  %v5999_v7 = vpop.f32.mrb[35].mxu0  ;;  %v5374_v25 = vcombine.low %v2154_v9, %v2168_v10  ;;  %v2181_v21 = vrot.slane %v2179_v22, 5  ;;  %v2245_v2 = vrot.slane %v2243_v51, 5  ;;  %v5354_v9 = vld [vmem:[%s6918_s14 + $0x4c] sm:$0x1] }
 0x13e   : > { %v5356_v10 = vld [vmem:[%s6918_s14 + $0x54] sm:$0x1]  ;;  %v2210_v11 = vsel %vm7044_vm3, %v2205_v53, %v2209_v57  ;;  %v2235_v12 = vshll.u32 %v5354_v9, 16 }
 0x13f   : > { %6237 = vmatmul.mubr.bf16.vlgmr.msra.gmra.mrb[140].mxu0 %v5373_v61  ;;  %v2182_v46 = vsel %vm7044_vm3, %v2177_v18, %v2181_v21  ;;  %v2246_v6 = vor.u32 %v2245_v2, %v2242_v0  ;;  %v2249_v13 = vshll.u32 %v5356_v10, 16 }
 0x140   : > { %6240 = vmatprep.mubr.msk.bf16.mxu0 %vm6835_vm0, %v6834_v1 }
 0x141   : > { %v2247_v21 = vrot.slane %v2246_v6, 4 }
 0x142   : > { %v659_v19 = vpop.f32.mrb[36].mxu0 }
 0x143   : > { %v7458_v28 = vadd.f32 %v659_v19, %v7369_v29  ;;  %v6002_v30 = vpop.f32.mrb[37].mxu0  ;;  %v2196_v29 = vsel %vm7044_vm3, %v2191_v31, %v2195_v23  ;;  %v2237_v19 = vrot.slane %v2235_v12, 5  ;;  %v2251_v23 = vrot.slane %v2249_v13, 5 }
 0x144   : > { %v662_v35 = vpop.f32.mrb[38].mxu0  ;;  %v5375_v52 = vcombine.low %v2182_v46, %v2196_v29 }
 0x145   : > { %v7463_v39 = vadd.f32 %v662_v35, %v7372_v32  ;;  %v6003_v40 = vpop.f32.mrb[39].mxu0  ;;  %v2229_v32 = vshll.u32 %v5353_v42, 16 }
 0x147   : > { %6241 = vmatmul.mubr.bf16.gmra.mrb[144].mxu0 %v5374_v25  ;;  %v2231_v63 = vrot.slane %v2229_v32, 5  ;;  %v7496_v48 = vpop.f32.mrb[0].mxu1 }
 0x148   : > { %6244 = vmatprep.mubr.msk.bf16.mxu0 %vm6835_vm0, %v6834_v1  ;;  %v6202_v32 = vpop.f32.mrb[1].mxu1 }
 0x149   : > { %v2232_v22 = vor.u32 %v2231_v63, %v2228_v62  ;;  %v7499_v49 = vpop.f32.mrb[2].mxu1 }
 0x14a   : > { %v948_v50 = vpop.f32.mrb[40].mxu0  ;;  %v6203_v51 = vpop.f32.mrb[3].mxu1 }
 0x14b   : > { %v987_v54 = vadd.f32 %v948_v50, %v7385_v37  ;;  %v6022_v56 = vpop.f32.mrb[41].mxu0  ;;  %v2224_v37 = vsel %vm7044_vm3, %v2219_v58, %v2223_v60  ;;  %v2233_v18 = vrot.slane %v2232_v22, 4 }
 0x14c   : > { %v951_v61 = vpop.f32.mrb[42].mxu0  ;;  %v5376_v16 = vcombine.low %v2210_v11, %v2224_v37 }
 0x14d   : > { %v988_v5 = vadd.f32 %v951_v61, %v7394_v45  ;;  %v6023_v7 = vpop.f32.mrb[43].mxu0  ;;  %v2238_v30 = vsel %vm7044_vm3, %v2233_v18, %v2237_v19 }
 0x14f   : > { %6245 = vmatmul.mubr.bf16.gmra.mrb[148].mxu0 %v5375_v52 }
 0x150   : > { %6248 = vmatprep.mubr.msk.bf16.mxu0 %vm6835_vm0, %v6834_v1 }
 0x152   : > { %v956_v14 = vpop.f32.mrb[44].mxu0 }
 0x153   : > { %v989_v45 = vadd.f32 %v956_v14, %v7406_v55  ;;  %v6026_v15 = vpop.f32.mrb[45].mxu0  ;;  %v2252_v55 = vsel %vm7044_vm3, %v2247_v21, %v2251_v23 }
 0x154   : > { %v959_v25 = vpop.f32.mrb[46].mxu0  ;;  %v5377_v35 = vcombine.low %v2238_v30, %v2252_v55  ;;  %v6715_v30 = vld [vmem:[%s8140_s3 + $0x40] sm:$0xff]  }
 0x155   : > { %v990_v24 = vadd.f32 %v959_v25, %v7414_v4  ;;  %v6027_v26 = vpop.f32.mrb[47].mxu0  ;;  %6256 = vmatprep.subr.bf16.mxu0 %v6715_v30 }
 0x156   : > { %6257 = vmatpush3.bf16.msra.mxu0 %v6715_v30  ;;  %v2510_v30 = vld [vmem:[#allocation2 + $0x24] sm:$0x8] }
 0x157   : > { %6249 = vmatmul.mubr.bf16.gmra.mrb[152].mxu0 %v5376_v16 }
 0x158   : > { %6252 = vmatprep.mubr.msk.bf16.mxu0 %vm6835_vm0, %v6834_v1 }
 0x15a   : > { %v964_v31 = vpop.f32.mrb[48].mxu0 }
 0x15b   : > { %v991_v33 = vadd.f32 %v964_v31, %v7429_v27  ;;  %v6030_v34 = vpop.f32.mrb[49].mxu0  ;;  %v6714_v31 = vld [vmem:[%s8140_s3] sm:$0xff]  }
 0x15c   : > { %v967_v36 = vpop.f32.mrb[50].mxu0  ;;  %6280 = vmatprep.subr.bf16.mxu1 %v6714_v31  ;;  %v6716_v34 = vld [vmem:[%s8140_s3 + $0x48] sm:$0xff]  }
 0x15d   : > { %v992_v38 = vadd.f32 %v967_v36, %v7433_v41  ;;  %v6031_v4 = vpop.f32.mrb[51].mxu0  ;;  %6281 = vmatpush3.bf16.msra.mxu1 %v6714_v31  ;;  %6258 = vmatprep.subr.bf16.mxu0 %v6716_v34  ;;  %v2511_v31 = vsel %vm7555_vm6, 0, %v2510_v30 }
 0x15e   : > { %6259 = vmatpush3.bf16.msra.mxu0 %v6716_v34  ;;  %2512 = vst [vmem:[#allocation2 + $0x24] sm:$0x8] %v2511_v31  ;;  %v6728_v34 = vld [vmem:[%s8140_s3 + $0x78] sm:$0xff]  }
 0x15f   : > { %6253 = vmatmul.mubr.bf16.gmra.mrb[156].mxu0 %v5377_v35 }
 0x162   : > { %v972_v40 = vpop.f32.mrb[52].mxu0 }
 0x163   : > { %v993_v42 = vadd.f32 %v972_v40, %v7443_v59  ;;  %v6034_v1 = vpop.f32.mrb[53].mxu0 }
 0x164   : > { %v975_v44 = vpop.f32.mrb[54].mxu0  ;;  %v6718_v1 = vld [vmem:[%s8140_s3 + $0x50] sm:$0xff]  }
 0x165   : > { %v994_v46 = vadd.f32 %v975_v44, %v7449_v3  ;;  %v6035_v17 = vpop.f32.mrb[55].mxu0  ;;  %v7501_v3 = vpop.f32.mrb[4].mxu1  ;;  %v6717_v44 = vld [vmem:[%s8140_s3 + $0x8] sm:$0xff]   ;;  %6260 = vmatprep.subr.bf16.mxu0 %v6718_v1 }
 0x166   : > { %v6206_v57 = vpop.f32.mrb[5].mxu1  ;;  %6261 = vmatpush3.bf16.msra.mxu0 %v6718_v1  ;;  %6282 = vmatprep.subr.bf16.mxu1 %v6717_v44 }
 0x167   : > { %v7505_v58 = vpop.f32.mrb[6].mxu1  ;;  %6283 = vmatpush3.bf16.msra.mxu1 %v6717_v44  ;;  %v6719_v57 = vld [vmem:[%s8140_s3 + $0x10] sm:$0xff]  }
 0x168   : > { %v6207_v60 = vpop.f32.mrb[7].mxu1  ;;  %6284 = vmatprep.subr.bf16.mxu1 %v6719_v57  ;;  %v6729_v44 = vld [vmem:[%s8140_s3 + $0x30] sm:$0xff]  }
 0x169   : > { %v7509_v0 = vpop.f32.mrb[8].mxu1 }
 0x16a   : > { %v980_v29 = vpop.f32.mrb[56].mxu0  ;;  %v6210_v7 = vpop.f32.mrb[9].mxu1 }
 0x16b   : > { %v995_v43 = vadd.f32 %v980_v29, %v7458_v28  ;;  %v6038_v47 = vpop.f32.mrb[57].mxu0  ;;  %v7513_v9 = vpop.f32.mrb[10].mxu1  ;;  %v2537_v7 = vld [vmem:[#allocation2 + $0x14] sm:$0x1]  ;;  %6285 = vmatpush3.bf16.msra.mxu1 %v6719_v57  ;;  %v2519_v57 = vld [vmem:[#allocation2 + $0x48] sm:$0x8] }
 0x16c   : > { %v983_v27 = vpop.f32.mrb[58].mxu0  ;;  %v2501_v47 = vld [vmem:[#allocation2] sm:$0x8] }
 0x16d   : > { %v996_v20 = vadd.f32 %v983_v27, %v7463_v39  ;;  %v6039_v41 = vpop.f32.mrb[59].mxu0 }
 0x16e   : > { %v2528_v41 = vld [vmem:[#allocation2 + $0x6c] sm:$0x8] }
 0x172   : > { %v1140_v59 = vpop.f32.mrb[60].mxu0 }
 0x173   : > { %v1179_v50 = vadd.f32 %v1140_v59, %v987_v54  ;;  %v6058_v52 = vpop.f32.mrb[61].mxu0  ;;  %v2502_v59 = vsel %vm7555_vm6, 0, %v2501_v47 }
 0x174   : > { %v1143_v53 = vpop.f32.mrb[62].mxu0  ;;  %2503 = vst [vmem:[#allocation2] sm:$0x8] %v2502_v59 }
 0x175   : > { %v7503_v56 = vadd.f32 %v1143_v53, %v988_v5  ;;  %v6059_v28 = vpop.f32.mrb[63].mxu0  ;;  %v6211_v5 = vpop.f32.mrb[11].mxu1  ;;  %v2534_v53 = vld [vmem:[#allocation2 + $0x8] sm:$0x1] }
 0x176   : > { %v7517_v12 = vpop.f32.mrb[12].mxu1  ;;  %v2535_v28 = vsel %vm7567_vm9, 0, %v2534_v53  ;;  %v6724_v5 = vld [vmem:[%s8140_s3 + $0x68] sm:$0xff]  }
 0x177   : > { %v6214_v14 = vpop.f32.mrb[13].mxu1  ;;  %2536 = vst [vmem:[#allocation2 + $0x8] sm:$0x1] %v2535_v28 }
 0x17a   : > { %v1148_v61 = vpop.f32.mrb[64].mxu0 }
 0x17b   : > { %v7507_v39 = vadd.f32 %v1148_v61, %v989_v45  ;;  %v6062_v62 = vpop.f32.mrb[65].mxu0  ;;  %v7521_v45 = vpop.f32.mrb[14].mxu1  ;;  %v6836_v61 = vmov 0  }
 0x17c   : > { %v1151_v63 = vpop.f32.mrb[66].mxu0  ;;  %v6215_v15 = vpop.f32.mrb[15].mxu1  ;;  %2568 = vst [vmem:[#allocation2] sm:$0xf] %v6836_v61  ;;  %v6721_v62 = vld [vmem:[%s8140_s3 + $0x18] sm:$0xff]  }
 0x17d   : > { %v7511_v2 = vadd.f32 %v1151_v63, %v990_v24  ;;  %v6063_v54 = vpop.f32.mrb[67].mxu0  ;;  %v7525_v21 = vpop.f32.mrb[16].mxu1  ;;  %v6722_v63 = vld [vmem:[%s8140_s3 + $0x60] sm:$0xff]   ;;  %2570 = vst [vmem:[#allocation2 + $0x8] sm:$0xf] %v6836_v61  ;;  %6286 = vmatprep.subr.bf16.mxu1 %v6721_v62 }
 0x17e   : > { %v6218_v26 = vpop.f32.mrb[17].mxu1  ;;  %v2504_v54 = vld [vmem:[#allocation2 + $0xc] sm:$0x8]  ;;  %v6723_v15 = vld [vmem:[%s8140_s3 + $0x20] sm:$0xff]   ;;  %6287 = vmatpush3.bf16.msra.mxu1 %v6721_v62 }
 0x17f   : > { %v7532_v55 = vpop.f32.mrb[18].mxu1  ;;  %v6725_v26 = vld [vmem:[%s8140_s3 + $0x70] sm:$0xff]   ;;  %6288 = vmatprep.subr.bf16.mxu1 %v6723_v15 }
 0x182   : > { %v1156_v10 = vpop.f32.mrb[68].mxu0  ;;  %6289 = vmatpush3.bf16.msra.mxu1 %v6723_v15 }
 0x183   : > { %v7515_v11 = vadd.f32 %v1156_v10, %v991_v33  ;;  %v6066_v37 = vpop.f32.mrb[69].mxu0  ;;  %v6219_v33 = vpop.f32.mrb[19].mxu1  ;;  %v2505_v10 = vsel %vm7555_vm6, 0, %v2504_v54  ;;  %v2522_v54 = vld [vmem:[#allocation2 + $0x54] sm:$0x8] }
 0x184   : > { %v1159_v22 = vpop.f32.mrb[70].mxu0  ;;  %v2538_v37 = vsel %vm7567_vm9, 0, %v2537_v7  ;;  %2506 = vst [vmem:[#allocation2 + $0xc] sm:$0x8] %v2505_v10  ;;  %v2546_v7 = vld [vmem:[#allocation2 + $0x38] sm:$0x1] }
 0x185   : > { %v7519_v6 = vadd.f32 %v1159_v22, %v992_v38  ;;  %v6067_v13 = vpop.f32.mrb[71].mxu0  ;;  %2539 = vst [vmem:[#allocation2 + $0x14] sm:$0x1] %v2538_v37  ;;  %v2549_v10 = vld [vmem:[#allocation2 + $0x44] sm:$0x1] }
 0x18a   : > { %v1164_v16 = vpop.f32.mrb[72].mxu0 }
 0x18b   : > { %v7523_v25 = vadd.f32 %v1164_v16, %v993_v42  ;;  %v6070_v18 = vpop.f32.mrb[73].mxu0 }
 0x18c   : > { %v1167_v19 = vpop.f32.mrb[74].mxu0  ;;  %v2507_v18 = vld [vmem:[#allocation2 + $0x18] sm:$0x8] }
 0x18d   : > { %v7527_v23 = vadd.f32 %v1167_v19, %v994_v46  ;;  %v6071_v24 = vpop.f32.mrb[75].mxu0  ;;  %v6720_v46 = vld [vmem:[%s8140_s3 + $0x58] sm:$0xff]  }
 0x18e   : > { %6262 = vmatprep.subr.bf16.mxu0 %v6720_v46 }
 0x18f   : > { %6263 = vmatpush3.bf16.msra.mxu0 %v6720_v46  ;;  %v2513_v46 = vld [vmem:[#allocation2 + $0x30] sm:$0x8] }
 0x190   : > { %6264 = vmatprep.subr.bf16.mxu0 %v6722_v63  ;;  %v2514_v47 = vsel %vm7555_vm6, 0, %v2513_v46 }
 0x191   : > { %2515 = vst [vmem:[#allocation2 + $0x30] sm:$0x8] %v2514_v47 }
 0x192   : > { %v1172_v35 = vpop.f32.mrb[76].mxu0 }
 0x193   : > { %v7540_v36 = vadd.f32 %v1172_v35, %v995_v43  ;;  %v6074_v38 = vpop.f32.mrb[77].mxu0  ;;  %6265 = vmatpush3.bf16.msra.mxu0 %v6722_v63  ;;  %v2520_v63 = vsel %vm7555_vm6, 0, %v2519_v57 }
 0x194   : > { %v1175_v4 = vpop.f32.mrb[78].mxu0  ;;  %6266 = vmatprep.subr.bf16.mxu0 %v6724_v5  ;;  %2521 = vst [vmem:[#allocation2 + $0x48] sm:$0x8] %v2520_v63 }
 0x195   : > { %v7542_v40 = vadd.f32 %v1175_v4, %v996_v20  ;;  %v6075_v42 = vpop.f32.mrb[79].mxu0  ;;  %v2540_v4 = vld [vmem:[#allocation2 + $0x20] sm:$0x1] }
 0x196   : > { %v2543_v42 = vld [vmem:[#allocation2 + $0x2c] sm:$0x1] }
 0x197   : > { %6267 = vmatpush3.bf16.msra.mxu0 %v6724_v5  ;;  %v2547_v5 = vsel %vm7567_vm9, 0, %v2546_v7  ;;  %v2558_v7 = vld [vmem:[#allocation2 + $0x68] sm:$0x1] }
 0x198   : > { %6268 = vmatprep.subr.bf16.mxu0 %v6725_v26  ;;  %2548 = vst [vmem:[#allocation2 + $0x38] sm:$0x1] %v2547_v5 }
 0x19a   : > { %v1332_v17 = vpop.f32.mrb[80].mxu0 }
 0x19b   : > { %v7553_v29 = vadd.f32 %v1332_v17, %v1179_v50  ;;  %v6094_v43 = vpop.f32.mrb[81].mxu0  ;;  %v2529_v50 = vsel %vm7555_vm6, 0, %v2528_v41  ;;  %6269 = vmatpush3.bf16.msra.mxu0 %v6725_v26  ;;  %v2544_v41 = vsel %vm7567_vm9, 0, %v2543_v42 }
 0x19c   : > { %v1335_v27 = vpop.f32.mrb[82].mxu0  ;;  %2530 = vst [vmem:[#allocation2 + $0x6c] sm:$0x8] %v2529_v50  ;;  %6270 = vmatprep.subr.bf16.mxu0 %v6728_v34  ;;  %2545 = vst [vmem:[#allocation2 + $0x2c] sm:$0x1] %v2544_v41 }
 0x19d   : > { %v7560_v32 = vadd.f32 %v1335_v27, %v7503_v56  ;;  %v6095_v51 = vpop.f32.mrb[83].mxu0  ;;  %v2561_v56 = vld [vmem:[#allocation2 + $0x74] sm:$0x1]  ;;  %5397 = vst [vmem:[#allocation2 + $0x6c] sm:$0xf] %v6836_v61 }
 0x19e   : > { %v2562_v60 = vsel %vm7567_vm9, 0, %v2561_v56  ;;  %v2516_v27 = vld [vmem:[#allocation2 + $0x3c] sm:$0x8]  ;;  %v7641_v56 = vld [vmem:[%s8140_s3 + $0x80] sm:$0xff]  }
 0x19f   : > { %2563 = vst [vmem:[#allocation2 + $0x74] sm:$0x1] %v2562_v60  ;;  %6271 = vmatpush3.bf16.msra.mxu0 %v6728_v34  ;;  %v6731_v51 = vld [vmem:[%s8140_s3 + $0x38] sm:$0xff]  }
 0x1a0   : > { %5399 = vst [vmem:[#allocation2 + $0x74] sm:$0xf] %v6836_v61 }
 0x1a2   : > { %v1340_v22 = vpop.f32.mrb[84].mxu0 }
 0x1a3   : > { %v7596_v13 = vadd.f32 %v1340_v22, %v7507_v39  ;;  %v6098_v14 = vpop.f32.mrb[85].mxu0  ;;  %v2508_v39 = vsel %vm7555_vm6, 0, %v2507_v18 }
 0x1a4   : > { %v1343_v16 = vpop.f32.mrb[86].mxu0  ;;  %2509 = vst [vmem:[#allocation2 + $0x18] sm:$0x8] %v2508_v39  ;;  %v2555_v39 = vld [vmem:[#allocation2 + $0x5c] sm:$0x1] }
 0x1a5   : > { %v7602_v19 = vadd.f32 %v1343_v16, %v7511_v2  ;;  %v6099_v24 = vpop.f32.mrb[87].mxu0  ;;  %v6727_v2 = vld [vmem:[%s8140_s3 + $0x28] sm:$0xff]   ;;  %v2556_v30 = vsel %vm7567_vm9, 0, %v2555_v39 }
 0x1a6   : > { %6290 = vmatprep.subr.bf16.mxu1 %v6727_v2  ;;  %v2552_v24 = vld [vmem:[#allocation2 + $0x50] sm:$0x1]  ;;  %2557 = vst [vmem:[#allocation2 + $0x5c] sm:$0x1] %v2556_v30 }
 0x1a7   : > { %6291 = vmatpush3.bf16.msra.mxu1 %v6727_v2  ;;  %v2553_v26 = vsel %vm7567_vm9, 0, %v2552_v24 }
 0x1a8   : > { %6292 = vmatprep.subr.bf16.mxu1 %v6729_v44  ;;  %2554 = vst [vmem:[#allocation2 + $0x50] sm:$0x1] %v2553_v26 }
 0x1aa   : > { %v1348_v33 = vpop.f32.mrb[88].mxu0 }
 0x1ab   : > { %v7618_v35 = vadd.f32 %v1348_v33, %v7515_v11  ;;  %v6102_v38 = vpop.f32.mrb[89].mxu0  ;;  %v2541_v11 = vsel %vm7567_vm9, 0, %v2540_v4  ;;  %6293 = vmatpush3.bf16.msra.mxu1 %v6729_v44 }
 0x1ac   : > { %v1351_v1 = vpop.f32.mrb[90].mxu0  ;;  %2542 = vst [vmem:[#allocation2 + $0x20] sm:$0x1] %v2541_v11  ;;  %6294 = vmatprep.subr.bf16.mxu1 %v6731_v51 }
 0x1ad   : > { %v7624_v17 = vadd.f32 %v1351_v1, %v7519_v6  ;;  %v6103_v43 = vpop.f32.mrb[91].mxu0  ;;  %v2517_v6 = vsel %vm7555_vm6, 0, %v2516_v27 }
 0x1ae   : > { %2518 = vst [vmem:[#allocation2 + $0x3c] sm:$0x8] %v2517_v6  ;;  %v2525_v6 = vld [vmem:[#allocation2 + $0x60] sm:$0x8] }
 0x1af   : > { %6295 = vmatpush3.bf16.msra.mxu1 %v6731_v51 }
 0x1b0   : > { %6304 = vmatprep.subr.bf16.mxu1 %v7641_v56 }
 0x1b2   : > { %v1356_v59 = vpop.f32.mrb[92].mxu0 }
 0x1b3   : > { %v1377_v50 = vadd.f32 %v1356_v59, %v7523_v25  ;;  %v6106_v53 = vpop.f32.mrb[93].mxu0  ;;  %v2523_v25 = vsel %vm7555_vm6, 0, %v2522_v54 }
 0x1b4   : > { %v1359_v28 = vpop.f32.mrb[94].mxu0  ;;  %2524 = vst [vmem:[#allocation2 + $0x54] sm:$0x8] %v2523_v25 }
 0x1b5   : > { %v1378_v60 = vadd.f32 %v1359_v28, %v7527_v23  ;;  %v6107_v62 = vpop.f32.mrb[95].mxu0  ;;  %v2550_v23 = vsel %vm7567_vm9, 0, %v2549_v10 }
 0x1b6   : > { %2551 = vst [vmem:[#allocation2 + $0x44] sm:$0x1] %v2550_v23 }
 0x1ba   : > { %v1364_v37 = vpop.f32.mrb[96].mxu0 }
 0x1bb   : > { %v1379_v22 = vadd.f32 %v1364_v37, %v7540_v36  ;;  %v6110_v14 = vpop.f32.mrb[97].mxu0 }
 0x1bc   : > { %v1367_v15 = vpop.f32.mrb[98].mxu0 }
 0x1bd   : > { %v1380_v16 = vadd.f32 %v1367_v15, %v7542_v40  ;;  %v6111_v18 = vpop.f32.mrb[99].mxu0 }
 0x1c2   : > { %v1660_v31 = vpop.f32.mrb[100].mxu0 }
 0x1c3   : > { %v1699_v2 = vadd.f32 %v1660_v31, %v7553_v29  ;;  %v6130_v36 = vpop.f32.mrb[101].mxu0 }
 0x1c4   : > { %v1663_v33 = vpop.f32.mrb[102].mxu0 }
 0x1c5   : > { %v1700_v34 = vadd.f32 %v1663_v33, %v7560_v32  ;;  %v6131_v38 = vpop.f32.mrb[103].mxu0  ;;  %v2526_v32 = vsel %vm7555_vm6, 0, %v2525_v6 }
 0x1c6   : > { %2527 = vst [vmem:[#allocation2 + $0x60] sm:$0x8] %v2526_v32 }
 0x1ca   : > { %v1668_v40 = vpop.f32.mrb[104].mxu0 }
 0x1cb   : > { %v1701_v4 = vadd.f32 %v1668_v40, %v7596_v13  ;;  %v6134_v42 = vpop.f32.mrb[105].mxu0 }
 0x1cc   : > { %v1671_v1 = vpop.f32.mrb[106].mxu0 }
 0x1cd   : > { %v1702_v44 = vadd.f32 %v1671_v1, %v7602_v19  ;;  %v6135_v46 = vpop.f32.mrb[107].mxu0 }
 0x1d2   : > { %v1676_v43 = vpop.f32.mrb[108].mxu0 }
 0x1d3   : > { %v1703_v47 = vadd.f32 %v1676_v43, %v7618_v35  ;;  %v6138_v11 = vpop.f32.mrb[109].mxu0 }
 0x1d4   : > { %v1679_v27 = vpop.f32.mrb[110].mxu0 }
 0x1d5   : > { %v1704_v29 = vadd.f32 %v1679_v27, %v7624_v17  ;;  %v6139_v41 = vpop.f32.mrb[111].mxu0  ;;  %v2559_v17 = vsel %vm7567_vm9, 0, %v2558_v7 }
 0x1d6   : > { %2560 = vst [vmem:[#allocation2 + $0x68] sm:$0x1] %v2559_v17 }
 0x1da   : > { %v1684_v51 = vpop.f32.mrb[112].mxu0 }
 0x1db   : > { %v1705_v13 = vadd.f32 %v1684_v51, %v1377_v50  ;;  %v6142_v59 = vpop.f32.mrb[113].mxu0 }
 0x1dc   : > { %v1687_v53 = vpop.f32.mrb[114].mxu0 }
 0x1dd   : > { %v1706_v28 = vadd.f32 %v1687_v53, %v1378_v60  ;;  %v6143_v19 = vpop.f32.mrb[115].mxu0 }
 0x1e2   : > { %v1692_v57 = vpop.f32.mrb[116].mxu0 }
 0x1e3   : > { %v1707_v62 = vadd.f32 %v1692_v57, %v1379_v22  ;;  %v6146_v63 = vpop.f32.mrb[117].mxu0 }
 0x1e4   : > { %v1695_v35 = vpop.f32.mrb[118].mxu0 }
 0x1e5   : > { %v1708_v54 = vadd.f32 %v1695_v35, %v1380_v16  ;;  %v6147_v25 = vpop.f32.mrb[119].mxu0 }
 0x1ea   : > { %v1852_v5 = vpop.f32.mrb[120].mxu0 }
 0x1eb   : > { %v1891_v20 = vadd.f32 %v1852_v5, %v1699_v2  ;;  %v6166_v10 = vpop.f32.mrb[121].mxu0 }
 0x1ec   : > { %v1855_v37 = vpop.f32.mrb[122].mxu0  ;;  %v2584_v10 = vld [vmem:[#allocation2 + $0xc] sm:$0x8] }
 0x1ed   : > { %v1892_v50 = vadd.f32 %v1855_v37, %v1700_v34  ;;  %v2083_v23 = vadd.f32 %v7496_v48, %v1891_v20  ;;  %v6167_v60 = vpop.f32.mrb[123].mxu0  ;;  %v2582_v20 = vld [vmem:[#allocation2] sm:$0x8] }
 0x1ee   : > { %v2601_v60 = vshrl.u32 %v2582_v20, 16 }
 0x1ef   : > { %v2084_v14 = vadd.f32 %v7499_v49, %v1892_v50 }
 0x1f2   : > { %v1860_v22 = vpop.f32.mrb[124].mxu0 }
 0x1f3   : > { %v1893_v15 = vadd.f32 %v1860_v22, %v1701_v4  ;;  %v6170_v18 = vpop.f32.mrb[125].mxu0 }
 0x1f4   : > { %v1863_v16 = vpop.f32.mrb[126].mxu0 }
 0x1f5   : > { %v1894_v24 = vadd.f32 %v1863_v16, %v1702_v44  ;;  %v2085_v26 = vadd.f32 %v7501_v3, %v1893_v15  ;;  %v6171_v52 = vpop.f32.mrb[127].mxu0 }
 0x1f7   : > { %v2086_v39 = vadd.f32 %v7505_v58, %v1894_v24 }
 0x1fa   : > { %v1868_v30 = vpop.f32.mrb[128].mxu0 }
 0x1fb   : > { %v1895_v31 = vadd.f32 %v1868_v30, %v1703_v47  ;;  %v6174_v2 = vpop.f32.mrb[129].mxu0 }
 0x1fc   : > { %v1871_v36 = vpop.f32.mrb[130].mxu0 }
 0x1fd   : > { %v1896_v33 = vadd.f32 %v1871_v36, %v1704_v29  ;;  %v2087_v48 = vadd.f32 %v7509_v0, %v1895_v31  ;;  %v6175_v34 = vpop.f32.mrb[131].mxu0 }
 0x1ff   : > { %v2088_v49 = vadd.f32 %v7513_v9, %v1896_v33  ;;  %v2586_v33 = vld [vmem:[#allocation2 + $0x18] sm:$0x8] }
 0x202   : > { %v1876_v38 = vpop.f32.mrb[132].mxu0 }
 0x203   : > { %v1897_v40 = vadd.f32 %v1876_v38, %v1705_v13  ;;  %v6178_v4 = vpop.f32.mrb[133].mxu0 }
 0x204   : > { %v1879_v42 = vpop.f32.mrb[134].mxu0 }
 0x205   : > { %v1898_v1 = vadd.f32 %v1879_v42, %v1706_v28  ;;  %v7676_v3 = vadd.f32 %v7517_v12, %v1897_v40  ;;  %v6179_v44 = vpop.f32.mrb[135].mxu0  ;;  %v7690_v12 = vld [vmem:[%s8139_s2] ss:$0 sm:$0xff]  ;;  %v5400_v40 = vrot.slane %v2601_v60, 11 }
 0x207   : > { %v7679_v58 = vadd.f32 %v7521_v45, %v1898_v1 }
 0x20a   : > { %v1884_v46 = vpop.f32.mrb[136].mxu0 }
 0x20b   : > { %v1899_v43 = vadd.f32 %v1884_v46, %v1707_v62  ;;  %v6182_v47 = vpop.f32.mrb[137].mxu0 }
 0x20c   : > { %v1887_v11 = vpop.f32.mrb[138].mxu0  ;;  %v2627_v47 = vshrl.u32 %v2586_v33, 16 }
 0x20d   : > { %v1900_v0 = vadd.f32 %v1887_v11, %v1708_v54  ;;  %v7682_v27 = vadd.f32 %v7525_v21, %v1899_v43  ;;  %v6183_v9 = vpop.f32.mrb[139].mxu0  ;;  %v2588_v43 = vld [vmem:[#allocation2 + $0x24] sm:$0x8] }
 0x20f   : > { %v7685_v29 = vadd.f32 %v7532_v55, %v1900_v0 }
 0x212   : > { %v2372_v41 = vpop.f32.mrb[140].mxu0 }
 0x213   : > { %v2411_v45 = vadd.f32 %v2372_v41, %v2083_v23  ;;  %v6238_v6 = vpop.f32.mrb[141].mxu0  ;;  %v2590_v41 = vld [vmem:[#allocation2 + $0x30] sm:$0x8] }
 0x214   : > { %v2375_v32 = vpop.f32.mrb[142].mxu0 }
 0x215   : > { %v2428_v51 = vadd.f32 %v7690_v12, %v2411_v45  ;;  %v2412_v13 = vadd.f32 %v2375_v32, %v2084_v14  ;;  %v6239_v59 = vpop.f32.mrb[143].mxu0  ;;  %v2614_v14 = vshrl.u32 %v2584_v10, 16 }
 0x217   : > { %v2438_v53 = vmax.f32 %v2428_v51, 0.0  ;;  %v2429_v21 = vadd.f32 %v7690_v12, %v2412_v13  ;;  %v5401_v4 = vrot.slane %v2614_v14, 11  ;;  %v2640_v51 = vshrl.u32 %v2588_v43, 16 }
 0x219   : > { %v5685_v28 = vpack.c.bf16 %v2438_v53, %v2438_v53  ;;  %v2439_v19 = vmax.f32 %v2429_v21, 0.0 }
 0x21a   : > { %v2380_v55 = vpop.f32.mrb[144].mxu0 }
 0x21b   : > { %2488 = vst [vmem:[#allocation2 + $0x4] sm:$0xf] %v5685_v28  ;;  %v5686_v57 = vpack.c.bf16 %v2439_v19, %v2439_v19  ;;  %v2413_v62 = vadd.f32 %v2380_v55, %v2085_v26  ;;  %v6242_v63 = vpop.f32.mrb[145].mxu0  ;;  %v2592_v19 = vld [vmem:[#allocation2 + $0x3c] sm:$0x8] }
 0x21c   : > { %2569 = vst [vmem:[#allocation2 + $0x4] sm:$0xf] %v6836_v61  ;;  %v2383_v35 = vpop.f32.mrb[146].mxu0 }
 0x21d   : > { %2489 = vst [vmem:[#allocation2 + $0x10] sm:$0xf] %v5686_v57  ;;  %v2430_v54 = vadd.f32 %v7690_v12, %v2413_v62  ;;  %v2414_v25 = vadd.f32 %v2383_v35, %v2086_v39  ;;  %v6243_v7 = vpop.f32.mrb[147].mxu0  ;;  %v5402_v35 = vrot.slane %v2627_v47, 11 }
 0x21f   : > { %v2440_v17 = vmax.f32 %v2430_v54, 0.0  ;;  %v2431_v5 = vadd.f32 %v7690_v12, %v2414_v25  ;;  %v2653_v54 = vshrl.u32 %v2590_v41, 16 }
 0x221   : > { %v5687_v37 = vpack.c.bf16 %v2440_v17, %v2440_v17  ;;  %v2441_v50 = vmax.f32 %v2431_v5, 0.0 }
 0x222   : > { %v2388_v23 = vpop.f32.mrb[148].mxu0 }
 0x223   : > { %2490 = vst [vmem:[#allocation2 + $0x1c] sm:$0xf] %v5687_v37  ;;  %v5688_v22 = vpack.c.bf16 %v2441_v50, %v2441_v50  ;;  %v2415_v15 = vadd.f32 %v2388_v23, %v2087_v48  ;;  %v6246_v18 = vpop.f32.mrb[149].mxu0  ;;  %v2583_v16 = vld [vmem:[#allocation2 + $0x4] sm:$0xf]  ;;  %v5403_v50 = vrot.slane %v2640_v51, 11 }
 0x224   : > { %v2391_v24 = vpop.f32.mrb[150].mxu0  ;;  %v2585_v26 = vld [vmem:[#allocation2 + $0x10] sm:$0xf]  ;;  %v2606_v52 = vshrl.u32 %v2583_v16, 16  ;;  %v2609_v39 = vshll.u32 %v2583_v16, 16  ;;  %v2666_v23 = vshrl.u32 %v2592_v19, 16 }
 0x225   : > { %2491 = vst [vmem:[#allocation2 + $0x28] sm:$0xf] %v5688_v22  ;;  %v2432_v30 = vadd.f32 %v7690_v12, %v2415_v15  ;;  %v2416_v31 = vadd.f32 %v2391_v24, %v2088_v49  ;;  %v2619_v2 = vshrl.u32 %v2585_v26, 16  ;;  %v6247_v36 = vpop.f32.mrb[151].mxu0  ;;  %v5424_v38 = vcombine.low %v2583_v16, %v2585_v26  ;;  %v3003_v20 = vld [vmem:[#allocation2 + $0x4] sm:$0xf] }
 0x226   : > { %v2608_v34 = vrot.slane %v2606_v52, 7  ;;  %v2622_v46 = vshll.u32 %v2585_v26, 16  ;;  %v3005_v18 = vld [vmem:[#allocation2 + $0x10] sm:$0xf]  ;;  %v3020_v16 = vshrl.u32 %v3003_v20, 16  ;;  %v3023_v24 = vshll.u32 %v3003_v20, 16 }
 0x227   : > { %v2442_v42 = vmax.f32 %v2432_v30, 0.0  ;;  %v2433_v1 = vadd.f32 %v7690_v12, %v2416_v31  ;;  %v2621_v44 = vrot.slane %v2619_v2, 7  ;;  %6272 = vmatprep.mubr.bf16.mxu0 %v5424_v38  ;;  %v5405_v36 = vrot.slane %v2666_v23, 11  ;;  %v6784_v48 = vld [vmem:[%s8140_s3 + $0x1e8] sm:$0xff]  }
 0x228   : > { %v2611_v49 = vor.u32 %v2609_v39, %v2608_v34  ;;  %v5404_v39 = vrot.slane %v2653_v54, 11  ;;  %v3034_v33 = vshrl.u32 %v3005_v18, 16  ;;  %v3037_v34 = vshll.u32 %v3005_v18, 16 }
 0x229   : > { %v5689_v11 = vpack.c.bf16 %v2442_v42, %v2442_v42  ;;  %v2443_v0 = vmax.f32 %v2433_v1, 0.0  ;;  %v2624_v9 = vor.u32 %v2622_v46, %v2621_v44  ;;  %v6734_v44 = vld [vmem:[%s8140_s3 + $0x88] sm:$0xff]  }
 0x22a   : > { %v2396_v45 = vpop.f32.mrb[152].mxu0  ;;  %v2612_v6 = vsel %vm7700_vm11, %v5400_v40, %v2611_v49  ;;  %v2587_v32 = vld [vmem:[#allocation2 + $0x1c] sm:$0xf] }
 0x22b   : > { %2492 = vst [vmem:[#allocation2 + $0x34] sm:$0xf] %v5689_v11  ;;  %v5690_v13 = vpack.c.bf16 %v2443_v0, %v2443_v0  ;;  %v2417_v59 = vadd.f32 %v2396_v45, %v7676_v3  ;;  %v6250_v53 = vpop.f32.mrb[153].mxu0  ;;  %v2625_v21 = vsel %vm7700_vm11, %v5401_v4, %v2624_v9  ;;  %v2632_v28 = vshrl.u32 %v2587_v32, 16 }
 0x22c   : > { %v2399_v55 = vpop.f32.mrb[154].mxu0  ;;  %v5436_v57 = vcombine.low %v2612_v6, %v2625_v21  ;;  %v2589_v62 = vld [vmem:[#allocation2 + $0x28] sm:$0xf]  ;;  %v2635_v63 = vshll.u32 %v2587_v32, 16  ;;  %v3022_v11 = vrot.slane %v3020_v16, 4  ;;  %v3025_v0 = vrot.slane %v3023_v24, 5 }
 0x22d   : > { %2493 = vst [vmem:[#allocation2 + $0x40] sm:$0xf] %v5690_v13  ;;  %v2434_v25 = vadd.f32 %v7690_v12, %v2417_v59  ;;  %v2418_v7 = vadd.f32 %v2399_v55, %v7679_v58  ;;  %v2634_v17 = vrot.slane %v2632_v28, 7  ;;  %v2645_v5 = vshrl.u32 %v2589_v62, 16  ;;  %v6251_v3 = vpop.f32.mrb[155].mxu0 }
 0x22e   : > { %6296 = vmatprep.mubr.bf16.mxu1 %v5436_v57  ;;  %v2648_v10 = vshll.u32 %v2589_v62, 16  ;;  %v5425_v37 = vcombine.low %v2587_v32, %v2589_v62  ;;  %v3004_v6 = vld [vmem:[#allocation2 + $0x8] sm:$0x1]  ;;  %v3006_v59 = vld [vmem:[#allocation2 + $0x14] sm:$0x1]  ;;  %v3036_v53 = vrot.slane %v3034_v33, 4  ;;  %v3026_v20 = vor.u32 %v3025_v0, %v3022_v11 }
 0x22f   : > { %v2444_v60 = vmax.f32 %v2434_v25, 0.0  ;;  %v2435_v14 = vadd.f32 %v7690_v12, %v2418_v7  ;;  %v2647_v22 = vrot.slane %v2645_v5, 7  ;;  %v2637_v15 = vor.u32 %v2635_v63, %v2634_v17  ;;  %v2594_v62 = vld [vmem:[#allocation2 + $0x48] sm:$0x8]  ;;  %v2596_v63 = vld [vmem:[#allocation2 + $0x54] sm:$0x8] }
 0x230   : > { %6273 = vmatmul.mubr.bf16.vlgmr.msra.gmra.mrb[160].mxu0 %v5425_v37  ;;  %v3039_v21 = vrot.slane %v3037_v34, 5  ;;  %v3043_v17 = vshll.u32 %v3006_v59, 16  ;;  %v2679_v3 = vshrl.u32 %v2594_v62, 16 }
 0x231   : > { %v5691_v26 = vpack.c.bf16 %v2444_v60, %v2444_v60  ;;  %v2445_v58 = vmax.f32 %v2435_v14, 0.0  ;;  %v2650_v52 = vor.u32 %v2648_v10, %v2647_v22  ;;  %v2638_v31 = vsel %vm7700_vm11, %v5402_v35, %v2637_v15  ;;  %v6737_v22 = vld [vmem:[%s8140_s3 + $0x98] sm:$0xff]  }
 0x232   : > { %v2404_v30 = vpop.f32.mrb[156].mxu0  ;;  %v2591_v2 = vld [vmem:[#allocation2 + $0x34] sm:$0xf]  ;;  %v3029_v35 = vshll.u32 %v3004_v6, 16 }
 0x233   : > { %2494 = vst [vmem:[#allocation2 + $0x4c] sm:$0xf] %v5691_v26  ;;  %v5692_v38 = vpack.c.bf16 %v2445_v58, %v2445_v58  ;;  %v2419_v40 = vadd.f32 %v2404_v30, %v7682_v27  ;;  %v6254_v4 = vpop.f32.mrb[157].mxu0  ;;  %v2651_v42 = vsel %vm7700_vm11, %v5403_v50, %v2650_v52  ;;  %v2658_v1 = vshrl.u32 %v2591_v2, 16 }
 0x234   : > { %v2407_v46 = vpop.f32.mrb[158].mxu0  ;;  %v5437_v43 = vcombine.low %v2638_v31, %v2651_v42  ;;  %v2593_v49 = vld [vmem:[#allocation2 + $0x40] sm:$0xf]  ;;  %v2661_v47 = vshll.u32 %v2591_v2, 16  ;;  %v3031_v15 = vrot.slane %v3029_v35, 5  ;;  %v5406_v58 = vrot.slane %v2679_v3, 11 }
 0x235   : > { %2495 = vst [vmem:[#allocation2 + $0x58] sm:$0xf] %v5692_v38  ;;  %v2436_v9 = vadd.f32 %v7690_v12, %v2419_v40  ;;  %v2420_v27 = vadd.f32 %v2407_v46, %v7685_v29  ;;  %v2660_v41 = vrot.slane %v2658_v1, 7  ;;  %v2671_v45 = vshrl.u32 %v2593_v49, 16  ;;  %v6255_v32 = vpop.f32.mrb[159].mxu0  ;;  %v6735_v29 = vld [vmem:[%s8140_s3 + $0x90] sm:$0xff]  }
 0x236   : > { %6297 = vmatmul.mubr.bf16.vlgmr.msra.gmra.mrb[20].mxu1 %v5437_v43  ;;  %v2674_v51 = vshll.u32 %v2593_v49, 16  ;;  %v5426_v13 = vcombine.low %v2591_v2, %v2593_v49  ;;  %v3027_v52 = vrot.slane %v3026_v20, 4  ;;  %v3045_v30 = vrot.slane %v3043_v17, 5  ;;  %v3009_v31 = vld [vmem:[#allocation2 + $0x28] sm:$0xf]  ;;  %v6738_v40 = vld [vmem:[%s8140_s3 + $0xa0] sm:$0xff]  }
 0x237   : > { %v2446_v28 = vmax.f32 %v2436_v9, 0.0  ;;  %v2437_v19 = vadd.f32 %v7690_v12, %v2420_v27  ;;  %6305 = vmatpush3.bf16.msra.mxu1 %v7641_v56  ;;  %v2673_v55 = vrot.slane %v2671_v45, 7  ;;  %v2663_v57 = vor.u32 %v2661_v47, %v2660_v41  ;;  %v3013_v38 = vld [vmem:[#allocation2 + $0x40] sm:$0xf]  ;;  %v3007_v4 = vld [vmem:[#allocation2 + $0x1c] sm:$0xf] }
 0x238   : > { %6276 = vmatprep.mubr.bf16.mxu0 %v5426_v13  ;;  %6306 = vmatprep.subr.bf16.mxu1 %v6734_v44  ;;  %v2692_v12 = vshrl.u32 %v2596_v63, 16  ;;  %v3040_v56 = vor.u32 %v3039_v21, %v3036_v53  ;;  %v3062_v42 = vshrl.u32 %v3009_v31, 16  ;;  %v3065_v1 = vshll.u32 %v3009_v31, 16  ;;  %v6739_v45 = vld [vmem:[%s8140_s3 + $0xa8] sm:$0xff]   ;;  %v3014_v63 = vld [vmem:[#allocation2 + $0x44] sm:$0x1] }
 0x239   : > { %v5693_v54 = vpack.c.bf16 %v2446_v28, %v2446_v28  ;;  %v2447_v25 = vmax.f32 %v2437_v19, 0.0  ;;  %v2676_v7 = vor.u32 %v2674_v51, %v2673_v55  ;;  %v2664_v37 = vsel %vm7700_vm11, %v5404_v39, %v2663_v57  ;;  %v3010_v53 = vld [vmem:[#allocation2 + $0x2c] sm:$0x1]  ;;  %v3008_v55 = vld [vmem:[#allocation2 + $0x20] sm:$0x1] }
 0x23a   : > { %v2595_v5 = vld [vmem:[#allocation2 + $0x4c] sm:$0xf]  ;;  %v3041_v39 = vrot.slane %v3040_v56, 4  ;;  %v5407_v34 = vrot.slane %v2692_v12, 11  ;;  %v3032_v46 = vsel %vm7044_vm3, %v3027_v52, %v3031_v15  ;;  %v3090_v49 = vshrl.u32 %v3013_v38, 16 }
 0x23b   : > { %2496 = vst [vmem:[#allocation2 + $0x64] sm:$0xf] %v5693_v54  ;;  %v5694_v10 = vpack.c.bf16 %v2447_v25, %v2447_v25  ;;  %6307 = vmatpush3.bf16.msra.mxu1 %v6734_v44  ;;  %v2677_v50 = vsel %vm7700_vm11, %v5405_v36, %v2676_v7  ;;  %v2684_v23 = vshrl.u32 %v2595_v5, 16  ;;  %v2687_v16 = vshll.u32 %v2595_v5, 16  ;;  %v3011_v44 = vld [vmem:[#allocation2 + $0x34] sm:$0xf] }
 0x23c   : > { %6308 = vmatprep.subr.bf16.mxu1 %v6735_v29  ;;  %v5438_v60 = vcombine.low %v2664_v37, %v2677_v50  ;;  %v2597_v14 = vld [vmem:[#allocation2 + $0x58] sm:$0xf]  ;;  %v3046_v43 = vsel %vm7044_vm3, %v3041_v39, %v3045_v30  ;;  %v3093_v47 = vshll.u32 %v3013_v38, 16  ;;  %v3048_v9 = vshrl.u32 %v3007_v4, 16  ;;  %v3015_v25 = vld [vmem:[#allocation2 + $0x4c] sm:$0xf] }
 0x23d   : > { %2497 = vst [vmem:[#allocation2 + $0x70] sm:$0xf] %v5694_v10  ;;  %v2686_v18 = vrot.slane %v2684_v23, 7  ;;  %v2697_v24 = vshrl.u32 %v2597_v14, 16  ;;  %v5427_v26 = vcombine.low %v2595_v5, %v2597_v14  ;;  %v2700_v36 = vshll.u32 %v2597_v14, 16  ;;  %v6741_v14 = vld [vmem:[%s8140_s3 + $0xb8] sm:$0xff]  }
 0x23e   : > { %5398 = vst [vmem:[#allocation2 + $0x70] sm:$0xf] %v6836_v61  ;;  %6300 = vmatprep.mubr.bf16.mxu1 %v5438_v60  ;;  %v3051_v27 = vshll.u32 %v3007_v4, 16  ;;  %v3076_v6 = vshrl.u32 %v3011_v44, 16  ;;  %v3079_v32 = vshll.u32 %v3011_v44, 16  ;;  %v5464_v51 = vcombine.low %v3032_v46, %v3046_v43  ;;  %v6742_v4 = vld [vmem:[%s8140_s3 + $0xc0] sm:$0xff]  }
 0x23f   : > { %6309 = vmatpush3.bf16.msra.mxu1 %v6735_v29  ;;  %v2699_v2 = vrot.slane %v2697_v24, 7  ;;  %6277 = vmatmul.mubr.bf16.gmra.mrb[164].mxu0 %v5427_v26  ;;  %v2689_v33 = vor.u32 %v2687_v16, %v2686_v18  ;;  %v3064_v13 = vrot.slane %v3062_v42, 4  ;;  %v3067_v59 = vrot.slane %v3065_v1, 5  ;;  %v3017_v19 = vld [vmem:[#allocation2 + $0x58] sm:$0xf]  ;;  %v6740_v29 = vld [vmem:[%s8140_s3 + $0xb0] sm:$0xff]  }
 0x240   : > { %6310 = vmatprep.subr.bf16.mxu1 %v6737_v22  ;;  %v3092_v21 = vrot.slane %v3090_v49, 4  ;;  %v3095_v28 = vrot.slane %v3093_v47, 5  ;;  %v3050_v57 = vrot.slane %v3048_v9, 4  ;;  %v3053_v62 = vrot.slane %v3051_v27, 5  ;;  %v3012_v5 = vld [vmem:[#allocation2 + $0x38] sm:$0x1] }
 0x241   : > { %v2702_v61 = vor.u32 %v2700_v36, %v2699_v2  ;;  %v2690_v11 = vsel %vm7700_vm11, %v5406_v58, %v2689_v33  ;;  %v3078_v35 = vrot.slane %v3076_v6, 4  ;;  %v3081_v54 = vrot.slane %v3079_v32, 5  ;;  %v7753_v60 = vld [vmem:[#allocation2 + $0x1c] sm:$0xf]  ;;  %v7758_v58 = vld [vmem:[#allocation2 + $0x10] sm:$0xf] }
 0x242   : > { %v3068_v7 = vor.u32 %v3067_v59, %v3064_v13  ;;  %v3071_v17 = vshll.u32 %v3010_v53, 16  ;;  %v3118_v3 = vshrl.u32 %v3017_v19, 16  ;;  %v3121_v12 = vshll.u32 %v3017_v19, 16  ;;  %v3018_v30 = vld [vmem:[#allocation2 + $0x5c] sm:$0x1] }
 0x243   : > { %6311 = vmatpush3.bf16.msra.mxu1 %v6737_v22  ;;  %v2703_v0 = vsel %vm7700_vm11, %v5407_v34, %v2702_v61  ;;  %v3096_v20 = vor.u32 %v3095_v28, %v3092_v21  ;;  %v3099_v56 = vshll.u32 %v3014_v63, 16  ;;  %v3054_v10 = vor.u32 %v3053_v62, %v3050_v57  ;;  %v3286_v31 = vld [vmem:[#allocation2 + $0xc] sm:$0x8]  ;;  %v3016_v1 = vld [vmem:[#allocation2 + $0x50] sm:$0x1] }
 0x244   : > { %6312 = vmatprep.subr.bf16.mxu1 %v6738_v40  ;;  %v5439_v41 = vcombine.low %v2690_v11, %v2703_v0  ;;  %v3057_v37 = vshll.u32 %v3008_v55, 16  ;;  %v3104_v50 = vshrl.u32 %v3015_v25, 16  ;;  %v3107_v23 = vshll.u32 %v3015_v25, 16 }
 0x245   : > { %v3082_v22 = vor.u32 %v3081_v54, %v3078_v35  ;;  %v3085_v15 = vshll.u32 %v3012_v5, 16  ;;  %v3069_v18 = vrot.slane %v3068_v7, 4  ;;  %v3073_v16 = vrot.slane %v3071_v17, 5 }
 0x246   : > { %6301 = vmatmul.mubr.bf16.gmra.mrb[24].mxu1 %v5439_v41  ;;  %v3120_v24 = vrot.slane %v3118_v3, 4  ;;  %v3123_v26 = vrot.slane %v3121_v12, 5  ;;  %v3097_v52 = vrot.slane %v3096_v20, 4  ;;  %v3101_v39 = vrot.slane %v3099_v56, 5  ;;  %v6745_v12 = vld [vmem:[%s8140_s3 + $0xd8] sm:$0xff]   ;;  %v6746_v56 = vld [vmem:[%s8140_s3 + $0xe0] sm:$0xff]  }
 0x247   : > { %6313 = vmatpush3.bf16.msra.mxu1 %v6738_v40  ;;  %6320 = vmatprep.mubr.bf16.mxu1 %v5464_v51  ;;  %v3321_v2 = vshrl.u32 %v7753_v60, 16  ;;  %v3055_v36 = vrot.slane %v3054_v10, 4  ;;  %v3059_v33 = vrot.slane %v3057_v37, 5  ;;  %v3106_v34 = vrot.slane %v3104_v50, 4  ;;  %v3288_v40 = vld [vmem:[#allocation2 + $0x18] sm:$0x8] }
 0x248   : > { %6314 = vmatprep.subr.bf16.mxu1 %v6739_v45  ;;  %v3109_v38 = vrot.slane %v3107_v23, 5  ;;  %v3083_v61 = vrot.slane %v3082_v22, 4  ;;  %v3087_v42 = vrot.slane %v3085_v15, 5  ;;  %v3308_v44 = vshrl.u32 %v7758_v58, 16  ;;  %v6743_v51 = vld [vmem:[%s8140_s3 + $0xc8] sm:$0xff]  }
 0x249   : > { %v3074_v46 = vsel %vm7044_vm3, %v3069_v18, %v3073_v16  ;;  %v3124_v43 = vor.u32 %v3123_v26, %v3120_v24  ;;  %v3127_v49 = vshll.u32 %v3018_v30, 16  ;;  %v3102_v47 = vsel %vm7044_vm3, %v3097_v52, %v3101_v39  ;;  %v7795_v10 = vld [vmem:[#allocation2 + $0x34] sm:$0xf]  ;;  %v7797_v37 = vld [vmem:[#allocation2 + $0x4c] sm:$0xf] }
 0x24a   : > { %v3316_v11 = vshrl.u32 %v3288_v40, 16  ;;  %v3323_v0 = vrot.slane %v3321_v2, 7  ;;  %v3060_v9 = vsel %vm7044_vm3, %v3055_v36, %v3059_v33  ;;  %v3110_v27 = vor.u32 %v3109_v38, %v3106_v34  ;;  %v6747_v50 = vld [vmem:[%s8140_s3 + $0xe8] sm:$0xff]   ;;  %v7805_v22 = vld [vmem:[#allocation2 + $0x40] sm:$0xf]  ;;  %v6748_v26 = vld [vmem:[%s8140_s3 + $0xf0] sm:$0xff]  }
 0x24b   : > { %6315 = vmatpush3.bf16.msra.mxu1 %v6739_v45  ;;  %v3113_v41 = vshll.u32 %v3016_v1, 16  ;;  %v3303_v45 = vshrl.u32 %v3286_v31, 16  ;;  %v5465_v6 = vcombine.low %v3060_v9, %v3074_v46  ;;  %v3088_v32 = vsel %vm7044_vm3, %v3083_v61, %v3087_v42  ;;  %v7802_v23 = vld [vmem:[#allocation2 + $0x28] sm:$0xf]  ;;  %v3292_v15 = vld [vmem:[#allocation2 + $0x30] sm:$0x8] }
 0x24c   : > { %6316 = vmatprep.subr.bf16.mxu1 %v6740_v29  ;;  %v3310_v13 = vrot.slane %v3308_v44, 7  ;;  %v3324_v59 = vshll.u32 %v7753_v60, 16  ;;  %v5466_v53 = vcombine.low %v3088_v32, %v3102_v47  ;;  %v3125_v21 = vrot.slane %v3124_v43, 4  ;;  %v3296_v24 = vld [vmem:[#allocation2 + $0x48] sm:$0x8]  ;;  %v6749_v61 = vld [vmem:[%s8140_s3 + $0xf8] sm:$0xff]  }
 0x24d   : > { %v3129_v28 = vrot.slane %v3127_v49, 5  ;;  %v3311_v19 = vshll.u32 %v7758_v58, 16  ;;  %v5477_v55 = vrot.slane %v3316_v11, 11  ;;  %v3111_v62 = vrot.slane %v3110_v27, 4  ;;  %v3290_v52 = vld [vmem:[#allocation2 + $0x24] sm:$0x8] }
 0x24e   : > { %v3326_v57 = vor.u32 %v3324_v59, %v3323_v0  ;;  %v3115_v63 = vrot.slane %v3113_v41, 5  ;;  %v5476_v35 = vrot.slane %v3303_v45, 11  ;;  %v3373_v18 = vshrl.u32 %v7797_v37, 16  ;;  %v3294_v2 = vld [vmem:[#allocation2 + $0x3c] sm:$0x8] }
 0x24f   : > { %6317 = vmatpush3.bf16.msra.mxu1 %v6740_v29  ;;  %v6744_v29 = vld [vmem:[%s8140_s3 + $0xd0] sm:$0xff]   ;;  %v3313_v54 = vor.u32 %v3311_v19, %v3310_v13  ;;  %v3130_v25 = vsel %vm7044_vm3, %v3125_v21, %v3129_v28  ;;  %v3334_v16 = vshrl.u32 %v7802_v23, 16  ;;  %v3360_v39 = vshrl.u32 %v7805_v22, 16  ;;  %v7813_v34 = vld [vmem:[#allocation2 + $0x64] sm:$0xf] }
 0x250   : > { %6318 = vmatprep.subr.bf16.mxu1 %v6741_v14  ;;  %v3327_v7 = vsel %vm7700_vm11, %v5477_v55, %v3326_v57  ;;  %v3116_v17 = vsel %vm7044_vm3, %v3111_v62, %v3115_v63  ;;  %v3342_v30 = vshrl.u32 %v3292_v15, 16  ;;  %v3368_v36 = vshrl.u32 %v3296_v24, 16  ;;  %v7820_v46 = vld [vmem:[#allocation2 + $0x58] sm:$0xf]  ;;  %v3300_v41 = vld [vmem:[#allocation2 + $0x60] sm:$0x8] }
 0x251   : > { %v5467_v5 = vcombine.low %v3116_v17, %v3130_v25  ;;  %v3314_v3 = vsel %vm7700_vm11, %v5476_v35, %v3313_v54  ;;  %v3375_v33 = vrot.slane %v3373_v18, 7  ;;  %v3329_v38 = vshrl.u32 %v3290_v52, 16  ;;  %v6751_v25 = vld [vmem:[%s8140_s3 + $0x108] sm:$0xff]   ;;  %v6754_v18 = vld [vmem:[%s8140_s3 + $0x118] sm:$0xff]   ;;  %v6755_v24 = vld [vmem:[%s8140_s3 + $0x120] sm:$0xff]  }
 0x252   : > { %v5500_v20 = vcombine.low %v3314_v3, %v3327_v7  ;;  %v3336_v40 = vrot.slane %v3334_v16, 7  ;;  %v3355_v42 = vshrl.u32 %v3294_v2, 16  ;;  %v3362_v1 = vrot.slane %v3360_v39, 7  ;;  %v3724_v52 = vld [vmem:[#allocation2 + $0x1c] sm:$0xf] }
 0x253   : > { %6319 = vmatpush3.bf16.msra.mxu1 %v6741_v14  ;;  %v3347_v14 = vshrl.u32 %v7795_v10, 16  ;;  %v3376_v44 = vshll.u32 %v7797_v37, 16  ;;  %v3337_v43 = vshll.u32 %v7802_v23, 16  ;;  %v5479_v49 = vrot.slane %v3342_v30, 11 }
 0x254   : > { %6328 = vmatprep.subr.bf16.mxu1 %v6742_v4  ;;  %v3399_v11 = vshrl.u32 %v7813_v34, 16  ;;  %v3363_v0 = vshll.u32 %v7805_v22, 16  ;;  %v5481_v9 = vrot.slane %v3368_v36, 11  ;;  %v5478_v45 = vrot.slane %v3329_v38, 11 }
 0x255   : > { %v3349_v31 = vrot.slane %v3347_v14, 7  ;;  %v3378_v27 = vor.u32 %v3376_v44, %v3375_v33  ;;  %v3386_v32 = vshrl.u32 %v7820_v46, 16  ;;  %v5480_v13 = vrot.slane %v3355_v42, 11 }
 0x256   : > { %6321 = vmatmul.mubr.bf16.vlgmr.msra.gmra.mrb[20].mxu1 %v5465_v6  ;;  %v3339_v6 = vor.u32 %v3337_v43, %v3336_v40  ;;  %v3365_v59 = vor.u32 %v3363_v0, %v3362_v1  ;;  %v3394_v28 = vshrl.u32 %v3300_v41, 16  ;;  %v3401_v19 = vrot.slane %v3399_v11, 7  ;;  %v3725_v40 = vld [vmem:[#allocation2 + $0x20] sm:$0x1]  ;;  %v3723_v1 = vld [vmem:[#allocation2 + $0x14] sm:$0x1] }
 0x257   : > { %6324 = vmatprep.mubr.bf16.mxu1 %v5466_v53  ;;  %6329 = vmatpush3.bf16.msra.mxu1 %v6742_v4  ;;  %v3350_v4 = vshll.u32 %v7795_v10, 16  ;;  %v3298_v53 = vld [vmem:[#allocation2 + $0x54] sm:$0x8]  ;;  %v3379_v55 = vsel %vm7700_vm11, %v5481_v9, %v3378_v27  ;;  %v3388_v63 = vrot.slane %v3386_v32, 7  ;;  %v3389_v17 = vshll.u32 %v7820_v46, 16 }
 0x258   : > { %6330 = vmatprep.subr.bf16.mxu1 %v6743_v51  ;;  %v3340_v57 = vsel %vm7700_vm11, %v5478_v45, %v3339_v6  ;;  %v3381_v62 = vshrl.u32 %v3298_v53, 16  ;;  %v3366_v54 = vsel %vm7700_vm11, %v5480_v13, %v3365_v59  ;;  %v5528_v16 = vcombine.low %v7758_v58, %v7753_v60  ;;  %v6757_v60 = vld [vmem:[%s8140_s3 + $0x130] sm:$0xff]   ;;  %v3732_v59 = vld [vmem:[#allocation2 + $0x4c] sm:$0xf]  ;;  %v6766_v53 = vld [vmem:[%s8140_s3 + $0x160] sm:$0xff]  }
 0x259   : > { %v3352_v47 = vor.u32 %v3350_v4, %v3349_v31  ;;  %v5502_v7 = vcombine.low %v3366_v54, %v3379_v55  ;;  %v3722_v58 = vld [vmem:[#allocation2 + $0x10] sm:$0xf]  ;;  %v3753_v39 = vshrl.u32 %v3724_v52, 16  ;;  %v3756_v30 = vshll.u32 %v3724_v52, 16  ;;  %v6758_v31 = vld [vmem:[%s8140_s3 + $0x138] sm:$0xff]   ;;  %v6760_v4 = vld [vmem:[%s8140_s3 + $0x140] sm:$0xff]  }
 0x25a   : > { %v3739_v2 = vshrl.u32 %v3722_v58, 16  ;;  %v3742_v36 = vshll.u32 %v3722_v58, 16  ;;  %v3762_v43 = vshll.u32 %v3725_v40, 16  ;;  %v3748_v0 = vshll.u32 %v3723_v1, 16  ;;  %v3728_v13 = vld [vmem:[#allocation2 + $0x34] sm:$0xf] }
 0x25b   : > { %6331 = vmatpush3.bf16.msra.mxu1 %v6743_v51  ;;  %v6750_v51 = vld [vmem:[%s8140_s3 + $0x100] sm:$0xff]   ;;  %v3353_v21 = vsel %vm7700_vm11, %v5479_v49, %v3352_v47  ;;  %v3755_v33 = vrot.slane %v3753_v39, 4  ;;  %v3758_v38 = vrot.slane %v3756_v30, 5  ;;  %v5529_v49 = vcombine.low %v7802_v23, %v7795_v10  ;;  %v6762_v47 = vld [vmem:[%s8140_s3 + $0x148] sm:$0xff]   ;;  %v6764_v10 = vld [vmem:[%s8140_s3 + $0x150] sm:$0xff]  }
 0x25c   : > { %6332 = vmatprep.subr.bf16.mxu1 %v6744_v29  ;;  %v5501_v35 = vcombine.low %v3340_v57, %v3353_v21  ;;  %v3744_v42 = vrot.slane %v3742_v36, 5  ;;  %v5530_v9 = vcombine.low %v7805_v22, %v7797_v37  ;;  %v3764_v41 = vrot.slane %v3762_v43, 5  ;;  %v6765_v22 = vld [vmem:[%s8140_s3 + $0x158] sm:$0xff]   ;;  %v3731_v52 = vld [vmem:[#allocation2 + $0x44] sm:$0x1] }
 0x25d   : > { %v3759_v44 = vor.u32 %v3758_v38, %v3755_v33  ;;  %v3750_v45 = vrot.slane %v3748_v0, 5  ;;  %v5531_v32 = vcombine.low %v7820_v46, %v7813_v34  ;;  %v3781_v46 = vshrl.u32 %v3728_v13, 16  ;;  %v7897_v38 = vld [vmem:[#allocation2 + $0x28] sm:$0xf]  ;;  %v6769_v40 = vld [vmem:[%s8140_s3 + $0x178] sm:$0xff]  }
 0x25e   : > { %6325 = vmatmul.mubr.bf16.gmra.mrb[24].mxu1 %v5467_v5  ;;  %v5483_v5 = vrot.slane %v3394_v28, 11  ;;  %v3784_v21 = vshll.u32 %v3728_v13, 16  ;;  %v3730_v28 = vld [vmem:[#allocation2 + $0x40] sm:$0xf]  ;;  %v3812_v55 = vshll.u32 %v3732_v59, 16 }
 0x25f   : > { %6333 = vmatpush3.bf16.msra.mxu1 %v6744_v29  ;;  %6344 = vmatprep.mubr.bf16.mxu1 %v5500_v20  ;;  %v3402_v29 = vshll.u32 %v7813_v34, 16  ;;  %v3391_v20 = vor.u32 %v3389_v17, %v3388_v63  ;;  %v3760_v27 = vrot.slane %v3759_v44, 4  ;;  %v3726_v34 = vld [vmem:[#allocation2 + $0x28] sm:$0xf]  ;;  %v3783_v54 = vrot.slane %v3781_v46, 4 }
 0x260   : > { %6334 = vmatprep.subr.bf16.mxu1 %v6745_v12  ;;  %v3767_v57 = vshrl.u32 %v3726_v34, 16  ;;  %v6767_v63 = vld [vmem:[%s8140_s3 + $0x168] sm:$0xff]  }
 0x261   : > { %v3404_v3 = vor.u32 %v3402_v29, %v3401_v19  ;;  %v3765_v6 = vsel %vm7044_vm3, %v3760_v27, %v3764_v41  ;;  %v3809_v19 = vshrl.u32 %v3732_v59, 16  ;;  %v3795_v29 = vshrl.u32 %v3730_v28, 16  ;;  %v3737_v0 = vld [vmem:[#allocation2 + $0x68] sm:$0x1] }
 0x262   : > { %v4040_v27 = vshrl.u32 %v7897_v38, 16 }
 0x263   : > { %6335 = vmatpush3.bf16.msra.mxu1 %v6745_v12  ;;  %v5482_v12 = vrot.slane %v3381_v62, 11  ;;  %v3770_v62 = vshll.u32 %v3726_v34, 16  ;;  %v3811_v17 = vrot.slane %v3809_v19, 4  ;;  %v3846_v34 = vshll.u32 %v3737_v0, 16 }
 0x264   : > { %6336 = vmatprep.subr.bf16.mxu1 %v6746_v56 }
 0x265   : > { %v3392_v14 = vsel %vm7700_vm11, %v5482_v12, %v3391_v20  ;;  %v3727_v12 = vld [vmem:[#allocation2 + $0x2c] sm:$0x1]  ;;  %v3769_v20 = vrot.slane %v3767_v57, 4 }
 0x267   : > { %6337 = vmatpush3.bf16.msra.mxu1 %v6746_v56  ;;  %v6752_v56 = vld [vmem:[%s8140_s3 + $0x110] sm:$0xff]  }
 0x268   : > { %6338 = vmatprep.subr.bf16.mxu1 %v6747_v50 }
 0x26b   : > { %6339 = vmatpush3.bf16.msra.mxu1 %v6747_v50  ;;  %v3405_v50 = vsel %vm7700_vm11, %v5483_v5, %v3404_v3  ;;  %v3814_v5 = vrot.slane %v3812_v55, 5  ;;  %v3736_v3 = vld [vmem:[#allocation2 + $0x64] sm:$0xf] }
 0x26c   : > { %6340 = vmatprep.subr.bf16.mxu1 %v6748_v26  ;;  %v5503_v15 = vcombine.low %v3392_v14, %v3405_v50  ;;  %v3733_v50 = vld [vmem:[#allocation2 + $0x50] sm:$0x1]  ;;  %v3840_v58 = vshll.u32 %v3736_v3, 16 }
 0x26d   : > { %v6768_v14 = vld [vmem:[%s8140_s3 + $0x170] sm:$0xff]   ;;  %v3815_v39 = vor.u32 %v3814_v5, %v3811_v17  ;;  %v3818_v30 = vshll.u32 %v3733_v50, 16  ;;  %v3848_v5 = vrot.slane %v3846_v34, 5 }
 0x26e   : > { %v3842_v43 = vrot.slane %v3840_v58, 5  ;;  %v6773_v58 = vld [vmem:[%s8140_s3 + $0x198] sm:$0xff]  }
 0x26f   : > { %6341 = vmatpush3.bf16.msra.mxu1 %v6748_v26  ;;  %v6756_v26 = vld [vmem:[%s8140_s3 + $0x128] sm:$0xff]  }
 0x270   : > { %6342 = vmatprep.subr.bf16.mxu1 %v6749_v61 }
 0x273   : > { %6343 = vmatpush3.bf16.msra.mxu1 %v6749_v61  ;;  %v3741_v61 = vrot.slane %v3739_v2, 4  ;;  %v3776_v2 = vshll.u32 %v3727_v12, 16 }
 0x274   : > { %6352 = vmatprep.subr.bf16.mxu1 %v6750_v51 }
 0x275   : > { %v3745_v11 = vor.u32 %v3744_v42, %v3741_v61  ;;  %v3804_v61 = vshll.u32 %v3731_v52, 16 }
 0x276   : > { %6345 = vmatmul.mubr.bf16.vlgmr.msra.gmra.mrb[20].mxu1 %v5501_v35  ;;  %v3798_v35 = vshll.u32 %v3730_v28, 16  ;;  %v4042_v28 = vrot.slane %v4040_v27, 7  ;;  %v4013_v27 = vld [vmem:[#allocation2 + $0x48] sm:$0x8] }
 0x277   : > { %6348 = vmatprep.mubr.bf16.mxu1 %v5502_v7  ;;  %6353 = vmatpush3.bf16.msra.mxu1 %v6750_v51  ;;  %v3746_v23 = vrot.slane %v3745_v11, 4  ;;  %v3729_v7 = vld [vmem:[#allocation2 + $0x38] sm:$0x1]  ;;  %v3820_v11 = vrot.slane %v3818_v30, 5  ;;  %v6774_v30 = vld [vmem:[%s8140_s3 + $0x1a0] sm:$0xff]  }
 0x278   : > { %6354 = vmatprep.subr.bf16.mxu1 %v6751_v25 }
 0x279   : > { %v3751_v37 = vsel %vm7044_vm3, %v3746_v23, %v3750_v45 }
 0x27a   : > { %v5556_v51 = vcombine.low %v3751_v37, %v3765_v6  ;;  %v4007_v6 = vld [vmem:[#allocation2 + $0x24] sm:$0x8] }
 0x27b   : > { %6355 = vmatpush3.bf16.msra.mxu1 %v6751_v25  ;;  %v3786_v25 = vrot.slane %v3784_v21, 5  ;;  %v4035_v21 = vshrl.u32 %v4007_v6, 16 }
 0x27c   : > { %6356 = vmatprep.subr.bf16.mxu1 %v6752_v56 }
 0x27d   : > { %v5569_v12 = vrot.slane %v4035_v21, 11 }
 0x27e   : > { %6349 = vmatmul.mubr.bf16.gmra.mrb[24].mxu1 %v5503_v15  ;;  %v3797_v15 = vrot.slane %v3795_v29, 4 }
 0x27f   : > { %6357 = vmatpush3.bf16.msra.mxu1 %v6752_v56  ;;  %6368 = vmatprep.mubr.bf16.mxu1 %v5528_v16  ;;  %v3772_v56 = vrot.slane %v3770_v62, 5  ;;  %v3734_v16 = vld [vmem:[#allocation2 + $0x58] sm:$0xf] }
 0x280   : > { %6358 = vmatprep.subr.bf16.mxu1 %v6754_v18  ;;  %v3823_v36 = vshrl.u32 %v3734_v16, 16  ;;  %v3826_v33 = vshll.u32 %v3734_v16, 16 }
 0x282   : > { %v3825_v23 = vrot.slane %v3823_v36, 4  ;;  %v3828_v45 = vrot.slane %v3826_v33, 5  ;;  %v6775_v36 = vld [vmem:[%s8140_s3 + $0x1a8] sm:$0xff]   ;;  %v7946_v33 = vld [vmem:[#allocation2 + $0x34] sm:$0xf] }
 0x283   : > { %6359 = vmatpush3.bf16.msra.mxu1 %v6754_v18  ;;  %v3800_v18 = vrot.slane %v3798_v35, 5  ;;  %v6771_v35 = vld [vmem:[%s8140_s3 + $0x188] sm:$0xff]  }
 0x284   : > { %6360 = vmatprep.subr.bf16.mxu1 %v6755_v24  ;;  %v3829_v55 = vor.u32 %v3828_v45, %v3825_v23  ;;  %v7957_v23 = vld [vmem:[#allocation2 + $0x70] sm:$0xf] }
 0x285   : > { %v4118_v21 = vshrl.u32 %v7957_v23, 16 }
 0x287   : > { %6361 = vmatpush3.bf16.msra.mxu1 %v6755_v24  ;;  %v3787_v24 = vor.u32 %v3786_v25, %v3783_v54  ;;  %v4043_v25 = vshll.u32 %v7897_v38, 16 }
 0x288   : > { %6362 = vmatprep.subr.bf16.mxu1 %v6756_v26 }
 0x289   : > { %v3788_v42 = vrot.slane %v3787_v24, 4 }
 0x28b   : > { %6363 = vmatpush3.bf16.msra.mxu1 %v6756_v26  ;;  %v3790_v26 = vshll.u32 %v3729_v7, 16 }
 0x28c   : > { %6364 = vmatprep.subr.bf16.mxu1 %v6757_v60 }
 0x28d   : > { %v3792_v1 = vrot.slane %v3790_v26, 5 }
 0x28f   : > { %6365 = vmatpush3.bf16.msra.mxu1 %v6757_v60  ;;  %v3837_v60 = vshrl.u32 %v3736_v3, 16  ;;  %v3793_v59 = vsel %vm7044_vm3, %v3788_v42, %v3792_v1  ;;  %v4053_v1 = vshrl.u32 %v7946_v33, 16 }
 0x290   : > { %6366 = vmatprep.subr.bf16.mxu1 %v6758_v31 }
 0x291   : > { %v3839_v44 = vrot.slane %v3837_v60, 4  ;;  %v4055_v6 = vrot.slane %v4053_v1, 7 }
 0x293   : > { %6367 = vmatpush3.bf16.msra.mxu1 %v6758_v31  ;;  %v3773_v31 = vor.u32 %v3772_v56, %v3769_v20  ;;  %v4045_v20 = vor.u32 %v4043_v25, %v4042_v28  ;;  %v3830_v56 = vrot.slane %v3829_v55, 4 }
 0x294   : > { %6376 = vmatprep.subr.bf16.mxu1 %v6760_v4 }
 0x295   : > { %v3774_v41 = vrot.slane %v3773_v31, 4  ;;  %v4046_v24 = vsel %vm7700_vm11, %v5569_v12, %v4045_v20  ;;  %v7939_v31 = vld [vmem:[#allocation2 + $0x40] sm:$0xf]  ;;  %v4121_v12 = vshll.u32 %v7957_v23, 16 }
 0x296   : > { %6369 = vmatmul.mubr.bf16.vlgmr.msra.gmra.mrb[20].mxu1 %v5529_v49  ;;  %v7902_v49 = vld [vmem:[#allocation2 + $0x1c] sm:$0xf] }
 0x297   : > { %6372 = vmatprep.mubr.bf16.mxu1 %v5530_v9  ;;  %6377 = vmatpush3.bf16.msra.mxu1 %v6760_v4  ;;  %v3801_v4 = vor.u32 %v3800_v18, %v3797_v15  ;;  %v4005_v9 = vld [vmem:[#allocation2 + $0x18] sm:$0x8]  ;;  %v4027_v13 = vshrl.u32 %v7902_v49, 16  ;;  %v4030_v3 = vshll.u32 %v7902_v49, 16  ;;  %v5620_v1 = vcombine.low %v7902_v49, %v7897_v38  ;;  %v6785_v38 = vld [vmem:[%s8140_s3 + $0x1f0] sm:$0xff]  }
 0x298   : > { %6378 = vmatprep.subr.bf16.mxu1 %v6762_v47  ;;  %v4022_v62 = vshrl.u32 %v4005_v9, 16  ;;  %v4441_v49 = vld [vmem:[#allocation2 + $0x1c] sm:$0xf] }
 0x299   : > { %v3802_v37 = vrot.slane %v3801_v4, 4  ;;  %v4029_v54 = vrot.slane %v4027_v13, 7  ;;  %v7949_v4 = vld [vmem:[#allocation2 + $0x4c] sm:$0xf] }
 0x29a   : > { %v5568_v15 = vrot.slane %v4022_v62, 11  ;;  %v4082_v28 = vshll.u32 %v7949_v4, 16 }
 0x29b   : > { %6379 = vmatpush3.bf16.msra.mxu1 %v6762_v47  ;;  %v3816_v47 = vrot.slane %v3815_v39, 4  ;;  %v4032_v18 = vor.u32 %v4030_v3, %v4029_v54  ;;  %v4120_v3 = vrot.slane %v4118_v21, 7 }
 0x29c   : > { %6380 = vmatprep.subr.bf16.mxu1 %v6764_v10 }
 0x29d   : > { %v3821_v46 = vsel %vm7044_vm3, %v3816_v47, %v3820_v11  ;;  %v4033_v60 = vsel %vm7700_vm11, %v5568_v15, %v4032_v18  ;;  %v4009_v47 = vld [vmem:[#allocation2 + $0x30] sm:$0x8]  ;;  %v4079_v11 = vshrl.u32 %v7949_v4, 16 }
 0x29e   : > { %6373 = vmatmul.mubr.bf16.gmra.mrb[24].mxu1 %v5531_v32  ;;  %v6770_v32 = vld [vmem:[%s8140_s3 + $0x180] sm:$0xff]   ;;  %v5592_v39 = vcombine.low %v4033_v60, %v4046_v24  ;;  %v4048_v45 = vshrl.u32 %v4009_v47, 16  ;;  %v4123_v60 = vor.u32 %v4121_v12, %v4120_v3 }
 0x29f   : > { %6381 = vmatpush3.bf16.msra.mxu1 %v6764_v10  ;;  %6392 = vmatprep.mubr.bf16.mxu1 %v5556_v51  ;;  %v3778_v10 = vrot.slane %v3776_v2, 5  ;;  %v3735_v51 = vld [vmem:[#allocation2 + $0x5c] sm:$0x1]  ;;  %v7941_v2 = vld [vmem:[#allocation2 + $0x58] sm:$0xf] }
 0x2a0   : > { %6382 = vmatprep.subr.bf16.mxu1 %v6765_v22  ;;  %v3832_v57 = vshll.u32 %v3735_v51, 16  ;;  %v4092_v42 = vshrl.u32 %v7941_v2, 16  ;;  %v4081_v51 = vrot.slane %v4079_v11, 7  ;;  %v4095_v13 = vshll.u32 %v7941_v2, 16 }
 0x2a1   : > { %v3779_v19 = vsel %vm7044_vm3, %v3774_v41, %v3778_v10  ;;  %v5570_v62 = vrot.slane %v4048_v45, 11  ;;  %v4444_v45 = vld [vmem:[#allocation2 + $0x2c] sm:$0x1] }
 0x2a2   : > { %v3834_v50 = vrot.slane %v3832_v57, 5  ;;  %v4094_v10 = vrot.slane %v4092_v42, 7  ;;  %v4019_v57 = vld [vmem:[#allocation2 + $0x6c] sm:$0x8]  ;;  %v4084_v25 = vor.u32 %v4082_v28, %v4081_v51  ;;  %v6782_v42 = vld [vmem:[%s8140_s3 + $0x1d8] sm:$0xff]   ;;  %v5622_v28 = vcombine.low %v7949_v4, %v7941_v2 }
 0x2a3   : > { %6383 = vmatpush3.bf16.msra.mxu1 %v6765_v22  ;;  %v3806_v22 = vrot.slane %v3804_v61, 5  ;;  %v4011_v61 = vld [vmem:[#allocation2 + $0x3c] sm:$0x8] }
 0x2a4   : > { %6384 = vmatprep.subr.bf16.mxu1 %v6766_v53  ;;  %v3835_v26 = vsel %vm7044_vm3, %v3830_v56, %v3834_v50  ;;  %v4061_v0 = vshrl.u32 %v4011_v61, 16  ;;  %v4097_v55 = vor.u32 %v4095_v13, %v4094_v10  ;;  %v4481_v13 = vshll.u32 %v4444_v45, 16  ;;  %v6793_v4 = vld [vmem:[%s8140_s3 + $0x218] sm:$0xff]  }
 0x2a5   : > { %v3807_v29 = vsel %vm7044_vm3, %v3802_v37, %v3806_v22  ;;  %v6777_v37 = vld [vmem:[%s8140_s3 + $0x1b8] sm:$0xff]   ;;  %v4074_v22 = vshrl.u32 %v4013_v27, 16  ;;  %v4461_v27 = vshll.u32 %v4441_v49, 16 }
 0x2a6   : > { %v5558_v7 = vcombine.low %v3807_v29, %v3821_v46  ;;  %v5571_v34 = vrot.slane %v4061_v0, 11  ;;  %v6786_v0 = vld [vmem:[%s8140_s3 + $0x1f8] sm:$0xff]  }
 0x2a7   : > { %6385 = vmatpush3.bf16.msra.mxu1 %v6766_v53  ;;  %v3843_v53 = vor.u32 %v3842_v43, %v3839_v44  ;;  %v4015_v44 = vld [vmem:[#allocation2 + $0x54] sm:$0x8]  ;;  %v5572_v54 = vrot.slane %v4074_v22, 11  ;;  %v4442_v22 = vld [vmem:[#allocation2 + $0x20] sm:$0x1] }
 0x2a8   : > { %6386 = vmatprep.subr.bf16.mxu1 %v6767_v63  ;;  %v6776_v43 = vld [vmem:[%s8140_s3 + $0x1b0] sm:$0xff]   ;;  %v4087_v41 = vshrl.u32 %v4015_v44, 16  ;;  %v6783_v44 = vld [vmem:[%s8140_s3 + $0x1e0] sm:$0xff]   ;;  %v4467_v21 = vshll.u32 %v4442_v22, 16 }
 0x2a9   : > { %v3844_v17 = vrot.slane %v3843_v53, 4  ;;  %v4056_v53 = vshll.u32 %v7946_v33, 16  ;;  %v4085_v18 = vsel %vm7700_vm11, %v5572_v54, %v4084_v25  ;;  %v4451_v54 = vld [vmem:[#allocation2 + $0x58] sm:$0xf]  ;;  %v6794_v25 = vld [vmem:[%s8140_s3 + $0x220] sm:$0xff]  }
 0x2aa   : > { %v4531_v3 = vshll.u32 %v4451_v54, 16 }
 0x2ab   : > { %6387 = vmatpush3.bf16.msra.mxu1 %v6767_v63  ;;  %v5557_v63 = vcombine.low %v3779_v19, %v3793_v59  ;;  %v3849_v16 = vsel %vm7044_vm3, %v3844_v17, %v3848_v5  ;;  %v7964_v59 = vld [vmem:[#allocation2 + $0x64] sm:$0xf]  ;;  %v5573_v19 = vrot.slane %v4087_v41, 11  ;;  %v4113_v5 = vshrl.u32 %v4019_v57, 16 }
 0x2ac   : > { %6388 = vmatprep.subr.bf16.mxu1 %v6768_v14  ;;  %v5559_v52 = vcombine.low %v3835_v26, %v3849_v16  ;;  %v4105_v29 = vshrl.u32 %v7964_v59, 16  ;;  %v6779_v16 = vld [vmem:[%s8140_s3 + $0x1c8] sm:$0xff]   ;;  %v4108_v26 = vshll.u32 %v7964_v59, 16  ;;  %v4469_v57 = vrot.slane %v4467_v21, 5 }
 0x2ad   : > { %v4098_v20 = vsel %vm7700_vm11, %v5573_v19, %v4097_v55  ;;  %v4483_v55 = vrot.slane %v4481_v13, 5 }
 0x2ae   : > { %v5594_v24 = vcombine.low %v4085_v18, %v4098_v20 }
 0x2af   : > { %6389 = vmatpush3.bf16.msra.mxu1 %v6768_v14  ;;  %v6772_v14 = vld [vmem:[%s8140_s3 + $0x190] sm:$0xff]  }
 0x2b0   : > { %6390 = vmatprep.subr.bf16.mxu1 %v6769_v40 }
 0x2b3   : > { %6391 = vmatpush3.bf16.msra.mxu1 %v6769_v40  ;;  %v4066_v40 = vshrl.u32 %v7939_v31, 16 }
 0x2b4   : > { %6400 = vmatprep.subr.bf16.mxu1 %v6770_v32 }
 0x2b5   : > { %v4068_v9 = vrot.slane %v4066_v40, 7 }
 0x2b6   : > { %6393 = vmatmul.mubr.bf16.vlgmr.msra.gmra.mrb[20].mxu1 %v5557_v63  ;;  %v4058_v63 = vor.u32 %v4056_v53, %v4055_v6  ;;  %v6788_v6 = vld [vmem:[%s8140_s3 + $0x200] sm:$0xff]   ;;  %v5621_v53 = vcombine.low %v7946_v33, %v7939_v31 }
 0x2b7   : > { %6396 = vmatprep.mubr.bf16.mxu1 %v5558_v7  ;;  %6401 = vmatpush3.bf16.msra.mxu1 %v6770_v32  ;;  %v4069_v32 = vshll.u32 %v7939_v31, 16  ;;  %v4017_v7 = vld [vmem:[#allocation2 + $0x60] sm:$0x8]  ;;  %v6792_v31 = vld [vmem:[%s8140_s3 + $0x210] sm:$0xff]  }
 0x2b8   : > { %6402 = vmatprep.subr.bf16.mxu1 %v6771_v35  ;;  %v4059_v56 = vsel %vm7700_vm11, %v5570_v62, %v4058_v63  ;;  %v4100_v50 = vshrl.u32 %v4017_v7, 16  ;;  %v5623_v63 = vcombine.low %v7964_v59, %v7957_v23  ;;  %v4445_v23 = vld [vmem:[#allocation2 + $0x34] sm:$0xf] }
 0x2b9   : > { %v4071_v46 = vor.u32 %v4069_v32, %v4068_v9  ;;  %v4458_v9 = vshrl.u32 %v4441_v49, 16  ;;  %v4486_v20 = vshrl.u32 %v4445_v23, 16 }
 0x2bb   : > { %6403 = vmatpush3.bf16.msra.mxu1 %v6771_v35  ;;  %v6778_v35 = vld [vmem:[%s8140_s3 + $0x1c0] sm:$0xff]   ;;  %v4072_v17 = vsel %vm7700_vm11, %v5571_v34, %v4071_v46  ;;  %v4460_v32 = vrot.slane %v4458_v9, 4  ;;  %v6790_v34 = vld [vmem:[%s8140_s3 + $0x208] sm:$0xff]  }
 0x2bc   : > { %6404 = vmatprep.subr.bf16.mxu1 %v6772_v14  ;;  %v5593_v15 = vcombine.low %v4059_v56, %v4072_v17  ;;  %v4449_v17 = vld [vmem:[#allocation2 + $0x4c] sm:$0xf]  ;;  %v4489_v56 = vshll.u32 %v4445_v23, 16 }
 0x2bd   : > { %v4517_v18 = vshll.u32 %v4449_v17, 16 }
 0x2be   : > { %6397 = vmatmul.mubr.bf16.gmra.mrb[24].mxu1 %v5559_v52  ;;  %v5575_v52 = vrot.slane %v4113_v5, 11  ;;  %v4528_v5 = vshrl.u32 %v4451_v54, 16 }
 0x2bf   : > { %6405 = vmatpush3.bf16.msra.mxu1 %v6772_v14  ;;  %6416 = vmatprep.mubr.bf16.mxu1 %v5592_v39  ;;  %v4107_v14 = vrot.slane %v4105_v29, 7 }
 0x2c0   : > { %6406 = vmatprep.subr.bf16.mxu1 %v6773_v58 }
 0x2c1   : > { %v4110_v39 = vor.u32 %v4108_v26, %v4107_v14  ;;  %v6795_v14 = vld [vmem:[%s8140_s3 + $0x228] sm:$0xff]  }
 0x2c3   : > { %6407 = vmatpush3.bf16.msra.mxu1 %v6773_v58  ;;  %v5574_v58 = vrot.slane %v4100_v50, 11 }
 0x2c4   : > { %6408 = vmatprep.subr.bf16.mxu1 %v6774_v30 }
 0x2c5   : > { %v4111_v40 = vsel %vm7700_vm11, %v5574_v58, %v4110_v39  ;;  %v4530_v58 = vrot.slane %v4528_v5, 4  ;;  %v4533_v39 = vrot.slane %v4531_v3, 5 }
 0x2c7   : > { %6409 = vmatpush3.bf16.msra.mxu1 %v6774_v30  ;;  %v6780_v30 = vld [vmem:[%s8140_s3 + $0x1d0] sm:$0xff]   ;;  %v4534_v9 = vor.u32 %v4533_v39, %v4530_v58 }
 0x2c8   : > { %6410 = vmatprep.subr.bf16.mxu1 %v6775_v36  ;;  %v6800_v58 = vld [vmem:[%s8142_s5 + $0x10] sm:$0xff]  }
 0x2cb   : > { %6411 = vmatpush3.bf16.msra.mxu1 %v6775_v36  ;;  %v4124_v36 = vsel %vm7700_vm11, %v5575_v52, %v4123_v60 }
 0x2cc   : > { %6412 = vmatprep.subr.bf16.mxu1 %v6776_v43  ;;  %v5595_v61 = vcombine.low %v4111_v40, %v4124_v36  ;;  %v4446_v36 = vld [vmem:[#allocation2 + $0x38] sm:$0x1]  ;;  %v4488_v40 = vrot.slane %v4486_v20, 4 }
 0x2cf   : > { %6413 = vmatpush3.bf16.msra.mxu1 %v6776_v43  ;;  %v4443_v43 = vld [vmem:[#allocation2 + $0x28] sm:$0xf] }
 0x2d0   : > { %6414 = vmatprep.subr.bf16.mxu1 %v6777_v37  ;;  %v4472_v47 = vshrl.u32 %v4443_v43, 16  ;;  %v4475_v11 = vshll.u32 %v4443_v43, 16  ;;  %v4453_v43 = vld [vmem:[#allocation2 + $0x64] sm:$0xf] }
 0x2d1   : > { %v4542_v45 = vshrl.u32 %v4453_v43, 16 }
 0x2d2   : > { %v4474_v41 = vrot.slane %v4472_v47, 4  ;;  %v4477_v10 = vrot.slane %v4475_v11, 5  ;;  %v4450_v47 = vld [vmem:[#allocation2 + $0x50] sm:$0x1] }
 0x2d3   : > { %6415 = vmatpush3.bf16.msra.mxu1 %v6777_v37  ;;  %v4463_v37 = vrot.slane %v4461_v27, 5  ;;  %v4523_v22 = vshll.u32 %v4450_v47, 16 }
 0x2d4   : > { %6424 = vmatprep.subr.bf16.mxu1 %v6778_v35  ;;  %v4478_v51 = vor.u32 %v4477_v10, %v4474_v41  ;;  %v4495_v10 = vshll.u32 %v4446_v36, 16  ;;  %v6806_v36 = vld [vmem:[%s6918_s14 + $0x110] ss:$8 sps:$4 sm:$0xff]  }
 0x2d5   : > { %v4464_v46 = vor.u32 %v4463_v37, %v4460_v32  ;;  %v6797_v32 = vld [vmem:[%s8140_s3 + $0x238] sm:$0xff]  }
 0x2d6   : > { %6417 = vmatmul.mubr.bf16.vlgmr.msra.gmra.mrb[20].mxu1 %v5593_v15  ;;  %v4479_v19 = vrot.slane %v4478_v51, 4  ;;  %v4514_v15 = vshrl.u32 %v4449_v17, 16 }
 0x2d7   : > { %6420 = vmatprep.mubr.bf16.mxu1 %v5594_v24  ;;  %6425 = vmatpush3.bf16.msra.mxu1 %v6778_v35  ;;  %v4465_v33 = vrot.slane %v4464_v46, 4  ;;  %v4447_v35 = vld [vmem:[#allocation2 + $0x40] sm:$0xf]  ;;  %v4448_v24 = vld [vmem:[#allocation2 + $0x44] sm:$0x1]  ;;  %v4535_v46 = vrot.slane %v4534_v9, 4 }
 0x2d8   : > { %6426 = vmatprep.subr.bf16.mxu1 %v6779_v16  ;;  %v4484_v62 = vsel %vm7044_vm3, %v4479_v19, %v4483_v55  ;;  %v4500_v59 = vshrl.u32 %v4447_v35, 16  ;;  %v4503_v7 = vshll.u32 %v4447_v35, 16  ;;  %v4509_v49 = vshll.u32 %v4448_v24, 16 }
 0x2d9   : > { %v4470_v2 = vsel %vm7044_vm3, %v4465_v33, %v4469_v57  ;;  %v4497_v55 = vrot.slane %v4495_v10, 5  ;;  %v6798_v57 = vld [vmem:[%s8142_s5] sm:$0xff]  }
 0x2da   : > { %v5648_v29 = vcombine.low %v4470_v2, %v4484_v62  ;;  %v4502_v26 = vrot.slane %v4500_v59, 4  ;;  %v4505_v52 = vrot.slane %v4503_v7, 5  ;;  %v4511_v13 = vrot.slane %v4509_v49, 5  ;;  %v4454_v2 = vld [vmem:[#allocation2 + $0x68] sm:$0x1] }
 0x2db   : > { %6427 = vmatpush3.bf16.msra.mxu1 %v6779_v16  ;;  %v4551_v17 = vshll.u32 %v4454_v2, 16  ;;  %v5660_v49 = vld [vmem:[%s8141_s4] ss:$0 sm:$0xff] }
 0x2dc   : > { %6428 = vmatprep.subr.bf16.mxu1 %v6780_v30 }
 0x2de   : > { %6421 = vmatmul.mubr.bf16.gmra.mrb[24].mxu1 %v5595_v61  ;;  %v4491_v61 = vrot.slane %v4489_v56, 5  ;;  %v6799_v56 = vld [vmem:[%s8142_s5 + $0x8] sm:$0xff]  }
 0x2df   : > { %6429 = vmatpush3.bf16.msra.mxu1 %v6780_v30  ;;  %6440 = vmatprep.mubr.bf16.mxu1 %v5620_v1  ;;  %v4455_v30 = vld [vmem:[#allocation2 + $0x70] sm:$0xf] }
 0x2e0   : > { %6430 = vmatprep.subr.bf16.mxu1 %v6782_v42  ;;  %v6796_v1 = vld [vmem:[%s8140_s3 + $0x230] sm:$0xff]   ;;  %v4556_v11 = vshrl.u32 %v4455_v30, 16  ;;  %v4492_v41 = vor.u32 %v4491_v61, %v4488_v40  ;;  %v6801_v61 = vld [vmem:[%s8142_s5 + $0x18] sm:$0xff]  }
 0x2e2   : > { %v4493_v19 = vrot.slane %v4492_v41, 4 }
 0x2e3   : > { %6431 = vmatpush3.bf16.msra.mxu1 %v6782_v42  ;;  %v4452_v42 = vld [vmem:[#allocation2 + $0x5c] sm:$0x1] }
 0x2e4   : > { %6432 = vmatprep.subr.bf16.mxu1 %v6783_v44  ;;  %v4537_v27 = vshll.u32 %v4452_v42, 16  ;;  %v4498_v59 = vsel %vm7044_vm3, %v4493_v19, %v4497_v55  ;;  %v6802_v42 = vld [vmem:[%s8142_s5 + $0x20] sm:$0xff]  }
 0x2e6   : > { %v4539_v21 = vrot.slane %v4537_v27, 5 }
 0x2e7   : > { %6433 = vmatpush3.bf16.msra.mxu1 %v6783_v44  ;;  %v4516_v44 = vrot.slane %v4514_v15, 4 }
 0x2e8   : > { %6434 = vmatprep.subr.bf16.mxu1 %v6784_v48 }
 0x2eb   : > { %6435 = vmatpush3.bf16.msra.mxu1 %v6784_v48  ;;  %v4519_v48 = vrot.slane %v4517_v18, 5 }
 0x2ec   : > { %6436 = vmatprep.subr.bf16.mxu1 %v6785_v38 }
 0x2ed   : > { %v4520_v37 = vor.u32 %v4519_v48, %v4516_v44  ;;  %v6805_v44 = vld [vmem:[%s8142_s5 + $0x38] sm:$0xff]   ;;  %v6807_v48 = vld [vmem:[%s6918_s14 + $0x120] ss:$8 sps:$4 sm:$0xff]  }
 0x2ef   : > { %6437 = vmatpush3.bf16.msra.mxu1 %v6785_v38  ;;  %v4506_v38 = vor.u32 %v4505_v52, %v4502_v26  ;;  %v4521_v62 = vrot.slane %v4520_v37, 4  ;;  %v4553_v52 = vrot.slane %v4551_v17, 5 }
 0x2f0   : > { %6438 = vmatprep.subr.bf16.mxu1 %v6786_v0 }
 0x2f1   : > { %v4507_v51 = vrot.slane %v4506_v38, 4  ;;  %v6809_v38 = vld [vmem:[%s6918_s14 + $0x140] ss:$8 sps:$4 sm:$0xff]  }
 0x2f3   : > { %6439 = vmatpush3.bf16.msra.mxu1 %v6786_v0  ;;  %v4559_v0 = vshll.u32 %v4455_v30, 16 }
 0x2f4   : > { %6448 = vmatprep.subr.bf16.mxu1 %v6788_v6 }
 0x2f6   : > { %6441 = vmatmul.mubr.bf16.vlgmr.msra.gmra.mrb[20].mxu1 %v5621_v53  ;;  %v4558_v53 = vrot.slane %v4556_v11, 4 }
 0x2f7   : > { %6444 = vmatprep.mubr.bf16.mxu1 %v5622_v28  ;;  %6449 = vmatpush3.bf16.msra.mxu1 %v6788_v6  ;;  %v4545_v6 = vshll.u32 %v4453_v43, 16  ;;  %v4456_v28 = vld [vmem:[#allocation2 + $0x74] sm:$0x1]  ;;  %v6808_v43 = vld [vmem:[%s6918_s14 + $0x130] ss:$8 sps:$4 sm:$0xff]  }
 0x2f8   : > { %6450 = vmatprep.subr.bf16.mxu1 %v6790_v34  ;;  %v4565_v35 = vshll.u32 %v4456_v28, 16 }
 0x2f9   : > { %v4547_v33 = vrot.slane %v4545_v6, 5 }
 0x2fa   : > { %v4567_v24 = vrot.slane %v4565_v35, 5 }
 0x2fb   : > { %6451 = vmatpush3.bf16.msra.mxu1 %v6790_v34  ;;  %v4561_v34 = vrot.slane %v4559_v0, 5  ;;  %v5669_v0 = vld [vmem:[%s8143_s6] ss:$0 sm:$0xff] }
 0x2fc   : > { %6452 = vmatprep.subr.bf16.mxu1 %v6792_v31 }
 0x2fe   : > { %6445 = vmatmul.mubr.bf16.gmra.mrb[24].mxu1 %v5623_v63  ;;  %v4525_v63 = vrot.slane %v4523_v22, 5 }
 0x2ff   : > { %6453 = vmatpush3.bf16.msra.mxu1 %v6792_v31  ;;  %6464 = vmatprep.mubr.bf16.mxu1 %v5648_v29  ;;  %v4544_v31 = vrot.slane %v4542_v45, 4  ;;  %v4562_v29 = vor.u32 %v4561_v34, %v4558_v53 }
 0x300   : > { %6454 = vmatprep.subr.bf16.mxu1 %v6793_v4  ;;  %v4526_v20 = vsel %vm7044_vm3, %v4521_v62, %v4525_v63 }
 0x301   : > { %v4548_v7 = vor.u32 %v4547_v33, %v4544_v31  ;;  %v4563_v18 = vrot.slane %v4562_v29, 4 }
 0x303   : > { %v8035_v12 = vpop.f32.mrb[160].mxu0  ;;  %6455 = vmatpush3.bf16.msra.mxu1 %v6793_v4  ;;  %v4512_v4 = vsel %vm7044_vm3, %v4507_v51, %v4511_v13  ;;  %v4549_v26 = vrot.slane %v4548_v7, 4  ;;  %v4568_v39 = vsel %vm7044_vm3, %v4563_v18, %v4567_v24 }
 0x304   : > { %v8037_v50 = vpop.f32.mrb[161].mxu0  ;;  %6456 = vmatprep.subr.bf16.mxu1 %v6794_v25  ;;  %v5649_v3 = vcombine.low %v4498_v59, %v4512_v4  ;;  %v6496_v9 = vadd.f32 %v8035_v12, %v5660_v49 }
 0x305   : > { %v8042_v16 = vpop.f32.mrb[162].mxu0  ;;  %v4554_v30 = vsel %vm7044_vm3, %v4549_v26, %v4553_v52  ;;  %v6499_v27 = vadd.f32 %v5660_v49, %v8037_v50 }
 0x306   : > { %v8044_v60 = vpop.f32.mrb[163].mxu0  ;;  %v5651_v40 = vcombine.low %v4554_v30, %v4568_v39  ;;  %v6502_v47 = vadd.f32 %v8042_v16, %v5660_v49 }
 0x307   : > { %6457 = vmatpush3.bf16.msra.mxu1 %v6794_v25  ;;  %v4540_v25 = vsel %vm7044_vm3, %v4535_v46, %v4539_v21  ;;  %v6505_v11 = vadd.f32 %v5660_v49, %v8044_v60 }
 0x308   : > { %6458 = vmatprep.subr.bf16.mxu1 %v6795_v14  ;;  %v5650_v15 = vcombine.low %v4526_v20, %v4540_v25  ;;  %v6503_v6 = vadd.f32 %v6502_v47, %v5669_v0 }
 0x309   : > { %v6506_v22 = vadd.f32 %v6505_v11, %v5669_v0 }
 0x30b   : > { %6459 = vmatpush3.bf16.msra.mxu1 %v6795_v14 }
 0x30c   : > { %6460 = vmatprep.subr.bf16.mxu1 %v6796_v1 }
 0x30f   : > { %6461 = vmatpush3.bf16.msra.mxu1 %v6796_v1  ;;  %v6804_v1 = vld [vmem:[%s8142_s5 + $0x30] sm:$0xff]  }
 0x310   : > { %6462 = vmatprep.subr.bf16.mxu1 %v6797_v32 }
 0x312   : > { %v8057_v54 = vpop.f32.mrb[164].mxu0 }
 0x313   : > { %6463 = vmatpush3.bf16.msra.mxu1 %v6797_v32  ;;  %v8061_v23 = vpop.f32.mrb[165].mxu0  ;;  %v6508_v16 = vadd.f32 %v8057_v54, %v5660_v49 }
 0x314   : > { %v8065_v5 = vpop.f32.mrb[166].mxu0  ;;  %6472 = vmatprep.subr.bf16.mxu1 %v6798_v57  ;;  %v6511_v53 = vadd.f32 %v5660_v49, %v8061_v23 }
 0x315   : > { %v8072_v14 = vpop.f32.mrb[167].mxu0  ;;  %v6514_v34 = vadd.f32 %v8065_v5, %v5660_v49  ;;  %v6509_v31 = vadd.f32 %v6508_v16, %v5669_v0 }
 0x316   : > { %6465 = vmatmul.mubr.bf16.vlgmr.msra.gmra.mrb[20].mxu1 %v5649_v3  ;;  %v6517_v28 = vadd.f32 %v5660_v49, %v8072_v14 }
 0x317   : > { %6468 = vmatprep.mubr.bf16.mxu1 %v5650_v15  ;;  %6473 = vmatpush3.bf16.msra.mxu1 %v6798_v57  ;;  %v6512_v57 = vadd.f32 %v6511_v53, %v5669_v0  ;;  %v6515_v2 = vadd.f32 %v6514_v34, %v5669_v0 }
 0x318   : > { %6474 = vmatprep.subr.bf16.mxu1 %v6799_v56  ;;  %v6518_v35 = vadd.f32 %v6517_v28, %v5669_v0 }
 0x31b   : > { %6475 = vmatpush3.bf16.msra.mxu1 %v6799_v56 }
 0x31c   : > { %6476 = vmatprep.subr.bf16.mxu1 %v6800_v58 }
 0x31e   : > { %6469 = vmatmul.mubr.bf16.gmra.mrb[24].mxu1 %v5651_v40 }
 0x31f   : > { %6477 = vmatpush3.bf16.msra.mxu1 %v6800_v58  ;;  %6488 = vmatprep.mubr.bf16.mxu1 %v6806_v36 }
 0x320   : > { %6478 = vmatprep.subr.bf16.mxu1 %v6801_v61 }
 0x323   : > { %6479 = vmatpush3.bf16.msra.mxu1 %v6801_v61 }
 0x324   : > { %6480 = vmatprep.subr.bf16.mxu1 %v6802_v42 }
 0x327   : > { %6481 = vmatpush3.bf16.msra.mxu1 %v6802_v42 }
 0x328   : > { %6482 = vmatprep.subr.bf16.mxu1 %v6803_v8 }
 0x32b   : > { %6483 = vmatpush3.bf16.msra.mxu1 %v6803_v8 }
 0x32c   : > { %6484 = vmatprep.subr.bf16.mxu1 %v6804_v1 }
 0x32f   : > { %6485 = vmatpush3.bf16.msra.mxu1 %v6804_v1 }
 0x330   : > { %6486 = vmatprep.subr.bf16.mxu1 %v6805_v44 }
 0x333   : > { %6487 = vmatpush3.bf16.msra.mxu1 %v6805_v44 }
 0x336   : > { %6489 = vmatmul.mubr.bf16.vlgmr.msra.gmra.mrb[20].mxu1 %v6807_v48 }
 0x337   : > { %6492 = vmatprep.mubr.bf16.mxu1 %v6808_v43 }
 0x33e   : > { %6493 = vmatmul.mubr.bf16.gmra.mrb[24].mxu1 %v6809_v38 }
 0x409   : > { %v6490_v41 = vpop.f32.mrb[20].mxu1 }
 0x40a   : > { %v6497_v10 = vadd.f32 %v6496_v9, %v6490_v41  ;;  %v4879_v45 = vpop.f32.mrb[21].mxu1 }
 0x40b   : > { %v6500_v32 = vadd.f32 %v6499_v27, %v4879_v45  ;;  %v6491_v37 = vpop.f32.mrb[22].mxu1 }
 0x40c   : > { %v6498_v51 = vadd.f32 %v6497_v10, %v5669_v0  ;;  %v6504_v60 = vadd.f32 %v6503_v6, %v6491_v37  ;;  %v4882_v13 = vpop.f32.mrb[23].mxu1 }
 0x40d   : > { %v6501_v12 = vadd.f32 %v6500_v32, %v5669_v0  ;;  %v6507_v50 = vadd.f32 %v6506_v22, %v4882_v13 }
 0x40e   : > { %v4920_v46 = vmax.f32 %v6498_v51, 0.0  ;;  %v4921_v21 = vmax.f32 %v6504_v60, 0.0 }
 0x40f   : > { %v4918_v19 = vmax.f32 %v6501_v12, 0.0  ;;  %v4919_v55 = vmax.f32 %v6507_v50, 0.0 }
 0x410   : > { %4928 = vst [vmem:[%s8116_s15 + $0x10] sm:$0xff] %v4920_v46  ;;  %4929 = vst [vmem:[%s8116_s15 + $0x18] sm:$0xff] %v4921_v21 }
 0x411   : > { %4926 = vst [vmem:[%s8116_s15] sm:$0xff] %v4918_v19  ;;  %4927 = vst [vmem:[%s8116_s15 + $0x8] sm:$0xff] %v4919_v55  ;;  %v6494_v33 = vpop.f32.mrb[24].mxu1 }
 0x412   : > { %v6510_v62 = vadd.f32 %v6509_v31, %v6494_v33  ;;  %v4895_v63 = vpop.f32.mrb[25].mxu1 }
 0x413   : > { %v6513_v4 = vadd.f32 %v6512_v57, %v4895_v63  ;;  %v6495_v29 = vpop.f32.mrb[26].mxu1 }
 0x414   : > { %v4924_v54 = vmax.f32 %v6510_v62, 0.0  ;;  %v6516_v25 = vadd.f32 %v6515_v2, %v6495_v29  ;;  %v4898_v23 = vpop.f32.mrb[27].mxu1 }
 0x415   : > { %v4922_v59 = vmax.f32 %v6513_v4, 0.0  ;;  %v6519_v7 = vadd.f32 %v6518_v35, %v4898_v23 }
 0x416   : > { %4932 = vst [vmem:[%s8116_s15 + $0x30] sm:$0xff] %v4924_v54  ;;  %v4925_v17 = vmax.f32 %v6516_v25, 0.0 }
 0x417   : > { %4930 = vst [vmem:[%s8116_s15 + $0x20] sm:$0xff] %v4922_v59  ;;  %v4923_v5 = vmax.f32 %v6519_v7, 0.0 }
 0x418   : > { %4933 = vst [vmem:[%s8116_s15 + $0x38] sm:$0xff] %v4925_v17 }
 0x419   : > { %4931 = vst [vmem:[%s8116_s15 + $0x28] sm:$0xff] %v4923_v5 }
 0x41a PF: > { %s17_s26 = sadd.s32 1, %s6832_s26   ;;  %s8153_s24 = smov %s6828_s25 }
 0x41b   : > { %p14_p5 = scmp.ge.s32.totalorder %s17_s26, 4   ;;  %s8154_s25 = smov %s8156_s27 }
 0x41d   :  { %16 = sbr.rel (!%p14_p5) target bundleno = 2 (0x2), region = 112 }

</bundles_post_ra>
